<compile_context>
chip_gen: v6e
topology: v6e:2x2x1
jax: 0.10.0
libtpu: 0.0.40
codegen_flags: <defaults>
</compile_context>

<pallas_src>
import jax
import jax.numpy as jnp
from jax.experimental import pallas as pl
from jax.experimental.pallas import tpu as pltpu


def _residual_block_kernel(x_ref, s1_ref, b1_ref, w1_ref, s2_ref, b2_ref, w2_ref,
                           o_ref, pad_ref):
    _, H, W, C = x_ref.shape
    Cout = o_ref.shape[-1]

    # Zero the padded scratch ONCE per grid step (VMEM scratch is not zero-initialized
    # and persists across grid steps / invocations). The interior is overwritten before
    # every read, so only the halo border actually has to stay zero after this.
    pad_ref[...] = jnp.zeros_like(pad_ref)

    def conv3x3(y, w_ref):
        # Zero-padded 3x3 conv, stride 1, as ONE (H*W, 9*cin) @ (9*cin, cout) matmul.
        cin = y.shape[-1]
        cout = w_ref.shape[-1]
        pad_ref[1:H + 1, 1:W + 1, :] = y                      # write interior only
        # im2col: concatenate the 9 shifted windows along the lane (channel) axis.
        patches = [pad_ref[kh:kh + H, kw:kw + W, :]           # (H, W, cin) each
                   for kh in range(3) for kw in range(3)]
        slab = jnp.concatenate(patches, axis=-1)              # (H, W, 9*cin)
        out = jnp.dot(slab.reshape(H * W, 9 * cin), w_ref[...],
                      preferred_element_type=jnp.float32)     # single MXU matmul
        return out.reshape(H, W, cout)

    # bn1 (folded running-stats affine) + relu, then conv1
    y1 = jnp.maximum(x_ref[0] * s1_ref[...] + b1_ref[...], 0.0)
    h1 = conv3x3(y1, w1_ref)
    # bn2 + relu, then conv2
    y2 = jnp.maximum(h1 * s2_ref[...] + b2_ref[...], 0.0)
    h2 = conv3x3(y2, w2_ref)
    # identity residual add (downsample=False); re-read x instead of holding it live.
    o_ref[0] = (h2 + x_ref[0]).astype(o_ref.dtype)


def residual_block_pallas(x_nhwc, scale1, shift1, w1_hwio, scale2, shift2, w2_hwio):
    N, H, W, C = x_nhwc.shape
    Cout = w1_hwio.shape[-1]
    # The shared pad scratch (and the identity shortcut) rely on C == Cout.
    assert Cout == C, "identity-shortcut path requires in_channels == out_channels"

    # Weight prep: HWIO (3,3,cin,cout) -> im2col matrix (9*cin, cout); row order is
    # (kh, kw, cin), matching the patch concatenation order inside the kernel.
    w1_im2col = w1_hwio.reshape(9 * C, Cout)
    w2_im2col = w2_hwio.reshape(9 * Cout, Cout)
    s1 = scale1.reshape(1, 1, C)
    b1 = shift1.reshape(1, 1, C)
    s2 = scale2.reshape(1, 1, Cout)
    b2 = shift2.reshape(1, 1, Cout)

    def _full(shape):
        # Whole-array block, resident across grid steps (constant block index).
        return pl.BlockSpec(shape, lambda n: (0,) * len(shape))

    return pl.pallas_call(
        _residual_block_kernel,
        out_shape=jax.ShapeDtypeStruct((N, H, W, Cout), jnp.float32),
        grid_spec=pltpu.PrefetchScalarGridSpec(
            num_scalar_prefetch=0,
            grid=(N,),                                        # one batch image per step
            in_specs=[
                pl.BlockSpec((1, H, W, C), lambda n: (n, 0, 0, 0)),
                _full((1, 1, C)), _full((1, 1, C)), _full((9 * C, Cout)),
                _full((1, 1, Cout)), _full((1, 1, Cout)), _full((9 * Cout, Cout)),
            ],
            out_specs=pl.BlockSpec((1, H, W, Cout), lambda n: (n, 0, 0, 0)),
            scratch_shapes=[pltpu.VMEM((H + 2, W + 2, C), jnp.float32)],
        ),
        compiler_params=pltpu.CompilerParams(
            dimension_semantics=("parallel",)),
    )(x_nhwc, s1, b1, w1_im2col, s2, b2, w2_im2col)


def _fold_bn(gamma, beta, mean, var, eps=1e-5):
    scale = gamma / jnp.sqrt(var + eps)
    shift = beta - mean * scale
    return scale, shift        # per-channel (C,)


def _reference(x_nhwc, scale1, shift1, w1, scale2, shift2, w2):
    dn = ('NHWC', 'HWIO', 'NHWC')
    y = jnp.maximum(x_nhwc * scale1 + shift1, 0.0)
    y = jax.lax.conv_general_dilated(y, w1, (1, 1), 'SAME', dimension_numbers=dn)
    y = jnp.maximum(y * scale2 + shift2, 0.0)
    y = jax.lax.conv_general_dilated(y, w2, (1, 1), 'SAME', dimension_numbers=dn)
    return y + x_nhwc


if __name__ == "__main__":
    key = jax.random.PRNGKey(0)
    ks = jax.random.split(key, 12)

    # PyTorch-side shapes: x is NCHW, conv weights are OIHW, BN params per-channel.
    N, C, H, W = 2, 4, 16, 16
    x_nchw = jax.random.normal(ks[0], (N, C, H, W), jnp.float32)

    w1_oihw = jax.random.normal(ks[1], (C, C, 3, 3), jnp.float32) * 0.2
    w2_oihw = jax.random.normal(ks[2], (C, C, 3, 3), jnp.float32) * 0.2

    g1 = 1.0 + 0.1 * jax.random.normal(ks[3], (C,), jnp.float32)
    b1 = 0.1 * jax.random.normal(ks[4], (C,), jnp.float32)
    m1 = 0.1 * jax.random.normal(ks[5], (C,), jnp.float32)
    v1 = jax.random.uniform(ks[6], (C,), jnp.float32, minval=0.5, maxval=1.5)

    g2 = 1.0 + 0.1 * jax.random.normal(ks[7], (C,), jnp.float32)
    b2 = 0.1 * jax.random.normal(ks[8], (C,), jnp.float32)
    m2 = 0.1 * jax.random.normal(ks[9], (C,), jnp.float32)
    v2 = jax.random.uniform(ks[10], (C,), jnp.float32, minval=0.5, maxval=1.5)

    # Glue: NCHW -> NHWC, OIHW -> HWIO, fold BN running stats into scale/shift.
    x_nhwc = jnp.transpose(x_nchw, (0, 2, 3, 1))
    w1_hwio = jnp.transpose(w1_oihw, (2, 3, 1, 0))
    w2_hwio = jnp.transpose(w2_oihw, (2, 3, 1, 0))
    s1, sh1 = _fold_bn(g1, b1, m1, v1)
    s2, sh2 = _fold_bn(g2, b2, m2, v2)

    out = residual_block_pallas(x_nhwc, s1, sh1, w1_hwio, s2, sh2, w2_hwio)
    out = jax.block_until_ready(out)

    ref = _reference(x_nhwc, s1, sh1, w1_hwio, s2, sh2, w2_hwio)
    assert out.shape == (N, H, W, C)
    assert jnp.allclose(out, ref, atol=1e-4, rtol=1e-4), "mismatch vs pure-JAX reference"

    print("KERNEL_OK")
</pallas_src>

<mosaic_0001>
module attributes {stable_mosaic.version = 11 : i64} {
  func.func @_residual_block_kernel(%arg0: i32, %arg1: memref<1x16x16x4xf32, #tpu.memory_space<vmem>>, %arg2: memref<1x1x4xf32, #tpu.memory_space<vmem>>, %arg3: memref<1x1x4xf32, #tpu.memory_space<vmem>>, %arg4: memref<36x4xf32, #tpu.memory_space<vmem>>, %arg5: memref<1x1x4xf32, #tpu.memory_space<vmem>>, %arg6: memref<1x1x4xf32, #tpu.memory_space<vmem>>, %arg7: memref<36x4xf32, #tpu.memory_space<vmem>>, %arg8: memref<1x16x16x4xf32, #tpu.memory_space<vmem>>, %arg9: memref<18x18x4xf32, #tpu.memory_space<vmem>>) attributes {dimension_semantics = [#tpu.dimension_semantics<parallel>], iteration_bounds = array<i64: 2>, scalar_prefetch = 0 : i64, scratch_operands = 1 : i64, tpu.core_type = #tpu.core_type<tc>, window_params = [{transform_indices = @transform_0, window_bounds = array<i64: 1, 16, 16, 4>}, {pipeline_mode = #tpu.pipeline_mode<synchronous>, transform_indices = @transform_1, window_bounds = array<i64: 1, 1, 4>}, {pipeline_mode = #tpu.pipeline_mode<synchronous>, transform_indices = @transform_2, window_bounds = array<i64: 1, 1, 4>}, {pipeline_mode = #tpu.pipeline_mode<synchronous>, transform_indices = @transform_3, window_bounds = array<i64: 36, 4>}, {pipeline_mode = #tpu.pipeline_mode<synchronous>, transform_indices = @transform_4, window_bounds = array<i64: 1, 1, 4>}, {pipeline_mode = #tpu.pipeline_mode<synchronous>, transform_indices = @transform_5, window_bounds = array<i64: 1, 1, 4>}, {pipeline_mode = #tpu.pipeline_mode<synchronous>, transform_indices = @transform_6, window_bounds = array<i64: 36, 4>}, {transform_indices = @transform_7, window_bounds = array<i64: 1, 16, 16, 4>}]} {
    %cst = arith.constant 0.000000e+00 : f32
    %0 = vector.broadcast %cst : f32 to vector<18x18x4xf32>
    %c0 = arith.constant 0 : index
    %c0_0 = arith.constant 0 : index
    %c0_1 = arith.constant 0 : index
    %1 = vector.load %arg9[%c0, %c0_0, %c0_1] : memref<18x18x4xf32, #tpu.memory_space<vmem>>, vector<18x18x4xf32>
    tpu.vector_store %arg9[%c0, %c0_0, %c0_1], %0 {strides = array<i32>} : memref<18x18x4xf32, #tpu.memory_space<vmem>>, vector<18x18x4xf32>,
    %c0_2 = arith.constant 0 : index
    %c0_3 = arith.constant 0 : index
    %c0_4 = arith.constant 0 : index
    %c0_5 = arith.constant 0 : index
    %2 = vector.load %arg1[%c0_2, %c0_3, %c0_4, %c0_5] : memref<1x16x16x4xf32, #tpu.memory_space<vmem>>, vector<1x16x16x4xf32>
    %3 = vector.shape_cast %2 : vector<1x16x16x4xf32> to vector<16x16x4xf32>
    %c0_6 = arith.constant 0 : index
    %c0_7 = arith.constant 0 : index
    %c0_8 = arith.constant 0 : index
    %4 = vector.load %arg2[%c0_6, %c0_7, %c0_8] : memref<1x1x4xf32, #tpu.memory_space<vmem>>, vector<1x1x4xf32>
    %5 = vector.broadcast %4 : vector<1x1x4xf32> to vector<16x16x4xf32>
    %6 = arith.mulf %3, %5 : vector<16x16x4xf32>
    %c0_9 = arith.constant 0 : index
    %c0_10 = arith.constant 0 : index
    %c0_11 = arith.constant 0 : index
    %7 = vector.load %arg3[%c0_9, %c0_10, %c0_11] : memref<1x1x4xf32, #tpu.memory_space<vmem>>, vector<1x1x4xf32>
    %8 = vector.broadcast %7 : vector<1x1x4xf32> to vector<16x16x4xf32>
    %9 = arith.addf %6, %8 : vector<16x16x4xf32>
    %cst_12 = arith.constant 0.000000e+00 : f32
    %10 = vector.broadcast %cst_12 : f32 to vector<16x16x4xf32>
    %11 = arith.maximumf %9, %10 : vector<16x16x4xf32>
    %c1 = arith.constant 1 : index
    %c1_13 = arith.constant 1 : index
    %c0_14 = arith.constant 0 : index
    %12 = vector.load %arg9[%c1, %c1_13, %c0_14] : memref<18x18x4xf32, #tpu.memory_space<vmem>>, vector<16x16x4xf32>
    tpu.vector_store %arg9[%c1, %c1_13, %c0_14], %11 {strides = array<i32>} : memref<18x18x4xf32, #tpu.memory_space<vmem>>, vector<16x16x4xf32>,
    %c0_15 = arith.constant 0 : index
    %c0_16 = arith.constant 0 : index
    %c0_17 = arith.constant 0 : index
    %13 = vector.load %arg9[%c0_15, %c0_16, %c0_17] : memref<18x18x4xf32, #tpu.memory_space<vmem>>, vector<16x16x4xf32>
    %c0_18 = arith.constant 0 : index
    %c1_19 = arith.constant 1 : index
    %c0_20 = arith.constant 0 : index
    %14 = vector.load %arg9[%c0_18, %c1_19, %c0_20] : memref<18x18x4xf32, #tpu.memory_space<vmem>>, vector<16x16x4xf32>
    %c0_21 = arith.constant 0 : index
    %c2 = arith.constant 2 : index
    %c0_22 = arith.constant 0 : index
    %15 = vector.load %arg9[%c0_21, %c2, %c0_22] : memref<18x18x4xf32, #tpu.memory_space<vmem>>, vector<16x16x4xf32>
    %c1_23 = arith.constant 1 : index
    %c0_24 = arith.constant 0 : index
    %c0_25 = arith.constant 0 : index
    %16 = vector.load %arg9[%c1_23, %c0_24, %c0_25] : memref<18x18x4xf32, #tpu.memory_space<vmem>>, vector<16x16x4xf32>
    %c1_26 = arith.constant 1 : index
    %c1_27 = arith.constant 1 : index
    %c0_28 = arith.constant 0 : index
    %17 = vector.load %arg9[%c1_26, %c1_27, %c0_28] : memref<18x18x4xf32, #tpu.memory_space<vmem>>, vector<16x16x4xf32>
    %c1_29 = arith.constant 1 : index
    %c2_30 = arith.constant 2 : index
    %c0_31 = arith.constant 0 : index
    %18 = vector.load %arg9[%c1_29, %c2_30, %c0_31] : memref<18x18x4xf32, #tpu.memory_space<vmem>>, vector<16x16x4xf32>
    %c2_32 = arith.constant 2 : index
    %c0_33 = arith.constant 0 : index
    %c0_34 = arith.constant 0 : index
    %19 = vector.load %arg9[%c2_32, %c0_33, %c0_34] : memref<18x18x4xf32, #tpu.memory_space<vmem>>, vector<16x16x4xf32>
    %c2_35 = arith.constant 2 : index
    %c1_36 = arith.constant 1 : index
    %c0_37 = arith.constant 0 : index
    %20 = vector.load %arg9[%c2_35, %c1_36, %c0_37] : memref<18x18x4xf32, #tpu.memory_space<vmem>>, vector<16x16x4xf32>
    %c2_38 = arith.constant 2 : index
    %c2_39 = arith.constant 2 : index
    %c0_40 = arith.constant 0 : index
    %21 = vector.load %arg9[%c2_38, %c2_39, %c0_40] : memref<18x18x4xf32, #tpu.memory_space<vmem>>, vector<16x16x4xf32>
    %22 = tpu.concatenate %13, %14, %15, %16, %17, %18, %19, %20, %21 in 2 : vector<16x16x4xf32>, vector<16x16x4xf32>, vector<16x16x4xf32>, vector<16x16x4xf32>, vector<16x16x4xf32>, vector<16x16x4xf32>, vector<16x16x4xf32>, vector<16x16x4xf32>, vector<16x16x4xf32> -> vector<16x16x36xf32>
    %23 = vector.shape_cast %22 : vector<16x16x36xf32> to vector<256x36xf32>
    %c0_41 = arith.constant 0 : index
    %c0_42 = arith.constant 0 : index
    %24 = vector.load %arg4[%c0_41, %c0_42] : memref<36x4xf32, #tpu.memory_space<vmem>>, vector<36x4xf32>
    %cst_43 = arith.constant dense<0.000000e+00> : vector<256x4xf32>
    %25 = tpu.matmul %23, %24, %cst_43 {dimension_numbers = #tpu.dot_dimension_numbers<[1], [0], [0], [1], [0, 0, 1, 1], [], []>} : vector<256x36xf32>, vector<36x4xf32>, vector<256x4xf32> -> vector<256x4xf32>
    %26 = vector.shape_cast %25 : vector<256x4xf32> to vector<16x16x4xf32>
    %c0_44 = arith.constant 0 : index
    %c0_45 = arith.constant 0 : index
    %c0_46 = arith.constant 0 : index
    %27 = vector.load %arg5[%c0_44, %c0_45, %c0_46] : memref<1x1x4xf32, #tpu.memory_space<vmem>>, vector<1x1x4xf32>
    %28 = vector.broadcast %27 : vector<1x1x4xf32> to vector<16x16x4xf32>
    %29 = arith.mulf %26, %28 : vector<16x16x4xf32>
    %c0_47 = arith.constant 0 : index
    %c0_48 = arith.constant 0 : index
    %c0_49 = arith.constant 0 : index
    %30 = vector.load %arg6[%c0_47, %c0_48, %c0_49] : memref<1x1x4xf32, #tpu.memory_space<vmem>>, vector<1x1x4xf32>
    %31 = vector.broadcast %30 : vector<1x1x4xf32> to vector<16x16x4xf32>
    %32 = arith.addf %29, %31 : vector<16x16x4xf32>
    %cst_50 = arith.constant 0.000000e+00 : f32
    %33 = vector.broadcast %cst_50 : f32 to vector<16x16x4xf32>
    %34 = arith.maximumf %32, %33 : vector<16x16x4xf32>
    %c1_51 = arith.constant 1 : index
    %c1_52 = arith.constant 1 : index
    %c0_53 = arith.constant 0 : index
    %35 = vector.load %arg9[%c1_51, %c1_52, %c0_53] : memref<18x18x4xf32, #tpu.memory_space<vmem>>, vector<16x16x4xf32>
    tpu.vector_store %arg9[%c1_51, %c1_52, %c0_53], %34 {strides = array<i32>} : memref<18x18x4xf32, #tpu.memory_space<vmem>>, vector<16x16x4xf32>,
    %c0_54 = arith.constant 0 : index
    %c0_55 = arith.constant 0 : index
    %c0_56 = arith.constant 0 : index
    %36 = vector.load %arg9[%c0_54, %c0_55, %c0_56] : memref<18x18x4xf32, #tpu.memory_space<vmem>>, vector<16x16x4xf32>
    %c0_57 = arith.constant 0 : index
    %c1_58 = arith.constant 1 : index
    %c0_59 = arith.constant 0 : index
    %37 = vector.load %arg9[%c0_57, %c1_58, %c0_59] : memref<18x18x4xf32, #tpu.memory_space<vmem>>, vector<16x16x4xf32>
    %c0_60 = arith.constant 0 : index
    %c2_61 = arith.constant 2 : index
    %c0_62 = arith.constant 0 : index
    %38 = vector.load %arg9[%c0_60, %c2_61, %c0_62] : memref<18x18x4xf32, #tpu.memory_space<vmem>>, vector<16x16x4xf32>
    %c1_63 = arith.constant 1 : index
    %c0_64 = arith.constant 0 : index
    %c0_65 = arith.constant 0 : index
    %39 = vector.load %arg9[%c1_63, %c0_64, %c0_65] : memref<18x18x4xf32, #tpu.memory_space<vmem>>, vector<16x16x4xf32>
    %c1_66 = arith.constant 1 : index
    %c1_67 = arith.constant 1 : index
    %c0_68 = arith.constant 0 : index
    %40 = vector.load %arg9[%c1_66, %c1_67, %c0_68] : memref<18x18x4xf32, #tpu.memory_space<vmem>>, vector<16x16x4xf32>
    %c1_69 = arith.constant 1 : index
    %c2_70 = arith.constant 2 : index
    %c0_71 = arith.constant 0 : index
    %41 = vector.load %arg9[%c1_69, %c2_70, %c0_71] : memref<18x18x4xf32, #tpu.memory_space<vmem>>, vector<16x16x4xf32>
    %c2_72 = arith.constant 2 : index
    %c0_73 = arith.constant 0 : index
    %c0_74 = arith.constant 0 : index
    %42 = vector.load %arg9[%c2_72, %c0_73, %c0_74] : memref<18x18x4xf32, #tpu.memory_space<vmem>>, vector<16x16x4xf32>
    %c2_75 = arith.constant 2 : index
    %c1_76 = arith.constant 1 : index
    %c0_77 = arith.constant 0 : index
    %43 = vector.load %arg9[%c2_75, %c1_76, %c0_77] : memref<18x18x4xf32, #tpu.memory_space<vmem>>, vector<16x16x4xf32>
    %c2_78 = arith.constant 2 : index
    %c2_79 = arith.constant 2 : index
    %c0_80 = arith.constant 0 : index
    %44 = vector.load %arg9[%c2_78, %c2_79, %c0_80] : memref<18x18x4xf32, #tpu.memory_space<vmem>>, vector<16x16x4xf32>
    %45 = tpu.concatenate %36, %37, %38, %39, %40, %41, %42, %43, %44 in 2 : vector<16x16x4xf32>, vector<16x16x4xf32>, vector<16x16x4xf32>, vector<16x16x4xf32>, vector<16x16x4xf32>, vector<16x16x4xf32>, vector<16x16x4xf32>, vector<16x16x4xf32>, vector<16x16x4xf32> -> vector<16x16x36xf32>
    %46 = vector.shape_cast %45 : vector<16x16x36xf32> to vector<256x36xf32>
    %c0_81 = arith.constant 0 : index
    %c0_82 = arith.constant 0 : index
    %47 = vector.load %arg7[%c0_81, %c0_82] : memref<36x4xf32, #tpu.memory_space<vmem>>, vector<36x4xf32>
    %cst_83 = arith.constant dense<0.000000e+00> : vector<256x4xf32>
    %48 = tpu.matmul %46, %47, %cst_83 {dimension_numbers = #tpu.dot_dimension_numbers<[1], [0], [0], [1], [0, 0, 1, 1], [], []>} : vector<256x36xf32>, vector<36x4xf32>, vector<256x4xf32> -> vector<256x4xf32>
    %49 = vector.shape_cast %48 : vector<256x4xf32> to vector<16x16x4xf32>
    %c0_84 = arith.constant 0 : index
    %c0_85 = arith.constant 0 : index
    %c0_86 = arith.constant 0 : index
    %c0_87 = arith.constant 0 : index
    %50 = vector.load %arg1[%c0_84, %c0_85, %c0_86, %c0_87] : memref<1x16x16x4xf32, #tpu.memory_space<vmem>>, vector<1x16x16x4xf32>
    %51 = vector.shape_cast %50 : vector<1x16x16x4xf32> to vector<16x16x4xf32>
    %52 = arith.addf %49, %51 : vector<16x16x4xf32>
    %c0_88 = arith.constant 0 : index
    %c0_89 = arith.constant 0 : index
    %c0_90 = arith.constant 0 : index
    %c0_91 = arith.constant 0 : index
    %53 = vector.load %arg8[%c0_88, %c0_89, %c0_90, %c0_91] : memref<1x16x16x4xf32, #tpu.memory_space<vmem>>, vector<1x16x16x4xf32>
    %54 = vector.shape_cast %53 : vector<1x16x16x4xf32> to vector<16x16x4xf32>
    %55 = vector.shape_cast %52 : vector<16x16x4xf32> to vector<1x16x16x4xf32>
    tpu.vector_store %arg8[%c0_88, %c0_89, %c0_90, %c0_91], %55 {strides = array<i32>} : memref<1x16x16x4xf32, #tpu.memory_space<vmem>>, vector<1x16x16x4xf32>,
    return
  }
  func.func @transform_0(%arg0: i32) -> (i32, i32, i32, i32) {
    %c0_i32 = arith.constant 0 : i32
    %c0_i32_0 = arith.constant 0 : i32
    %c0_i32_1 = arith.constant 0 : i32
    %c0_i32_2 = arith.constant 0 : i32
    return %arg0, %c0_i32, %c0_i32_0, %c0_i32_1 : i32, i32, i32, i32
  }
  func.func @transform_1(%arg0: i32) -> (i32, i32, i32) {
    %c0_i32 = arith.constant 0 : i32
    %c0_i32_0 = arith.constant 0 : i32
    %c0_i32_1 = arith.constant 0 : i32
    %c0_i32_2 = arith.constant 0 : i32
    return %c0_i32, %c0_i32_0, %c0_i32_1 : i32, i32, i32
  }
  func.func @transform_2(%arg0: i32) -> (i32, i32, i32) {
    %c0_i32 = arith.constant 0 : i32
    %c0_i32_0 = arith.constant 0 : i32
    %c0_i32_1 = arith.constant 0 : i32
    %c0_i32_2 = arith.constant 0 : i32
    return %c0_i32, %c0_i32_0, %c0_i32_1 : i32, i32, i32
  }
  func.func @transform_3(%arg0: i32) -> (i32, i32) {
    %c0_i32 = arith.constant 0 : i32
    %c0_i32_0 = arith.constant 0 : i32
    %c0_i32_1 = arith.constant 0 : i32
    return %c0_i32, %c0_i32_0 : i32, i32
  }
  func.func @transform_4(%arg0: i32) -> (i32, i32, i32) {
    %c0_i32 = arith.constant 0 : i32
    %c0_i32_0 = arith.constant 0 : i32
    %c0_i32_1 = arith.constant 0 : i32
    %c0_i32_2 = arith.constant 0 : i32
    return %c0_i32, %c0_i32_0, %c0_i32_1 : i32, i32, i32
  }
  func.func @transform_5(%arg0: i32) -> (i32, i32, i32) {
    %c0_i32 = arith.constant 0 : i32
    %c0_i32_0 = arith.constant 0 : i32
    %c0_i32_1 = arith.constant 0 : i32
    %c0_i32_2 = arith.constant 0 : i32
    return %c0_i32, %c0_i32_0, %c0_i32_1 : i32, i32, i32
  }
  func.func @transform_6(%arg0: i32) -> (i32, i32) {
    %c0_i32 = arith.constant 0 : i32
    %c0_i32_0 = arith.constant 0 : i32
    %c0_i32_1 = arith.constant 0 : i32
    return %c0_i32, %c0_i32_0 : i32, i32
  }
  func.func @transform_7(%arg0: i32) -> (i32, i32, i32, i32) {
    %c0_i32 = arith.constant 0 : i32
    %c0_i32_0 = arith.constant 0 : i32
    %c0_i32_1 = arith.constant 0 : i32
    %c0_i32_2 = arith.constant 0 : i32
    return %arg0, %c0_i32, %c0_i32_0, %c0_i32_1 : i32, i32, i32, i32
  }
}

</mosaic_0001>

<bundles_post_ra>
// kernel: tpu_custom_call.1
= control target key start
LH: loop header
LB: loop body
LE: loop exit
PB: predicated region body
PF: predicated region fallthrough
CT: control target
= control target key end

     0   :  { %s5001_s24 = smov 0   ;;  %s8083_s0 = inlined_call_operand.vmem [shape: f32[2,16,16,4], index: 0, kind: input, shape index: {}]   ;;  %s8084_s1 = inlined_call_operand.vmem [shape: f32[1,1,4], index: 1, kind: input, shape index: {}]   ;;  %s8085_s2 = inlined_call_operand.vmem [shape: f32[1,1,4], index: 2, kind: input, shape index: {}]   ;;  %s8086_s3 = inlined_call_operand.vmem [shape: f32[36,4], index: 3, kind: input, shape index: {}]   ;;  %s8087_s4 = inlined_call_operand.vmem [shape: f32[1,1,4], index: 4, kind: input, shape index: {}]   ;;  %s8088_s5 = inlined_call_operand.vmem [shape: f32[1,1,4], index: 5, kind: input, shape index: {}]   ;;  %s8089_s6 = inlined_call_operand.vmem [shape: f32[36,4], index: 6, kind: input, shape index: {}]   ;;  %s8090_s7 = inlined_call_operand.vmem [shape: f32[2,16,16,4], index: 7, kind: output, shape index: {}]  }
   0x1 LB: > { %s4607_s25 = sadd.s32 4294967295, %s4950_s24   ;;  %p4611_p0 = scmp.ge.s32.totalorder %s4950_s24, 1  ;;  %s4950_s24 = sphi %s5001_s24, %s17_s24  }
   0x2   : > { %p237_p1 = scmp.lt.s32.totalorder %s4950_s24, 3 }
   0x4   : > { %p238_p2 = pnand %p4611_p0, %p237_p1 }
   0x6   : > { %241 = sbr.rel (%p238_p2) target bundleno = 1635 (0x663), region = 48 }
   0xb   : > { %vm279_vm0 = vcmask 31744   ;;  %vm282_vm1 = vcmask 25600   ;;  %p5011_p3 = scmp.lt.s32.totalorder %s4607_s25, 1  ;;  %v4952_v0 = vmov 0.0   ;;  %v5079_v1 = vld [vmem:[%s8084_s1] ss:$0 sm:$0xff] }
   0xc   : > { %280 = vst.msk [vmem:[#allocation2] sm:$0xff] %vm279_vm0, %v4952_v0  ;;  %281 = vst.msk [vmem:[#allocation2 + $0x8] sm:$0xff] %vm279_vm0, %v4952_v0  ;;  %v5091_v2 = vld [vmem:[%s8085_s2] ss:$0 sm:$0xff]  ;;  %s4953_s12 = smov 4   ;;  %s4954_s13 = smov 8  }
   0xd   : > { %284 = vst.msk [vmem:[#allocation2 + $0x18] sm:$0xff] %vm279_vm0, %v4952_v0  ;;  %285 = vst.msk [vmem:[#allocation2 + $0x20] sm:$0xff] %vm279_vm0, %v4952_v0  ;;  %s8646_s25 = smov (!%p5011_p3, %s4607_s25), 1  ;;  %s4955_s14 = smov 12   ;;  %vm2188_vm2 = vcmask 1043456   ;;  %vm1855_vm3 = vcmask 64512  }
   0xe   : > { %287 = vst.msk [vmem:[#allocation2 + $0x30] sm:$0xff] %vm279_vm0, %v4952_v0  ;;  %288 = vst.msk [vmem:[#allocation2 + $0x38] sm:$0xff] %vm279_vm0, %v4952_v0  ;;  %s4688_s27 = sshll.u32 %s8646_s25, 8  ;;  %s4956_s15 = smov 16   ;;  %vm1888_vm4 = vcmask 97280   ;;  %vm1921_vm5 = vcmask 130048  }
   0xf   : > { %290 = vst.msk [vmem:[#allocation2 + $0x48] sm:$0xff] %vm279_vm0, %v4952_v0  ;;  %291 = vst.msk [vmem:[#allocation2 + $0x50] sm:$0xff] %vm279_vm0, %v4952_v0  ;;  %s5086_s9 = scalar_lea.vmem %s8083_s0, %s4688_s27  ;;  %s4957_s16 = smov 20   ;;  %vm1954_vm6 = vcmask 162816   ;;  %vm1987_vm7 = vcmask 195584   ;;  %vm2020_vm8 = vcmask 228352  }
  0x10   : > { %293 = vst.msk [vmem:[#allocation2 + $0x60] sm:$0xff] %vm279_vm0, %v4952_v0  ;;  %294 = vst.msk [vmem:[#allocation2 + $0x68] sm:$0xff] %vm279_vm0, %v4952_v0  ;;  %v337_v3 = vld [vmem:[%s5086_s9 + $0x10] sm:$0xff]  ;;  %v335_v4 = vld [vmem:[%s5086_s9] sm:$0xff]  ;;  %s4958_s17 = smov 24   ;;  %s4959_s18 = smov 28  }
  0x11   : > { %296 = vst.msk [vmem:[#allocation2 + $0x78] sm:$0xff] %vm279_vm0, %v4952_v0  ;;  %297 = vst.msk [vmem:[#allocation2 + $0x80] sm:$0xff] %vm279_vm0, %v4952_v0  ;;  %v339_v5 = vld [vmem:[%s5086_s9 + $0x20] sm:$0xff]  ;;  %v376_v6 = vmul.f32 %v5079_v1, %v337_v3  ;;  %v374_v7 = vmul.f32 %v5079_v1, %v335_v4  ;;  %v336_v9 = vld [vmem:[%s5086_s9 + $0x8] sm:$0xff]  ;;  %s4960_s10 = smov 32   ;;  %vm2053_vm9 = vcmask 261120  }
  0x12   : > { %299 = vst.msk [vmem:[#allocation2 + $0x90] sm:$0xff] %vm279_vm0, %v4952_v0  ;;  %300 = vst.msk [vmem:[#allocation2 + $0x98] sm:$0xff] %vm279_vm0, %v4952_v0  ;;  %v378_v8 = vmul.f32 %v5079_v1, %v339_v5  ;;  %v341_v10 = vld [vmem:[%s5086_s9 + $0x30] sm:$0xff]  ;;  %v338_v11 = vld [vmem:[%s5086_s9 + $0x18] sm:$0xff]  ;;  %v375_v13 = vmul.f32 %v5079_v1, %v336_v9  ;;  %vm2091_vm10 = vcmask 293888  }
  0x13   : > { %302 = vst.msk [vmem:[#allocation2 + $0xa8] sm:$0xff] %vm279_vm0, %v4952_v0  ;;  %303 = vst.msk [vmem:[#allocation2 + $0xb0] sm:$0xff] %vm279_vm0, %v4952_v0  ;;  %v542_v12 = vld [vmem:[#allocation2 + $0x1] sm:$0xff]  ;;  %v380_v14 = vmul.f32 %v5079_v1, %v341_v10  ;;  %v377_v15 = vmul.f32 %v5079_v1, %v338_v11  ;;  %v415_v18 = vadd.f32 %v5091_v2, %v376_v6  ;;  %v345_v27 = vld [vmem:[%s5086_s9 + $0x50] sm:$0xff] }
  0x14   : > { %305 = vst.msk [vmem:[#allocation2 + $0xc0] sm:$0xff] %vm279_vm0, %v4952_v0  ;;  %306 = vst.msk [vmem:[#allocation2 + $0xc8] sm:$0xff] %vm279_vm0, %v4952_v0  ;;  %v343_v16 = vld [vmem:[%s5086_s9 + $0x40] sm:$0xff]  ;;  %831 = vrot.lane.b32.xlu0 %v542_v12, %s4953_s12  ;;  %v413_v19 = vadd.f32 %v5091_v2, %v374_v7  ;;  %v417_v20 = vadd.f32 %v5091_v2, %v378_v8  ;;  %v340_v22 = vld [vmem:[%s5086_s9 + $0x28] sm:$0xff]  ;;  %v414_v23 = vadd.f32 %v5091_v2, %v375_v13 }
  0x15   : > { %308 = vst.msk [vmem:[#allocation2 + $0xd8] sm:$0xff] %vm279_vm0, %v4952_v0  ;;  %309 = vst.msk [vmem:[#allocation2 + $0xe0] sm:$0xff] %vm279_vm0, %v4952_v0  ;;  %v382_v21 = vmul.f32 %v5079_v1, %v343_v16  ;;  %v419_v24 = vadd.f32 %v5091_v2, %v380_v14  ;;  %v416_v25 = vadd.f32 %v5091_v2, %v377_v15  ;;  %v342_v28 = vld [vmem:[%s5086_s9 + $0x38] sm:$0xff]  ;;  %v347_v29 = vld [vmem:[%s5086_s9 + $0x60] sm:$0xff]  ;;  %v447_v30 = vmax.f32 %v415_v18, 0.0 }
  0x16   : > { %311 = vst.msk [vmem:[#allocation2 + $0xf0] sm:$0xff] %vm279_vm0, %v4952_v0  ;;  %312 = vst.msk [vmem:[#allocation2 + $0xf8] sm:$0xff] %vm279_vm0, %v4952_v0  ;;  %v379_v26 = vmul.f32 %v5079_v1, %v340_v22  ;;  %v445_v31 = vmax.f32 %v413_v19, 0.0  ;;  %v449_v32 = vmax.f32 %v417_v20, 0.0  ;;  %v344_v34 = vld [vmem:[%s5086_s9 + $0x48] sm:$0xff]  ;;  %v349_v35 = vld [vmem:[%s5086_s9 + $0x70] sm:$0xff]  ;;  %v384_v43 = vmul.f32 %v5079_v1, %v345_v27 }
  0x17   : > { %314 = vst.msk [vmem:[#allocation2 + $0x108] sm:$0xff] %vm279_vm0, %v4952_v0  ;;  %315 = vst.msk [vmem:[#allocation2 + $0x110] sm:$0xff] %vm279_vm0, %v4952_v0  ;;  %v421_v33 = vadd.f32 %v5091_v2, %v382_v21  ;;  %v346_v36 = vld [vmem:[%s5086_s9 + $0x58] sm:$0xff]  ;;  %v446_v37 = vmax.f32 %v414_v23, 0.0  ;;  %v451_v38 = vmax.f32 %v419_v24, 0.0  ;;  %v448_v39 = vmax.f32 %v416_v25, 0.0 }
  0x18   : > { %317 = vst.msk [vmem:[#allocation2 + $0x120] sm:$0xff] %vm279_vm0, %v4952_v0  ;;  %318 = vst.msk [vmem:[#allocation2 + $0x128] sm:$0xff] %vm279_vm0, %v4952_v0  ;;  %v418_v40 = vadd.f32 %v5091_v2, %v379_v26  ;;  %v351_v41 = vld [vmem:[%s5086_s9 + $0x80] sm:$0xff]  ;;  %v381_v44 = vmul.f32 %v5079_v1, %v342_v28  ;;  %v386_v45 = vmul.f32 %v5079_v1, %v347_v29  ;;  %v348_v46 = vld [vmem:[%s5086_s9 + $0x68] sm:$0xff] }
  0x19   : > { %320 = vst.msk [vmem:[#allocation2 + $0x138] sm:$0xff] %vm279_vm0, %v4952_v0  ;;  %321 = vst.msk [vmem:[#allocation2 + $0x140] sm:$0xff] %vm279_vm0, %v4952_v0  ;;  %v453_v42 = vmax.f32 %v421_v33, 0.0  ;;  %v383_v48 = vmul.f32 %v5079_v1, %v344_v34  ;;  %v388_v49 = vmul.f32 %v5079_v1, %v349_v35  ;;  %v385_v50 = vmul.f32 %v5079_v1, %v346_v36  ;;  %v353_v59 = vld [vmem:[%s5086_s9 + $0x90] sm:$0xff]  ;;  %v350_v60 = vld [vmem:[%s5086_s9 + $0x78] sm:$0xff] }
  0x1a   : > { %323 = vst.msk [vmem:[#allocation2 + $0x150] sm:$0xff] %vm279_vm0, %v4952_v0  ;;  %324 = vst.msk [vmem:[#allocation2 + $0x158] sm:$0xff] %vm279_vm0, %v4952_v0  ;;  %v450_v47 = vmax.f32 %v418_v40, 0.0  ;;  %v423_v51 = vadd.f32 %v5091_v2, %v384_v43  ;;  %v420_v52 = vadd.f32 %v5091_v2, %v381_v44  ;;  %v425_v53 = vadd.f32 %v5091_v2, %v386_v45  ;;  %v355_v61 = vld [vmem:[%s5086_s9 + $0xa0] sm:$0xff]  ;;  %v352_v4 = vld [vmem:[%s5086_s9 + $0x88] sm:$0xff] }
  0x1b   : > { %326 = vst.msk [vmem:[#allocation2 + $0x168] sm:$0xff] %vm279_vm0, %v4952_v0  ;;  %327 = vst.msk [vmem:[#allocation2 + $0x170] sm:$0xff] %vm279_vm0, %v4952_v0  ;;  %v390_v54 = vmul.f32 %v5079_v1, %v351_v41  ;;  %v422_v55 = vadd.f32 %v5091_v2, %v383_v48  ;;  %v427_v56 = vadd.f32 %v5091_v2, %v388_v49  ;;  %v357_v5 = vld [vmem:[%s5086_s9 + $0xb0] sm:$0xff]  ;;  %v354_v6 = vld [vmem:[%s5086_s9 + $0x98] sm:$0xff] }
  0x1c   : > { %329 = vst.msk [vmem:[#allocation2 + $0x180] sm:$0xff] %vm279_vm0, %v4952_v0  ;;  %330 = vst.msk [vmem:[#allocation2 + $0x188] sm:$0xff] %vm279_vm0, %v4952_v0  ;;  %v424_v57 = vadd.f32 %v5091_v2, %v385_v50  ;;  %v387_v58 = vmul.f32 %v5079_v1, %v348_v46  ;;  %v455_v62 = vmax.f32 %v423_v51, 0.0  ;;  %v452_v63 = vmax.f32 %v420_v52, 0.0  ;;  %v359_v15 = vld [vmem:[%s5086_s9 + $0xc0] sm:$0xff]  ;;  %v356_v22 = vld [vmem:[%s5086_s9 + $0xa8] sm:$0xff] }
  0x1d   : > { %332 = vst.msk [vmem:[#allocation2 + $0x198] sm:$0xff] %vm279_vm0, %v4952_v0  ;;  %333 = vst.msk [vmem:[#allocation2 + $0x1a0] sm:$0xff] %vm279_vm0, %v4952_v0  ;;  %v429_v3 = vadd.f32 %v5091_v2, %v390_v54  ;;  %v454_v7 = vmax.f32 %v422_v55, 0.0  ;;  %v459_v8 = vmax.f32 %v427_v56, 0.0  ;;  %v392_v12 = vmul.f32 %v5079_v1, %v353_v59  ;;  %v361_v26 = vld [vmem:[%s5086_s9 + $0xd0] sm:$0xff]  ;;  %v358_v33 = vld [vmem:[%s5086_s9 + $0xb8] sm:$0xff] }
  0x1e   : > { %283 = vst.msk [vmem:[#allocation2 + $0x10] sm:$0x3] %vm282_vm1, %v4952_v0  ;;  %286 = vst.msk [vmem:[#allocation2 + $0x28] sm:$0x3] %vm282_vm1, %v4952_v0  ;;  %v456_v9 = vmax.f32 %v424_v57, 0.0  ;;  %v426_v10 = vadd.f32 %v5091_v2, %v387_v58  ;;  %v389_v13 = vmul.f32 %v5079_v1, %v350_v60  ;;  %v394_v14 = vmul.f32 %v5079_v1, %v355_v61  ;;  %v362_v40 = vld [vmem:[%s5086_s9 + $0xd8] sm:$0xff] }
  0x1f   : > { %289 = vst.msk [vmem:[#allocation2 + $0x40] sm:$0x3] %vm282_vm1, %v4952_v0  ;;  %292 = vst.msk [vmem:[#allocation2 + $0x58] sm:$0x3] %vm282_vm1, %v4952_v0  ;;  %v461_v11 = vmax.f32 %v429_v3, 0.0  ;;  %v391_v19 = vmul.f32 %v5079_v1, %v352_v4  ;;  %v396_v20 = vmul.f32 %v5079_v1, %v357_v5  ;;  %v393_v21 = vmul.f32 %v5079_v1, %v354_v6  ;;  %v364_v45 = vld [vmem:[%s5086_s9 + $0xe8] sm:$0xff] }
  0x20   : > { %295 = vst.msk [vmem:[#allocation2 + $0x70] sm:$0x3] %vm282_vm1, %v4952_v0  ;;  %298 = vst.msk [vmem:[#allocation2 + $0x88] sm:$0x3] %vm282_vm1, %v4952_v0  ;;  %v458_v18 = vmax.f32 %v426_v10, 0.0  ;;  %v431_v23 = vadd.f32 %v5091_v2, %v392_v12  ;;  %v428_v24 = vadd.f32 %v5091_v2, %v389_v13  ;;  %v433_v25 = vadd.f32 %v5091_v2, %v394_v14 }
  0x21   : > { %301 = vst.msk [vmem:[#allocation2 + $0xa0] sm:$0x3] %vm282_vm1, %v4952_v0  ;;  %304 = vst.msk [vmem:[#allocation2 + $0xb8] sm:$0x3] %vm282_vm1, %v4952_v0  ;;  %v430_v29 = vadd.f32 %v5091_v2, %v391_v19  ;;  %v397_v48 = vmul.f32 %v5079_v1, %v358_v33  ;;  %v401_v54 = vmul.f32 %v5079_v1, %v362_v40 }
  0x22   : > { %307 = vst.msk [vmem:[#allocation2 + $0xd0] sm:$0x3] %vm282_vm1, %v4952_v0  ;;  %310 = vst.msk [vmem:[#allocation2 + $0xe8] sm:$0x3] %vm282_vm1, %v4952_v0  ;;  %v463_v34 = vmax.f32 %v431_v23, 0.0  ;;  %v460_v35 = vmax.f32 %v428_v24, 0.0  ;;  %v403_v58 = vmul.f32 %v5079_v1, %v364_v45 }
  0x23   : > { %313 = vst.msk [vmem:[#allocation2 + $0x100] sm:$0x3] %vm282_vm1, %v4952_v0  ;;  %316 = vst.msk [vmem:[#allocation2 + $0x118] sm:$0x3] %vm282_vm1, %v4952_v0  ;;  %v465_v36 = vmax.f32 %v433_v25, 0.0  ;;  %v462_v41 = vmax.f32 %v430_v29, 0.0  ;;  %v436_v57 = vadd.f32 %v5091_v2, %v397_v48  ;;  %v440_v61 = vadd.f32 %v5091_v2, %v401_v54 }
  0x24   : > { %319 = vst.msk [vmem:[#allocation2 + $0x130] sm:$0x3] %vm282_vm1, %v4952_v0  ;;  %322 = vst.msk [vmem:[#allocation2 + $0x148] sm:$0x3] %vm282_vm1, %v4952_v0  ;;  %v365_v25 = vld [vmem:[%s5086_s9 + $0xf0] sm:$0xff] }
  0x25   : > { %325 = vst.msk [vmem:[#allocation2 + $0x160] sm:$0x3] %vm282_vm1, %v4952_v0  ;;  %328 = vst.msk [vmem:[#allocation2 + $0x178] sm:$0x3] %vm282_vm1, %v4952_v0  ;;  %v543_v17 = vld [vmem:[#allocation2 + $0x9] sm:$0xff] }
  0x26   : > { %331 = vst.msk [vmem:[#allocation2 + $0x190] sm:$0x3] %vm282_vm1, %v4952_v0  ;;  %334 = vst.msk [vmem:[#allocation2 + $0x1a8] sm:$0x3] %vm282_vm1, %v4952_v0  ;;  %833 = vrot.lane.b32.xlu0 %v543_v17, %s4953_s12  ;;  %v457_v0 = vmax.f32 %v425_v53, 0.0 }
  0x27   : > { %480 = vst.msk [vmem:[#allocation2 + $0x31] sm:$0xff] %vm279_vm0, %v447_v30  ;;  %478 = vst.msk [vmem:[#allocation2 + $0x19] sm:$0xff] %vm279_vm0, %v445_v31  ;;  %v435_v30 = vadd.f32 %v5091_v2, %v396_v20  ;;  %v432_v31 = vadd.f32 %v5091_v2, %v393_v21 }
  0x28   : > { %482 = vst.msk [vmem:[#allocation2 + $0x49] sm:$0xff] %vm279_vm0, %v449_v32  ;;  %479 = vst.msk [vmem:[#allocation2 + $0x21] sm:$0xff] %vm279_vm0, %v446_v37  ;;  %v398_v32 = vmul.f32 %v5079_v1, %v359_v15  ;;  %v395_v37 = vmul.f32 %v5079_v1, %v356_v22 }
  0x29   : > { %484 = vst.msk [vmem:[#allocation2 + $0x61] sm:$0xff] %vm279_vm0, %v451_v38  ;;  %481 = vst.msk [vmem:[#allocation2 + $0x39] sm:$0xff] %vm279_vm0, %v448_v39  ;;  %v363_v38 = vld [vmem:[%s5086_s9 + $0xe0] sm:$0xff]  ;;  %v360_v39 = vld [vmem:[%s5086_s9 + $0xc8] sm:$0xff]  ;;  %v464_v43 = vmax.f32 %v432_v31, 0.0 }
  0x2a   : > { %486 = vst.msk [vmem:[#allocation2 + $0x79] sm:$0xff] %vm279_vm0, %v453_v42  ;;  %483 = vst.msk [vmem:[#allocation2 + $0x51] sm:$0xff] %vm279_vm0, %v450_v47  ;;  %v467_v42 = vmax.f32 %v435_v30, 0.0  ;;  %v437_v44 = vadd.f32 %v5091_v2, %v398_v32  ;;  %v434_v46 = vadd.f32 %v5091_v2, %v395_v37  ;;  %v400_v47 = vmul.f32 %v5079_v1, %v361_v26 }
  0x2b   : > { %488 = vst.msk [vmem:[#allocation2 + $0x91] sm:$0xff] %vm279_vm0, %v455_v62  ;;  %485 = vst.msk [vmem:[#allocation2 + $0x69] sm:$0xff] %vm279_vm0, %v452_v63  ;;  %v402_v52 = vmul.f32 %v5079_v1, %v363_v38  ;;  %v399_v53 = vmul.f32 %v5079_v1, %v360_v39  ;;  %v468_v63 = vmax.f32 %v436_v57, 0.0  ;;  %v404_v26 = vmul.f32 %v5079_v1, %v365_v25 }
  0x2c   : > { %490 = vst.msk [vmem:[#allocation2 + $0xa9] sm:$0xff] %vm279_vm0, %v457_v0  ;;  %487 = vst.msk [vmem:[#allocation2 + $0x81] sm:$0xff] %vm279_vm0, %v454_v7  ;;  %v469_v51 = vmax.f32 %v437_v44, 0.0  ;;  %v466_v55 = vmax.f32 %v434_v46, 0.0  ;;  %v439_v56 = vadd.f32 %v5091_v2, %v400_v47  ;;  %v442_v0 = vadd.f32 %v5091_v2, %v403_v58  ;;  %v575_v44 = vld [vmem:[#allocation2 + $0xa] sm:$0xff] }
  0x2d   : > { %492 = vst.msk [vmem:[#allocation2 + $0xc1] sm:$0xff] %vm279_vm0, %v459_v8  ;;  %489 = vst.msk [vmem:[#allocation2 + $0x99] sm:$0xff] %vm279_vm0, %v456_v9  ;;  %v441_v59 = vadd.f32 %v5091_v2, %v402_v52  ;;  %v438_v60 = vadd.f32 %v5091_v2, %v399_v53  ;;  %v472_v7 = vmax.f32 %v440_v61, 0.0  ;;  %v443_v29 = vadd.f32 %v5091_v2, %v404_v26 }
  0x2e   : > { %v5164_v16 = vld [vmem:[#allocation2 + $0x31] sm:$0xff]  ;;  %v5166_v17 = vld [vmem:[#allocation2 + $0x19] sm:$0xff]  ;;  %494 = vst.msk [vmem:[#allocation2 + $0xd9] sm:$0xff] %vm279_vm0, %v461_v11  ;;  %491 = vst.msk [vmem:[#allocation2 + $0xb1] sm:$0xff] %vm279_vm0, %v458_v18  ;;  %v471_v62 = vmax.f32 %v439_v56, 0.0  ;;  %v474_v8 = vmax.f32 %v442_v0, 0.0 }
  0x2f   : > { %839 = vrot.lane.b32.xlu0 %v5164_v16, %s4953_s12  ;;  %835 = vrot.lane.b32.xlu1 %v5166_v17, %s4953_s12  ;;  %v5184_v27 = vld [vmem:[#allocation2 + $0x49] sm:$0xff]  ;;  %v5186_v28 = vld [vmem:[#allocation2 + $0x21] sm:$0xff]  ;;  %496 = vst.msk [vmem:[#allocation2 + $0xf1] sm:$0xff] %vm279_vm0, %v463_v34  ;;  %493 = vst.msk [vmem:[#allocation2 + $0xc9] sm:$0xff] %vm279_vm0, %v460_v35  ;;  %v473_v5 = vmax.f32 %v441_v59, 0.0  ;;  %v470_v6 = vmax.f32 %v438_v60, 0.0 }
  0x30   : > { %498 = vst.msk [vmem:[#allocation2 + $0x109] sm:$0xff] %vm279_vm0, %v465_v36  ;;  %v5210_v49 = vld [vmem:[#allocation2 + $0x61] sm:$0xff]  ;;  %v5212_v50 = vld [vmem:[#allocation2 + $0x39] sm:$0xff]  ;;  %495 = vst.msk [vmem:[#allocation2 + $0xe1] sm:$0xff] %vm279_vm0, %v462_v41  ;;  %v475_v32 = vmax.f32 %v443_v29, 0.0 }
  0x31   : > { %500 = vst.msk [vmem:[#allocation2 + $0x121] sm:$0xff] %vm279_vm0, %v467_v42  ;;  %497 = vst.msk [vmem:[#allocation2 + $0xf9] sm:$0xff] %vm279_vm0, %v464_v43  ;;  %v5233_v3 = vld [vmem:[#allocation2 + $0x79] sm:$0xff]  ;;  %v5235_v4 = vld [vmem:[#allocation2 + $0x51] sm:$0xff] }
  0x32   : > { %502 = vst.msk [vmem:[#allocation2 + $0x139] sm:$0xff] %vm279_vm0, %v469_v51  ;;  %499 = vst.msk [vmem:[#allocation2 + $0x111] sm:$0xff] %vm279_vm0, %v466_v55  ;;  %v5247_v9 = vld [vmem:[#allocation2 + $0x91] sm:$0xff]  ;;  %v5249_v10 = vld [vmem:[#allocation2 + $0x69] sm:$0xff] }
  0x33   : > { %843 = vrot.lane.b32.xlu0 %v5184_v27, %s4953_s12  ;;  %837 = vrot.lane.b32.xlu1 %v5186_v28, %s4953_s12  ;;  %504 = vst.msk [vmem:[#allocation2 + $0x151] sm:$0xff] %vm279_vm0, %v471_v62  ;;  %501 = vst.msk [vmem:[#allocation2 + $0x129] sm:$0xff] %vm279_vm0, %v468_v63  ;;  %v5255_v11 = vld [vmem:[#allocation2 + $0xa9] sm:$0xff]  ;;  %v5257_v12 = vld [vmem:[#allocation2 + $0x81] sm:$0xff] }
  0x34   : > { %506 = vst.msk [vmem:[#allocation2 + $0x169] sm:$0xff] %vm279_vm0, %v473_v5  ;;  %503 = vst.msk [vmem:[#allocation2 + $0x141] sm:$0xff] %vm279_vm0, %v470_v6  ;;  %v5263_v13 = vld [vmem:[#allocation2 + $0xc1] sm:$0xff]  ;;  %v5265_v14 = vld [vmem:[#allocation2 + $0x99] sm:$0xff] }
  0x35   : > { %505 = vst.msk [vmem:[#allocation2 + $0x159] sm:$0xff] %vm279_vm0, %v472_v7  ;;  %507 = vst.msk [vmem:[#allocation2 + $0x171] sm:$0xff] %vm279_vm0, %v474_v8  ;;  %v5271_v15 = vld [vmem:[#allocation2 + $0xd9] sm:$0xff]  ;;  %v5273_v18 = vld [vmem:[#allocation2 + $0xb1] sm:$0xff] }
  0x36   : > { %v5279_v19 = vld [vmem:[#allocation2 + $0xf1] sm:$0xff]  ;;  %v5281_v20 = vld [vmem:[#allocation2 + $0xc9] sm:$0xff]  ;;  %508 = vst.msk [vmem:[#allocation2 + $0x181] sm:$0xff] %vm279_vm0, %v475_v32  ;;  %v5363_v48 = vld [vmem:[#allocation2 + $0x3a] sm:$0xff] }
  0x37   : > { %847 = vrot.lane.b32.xlu0 %v5210_v49, %s4953_s12  ;;  %841 = vrot.lane.b32.xlu1 %v5212_v50, %s4953_s12  ;;  %v5287_v21 = vld [vmem:[#allocation2 + $0x109] sm:$0xff]  ;;  %v5289_v22 = vld [vmem:[#allocation2 + $0xe1] sm:$0xff]  ;;  %v366_v35 = vld [vmem:[%s5086_s9 + $0xf8] sm:$0xff] }
  0x38   : > { %v5295_v23 = vld [vmem:[#allocation2 + $0x121] sm:$0xff]  ;;  %v5297_v24 = vld [vmem:[#allocation2 + $0xf9] sm:$0xff]  ;;  %v405_v36 = vmul.f32 %v5079_v1, %v366_v35  ;;  %v5353_v45 = vld [vmem:[#allocation2 + $0x4a] sm:$0xff] }
  0x39   : > { %v5306_v30 = vld [vmem:[#allocation2 + $0x139] sm:$0xff]  ;;  %v5308_v31 = vld [vmem:[#allocation2 + $0x111] sm:$0xff]  ;;  %v574_v1 = vld [vmem:[#allocation2 + $0x2] sm:$0xff] }
  0x3a   : > { %v5315_v33 = vld [vmem:[#allocation2 + $0x151] sm:$0xff]  ;;  %v5317_v34 = vld [vmem:[#allocation2 + $0x129] sm:$0xff]  ;;  %v444_v37 = vadd.f32 %v5091_v2, %v405_v36  ;;  %v5340_v2 = vld [vmem:[#allocation2 + $0x1a] sm:$0xff] }
  0x3b   : > { %851 = vrot.lane.b32.xlu0 %v5233_v3, %s4953_s12  ;;  %845 = vrot.lane.b32.xlu1 %v5235_v4, %s4953_s12  ;;  %v5326_v38 = vld [vmem:[#allocation2 + $0x169] sm:$0xff]  ;;  %v5328_v39 = vld [vmem:[#allocation2 + $0x141] sm:$0xff]  ;;  %v5348_v43 = vld [vmem:[#allocation2 + $0x32] sm:$0xff] }
  0x3c   : > { %v476_v40 = vmax.f32 %v444_v37, 0.0  ;;  %v5335_v41 = vld [vmem:[#allocation2 + $0x159] sm:$0xff]  ;;  %v5342_v42 = vld [vmem:[#allocation2 + $0x171] sm:$0xff]  ;;  %v5355_v46 = vld [vmem:[#allocation2 + $0x22] sm:$0xff] }
  0x3d   : > { %v5361_v47 = vld [vmem:[#allocation2 + $0x62] sm:$0xff]  ;;  %v5369_v51 = vld [vmem:[#allocation2 + $0x7a] sm:$0xff]  ;;  %v5371_v52 = vld [vmem:[#allocation2 + $0x52] sm:$0xff] }
  0x3e   : > { %509 = vst.msk [vmem:[#allocation2 + $0x189] sm:$0xff] %vm279_vm0, %v476_v40  ;;  %v5377_v53 = vld [vmem:[#allocation2 + $0x92] sm:$0xff]  ;;  %v5379_v54 = vld [vmem:[#allocation2 + $0x6a] sm:$0xff]  ;;  %v5387_v56 = vld [vmem:[#allocation2 + $0x82] sm:$0xff] }
  0x3f   : > { %855 = vrot.lane.b32.xlu0 %v5247_v9, %s4953_s12  ;;  %849 = vrot.lane.b32.xlu1 %v5249_v10, %s4953_s12  ;;  %v5385_v55 = vld [vmem:[#allocation2 + $0xaa] sm:$0xff]  ;;  %v5393_v57 = vld [vmem:[#allocation2 + $0xc2] sm:$0xff]  ;;  %v5395_v58 = vld [vmem:[#allocation2 + $0x9a] sm:$0xff] }
  0x40   : > { %v5401_v59 = vld [vmem:[#allocation2 + $0xda] sm:$0xff]  ;;  %v5403_v60 = vld [vmem:[#allocation2 + $0xb2] sm:$0xff]  ;;  %v5411_v62 = vld [vmem:[#allocation2 + $0xca] sm:$0xff] }
  0x41   : > { %v5409_v61 = vld [vmem:[#allocation2 + $0xf2] sm:$0xff]  ;;  %v5417_v63 = vld [vmem:[#allocation2 + $0x10a] sm:$0xff]  ;;  %v5419_v0 = vld [vmem:[#allocation2 + $0xe2] sm:$0xff] }
  0x42   : > { %v5425_v5 = vld [vmem:[#allocation2 + $0x122] sm:$0xff]  ;;  %v5427_v6 = vld [vmem:[#allocation2 + $0xfa] sm:$0xff]  ;;  %v5437_v25 = vld [vmem:[#allocation2 + $0x112] sm:$0xff] }
  0x43   : > { %859 = vrot.lane.b32.xlu0 %v5255_v11, %s4953_s12  ;;  %853 = vrot.lane.b32.xlu1 %v5257_v12, %s4953_s12  ;;  %v5435_v8 = vld [vmem:[#allocation2 + $0x13a] sm:$0xff]  ;;  %v5445_v29 = vld [vmem:[#allocation2 + $0x152] sm:$0xff]  ;;  %v5447_v32 = vld [vmem:[#allocation2 + $0x12a] sm:$0xff] }
  0x44   : > { %8127 = vst [vmem:[#allocation5_spill] sm:$0xff] %v5447_v32  ;;  %v5453_v35 = vld [vmem:[#allocation2 + $0x16a] sm:$0xff]  ;;  %v5455_v36 = vld [vmem:[#allocation2 + $0x142] sm:$0xff] }
  0x45   : > { %8128 = vst [vmem:[#allocation6_spill] sm:$0xff] %v5453_v35  ;;  %8129 = vst [vmem:[#allocation7_spill] sm:$0xff] %v5455_v36 }
  0x47   : > { %863 = vrot.lane.b32.xlu0 %v5263_v13, %s4953_s12  ;;  %857 = vrot.lane.b32.xlu1 %v5265_v14, %s4953_s12 }
  0x4b   : > { %867 = vrot.lane.b32.xlu0 %v5271_v15, %s4953_s12  ;;  %861 = vrot.lane.b32.xlu1 %v5273_v18, %s4953_s12 }
  0x4f   : > { %871 = vrot.lane.b32.xlu0 %v5279_v19, %s4953_s12  ;;  %865 = vrot.lane.b32.xlu1 %v5281_v20, %s4953_s12 }
  0x53   : > { %875 = vrot.lane.b32.xlu0 %v5287_v21, %s4953_s12  ;;  %869 = vrot.lane.b32.xlu1 %v5289_v22, %s4953_s12 }
  0x57   : > { %879 = vrot.lane.b32.xlu0 %v5295_v23, %s4953_s12  ;;  %873 = vrot.lane.b32.xlu1 %v5297_v24, %s4953_s12 }
  0x5b   : > { %883 = vrot.lane.b32.xlu0 %v5306_v30, %s4953_s12  ;;  %877 = vrot.lane.b32.xlu1 %v5308_v31, %s4953_s12 }
  0x5f   : > { %887 = vrot.lane.b32.xlu0 %v5315_v33, %s4953_s12  ;;  %881 = vrot.lane.b32.xlu1 %v5317_v34, %s4953_s12 }
  0x63   : > { %891 = vrot.lane.b32.xlu0 %v5326_v38, %s4953_s12  ;;  %885 = vrot.lane.b32.xlu1 %v5328_v39, %s4953_s12 }
  0x67   : > { %959 = vrot.lane.b32.xlu0 %v574_v1, %s4954_s13  ;;  %889 = vrot.lane.b32.xlu1 %v5335_v41, %s4953_s12  ;;  %v5465_v1 = vld [vmem:[#allocation2 + $0x15a] sm:$0xff] }
  0x68   : > { %8132 = vst [vmem:[#allocation10_spill] sm:$0xff] %v5465_v1 }
  0x6b   : > { %963 = vrot.lane.b32.xlu0 %v5340_v2, %s4954_s13  ;;  %893 = vrot.lane.b32.xlu1 %v5342_v42, %s4953_s12 }
  0x6f   : > { %967 = vrot.lane.b32.xlu0 %v5348_v43, %s4954_s13  ;;  %961 = vrot.lane.b32.xlu1 %v575_v44, %s4954_s13 }
  0x73   : > { %971 = vrot.lane.b32.xlu0 %v5353_v45, %s4954_s13  ;;  %965 = vrot.lane.b32.xlu1 %v5355_v46, %s4954_s13 }
  0x77   : > { %975 = vrot.lane.b32.xlu0 %v5361_v47, %s4954_s13  ;;  %969 = vrot.lane.b32.xlu1 %v5363_v48, %s4954_s13 }
  0x7b   : > { %979 = vrot.lane.b32.xlu0 %v5369_v51, %s4954_s13  ;;  %973 = vrot.lane.b32.xlu1 %v5371_v52, %s4954_s13 }
  0x7f   : > { %983 = vrot.lane.b32.xlu0 %v5377_v53, %s4954_s13  ;;  %977 = vrot.lane.b32.xlu1 %v5379_v54, %s4954_s13 }
  0x83   : > { %987 = vrot.lane.b32.xlu0 %v5385_v55, %s4954_s13  ;;  %981 = vrot.lane.b32.xlu1 %v5387_v56, %s4954_s13 }
  0x86   : > { %v5429_v7 = vpop.permute.xlu0 %831 }
  0x87   : > { %991 = vrot.lane.b32.xlu0 %v5393_v57, %s4954_s13  ;;  %985 = vrot.lane.b32.xlu1 %v5395_v58, %s4954_s13  ;;  %8125 = vst [vmem:[#allocation3_spill] sm:$0xff] %v5429_v7  ;;  %v512_v7 = vld [vmem:[#allocation2 + $0x18] sm:$0xff] }
  0x8b   : > { %995 = vrot.lane.b32.xlu0 %v5401_v59, %s4954_s13  ;;  %989 = vrot.lane.b32.xlu1 %v5403_v60, %s4954_s13 }
  0x8f   : > { %999 = vrot.lane.b32.xlu0 %v5409_v61, %s4954_s13  ;;  %993 = vrot.lane.b32.xlu1 %v5411_v62, %s4954_s13 }
  0x93   : > { %1003 = vrot.lane.b32.xlu0 %v5417_v63, %s4954_s13  ;;  %997 = vrot.lane.b32.xlu1 %v5419_v0, %s4954_s13 }
  0x97   : > { %1007 = vrot.lane.b32.xlu0 %v5425_v5, %s4954_s13  ;;  %1001 = vrot.lane.b32.xlu1 %v5427_v6, %s4954_s13 }
  0x98   : > { %v5443_v26 = vpop.permute.xlu0 %833 }
  0x99   : > { %8126 = vst [vmem:[#allocation4_spill] sm:$0xff] %v5443_v26 }
  0x9b   : > { %1011 = vrot.lane.b32.xlu0 %v5435_v8, %s4954_s13  ;;  %1005 = vrot.lane.b32.xlu1 %v5437_v25, %s4954_s13 }
  0x9f   : > { %1015 = vrot.lane.b32.xlu0 %v5445_v29, %s4954_s13  ;;  %1009 = vrot.lane.b32.xlu1 %v5447_v32, %s4954_s13  ;;  %v5501_v32 = vld [vmem:[#allocation2 + $0x38] sm:$0xff] }
  0xa0   : > { %8144 = vst [vmem:[#allocation22_spill] sm:$0xff] %v5501_v32 }
  0xa1   : > { %v5457_v37 = vpop.permute.xlu0 %839  ;;  %v5459_v40 = vpop.permute.xlu1 %835 }
  0xa2   : > { %8130 = vst [vmem:[#allocation8_spill] sm:$0xff] %v5457_v37  ;;  %8131 = vst [vmem:[#allocation9_spill] sm:$0xff] %v5459_v40  ;;  %v5474_v37 = vld [vmem:[#allocation2 + $0x172] sm:$0xff] }
  0xa3   : > { %1019 = vrot.lane.b32.xlu0 %v5453_v35, %s4954_s13  ;;  %1013 = vrot.lane.b32.xlu1 %v5455_v36, %s4954_s13  ;;  %v5480_v36 = vld [vmem:[#allocation2 + $0x30] sm:$0xff] }
  0xa4   : > { %8137 = vst [vmem:[#allocation15_spill] sm:$0xff] %v5480_v36 }
  0xa5   : > { %v5467_v44 = vpop.permute.xlu0 %843  ;;  %v5469_v26 = vpop.permute.xlu1 %837 }
  0xa6   : > { %8133 = vst [vmem:[#allocation11_spill] sm:$0xff] %v5467_v44  ;;  %8134 = vst [vmem:[#allocation12_spill] sm:$0xff] %v5469_v26  ;;  %v5490_v26 = vld [vmem:[#allocation2 + $0x48] sm:$0xff] }
  0xa7   : > { %1087 = vrot.lane.b32.xlu0 %v512_v7, %s4955_s14  ;;  %1017 = vrot.lane.b32.xlu1 %v5465_v1, %s4954_s13  ;;  %8140 = vst [vmem:[#allocation18_spill] sm:$0xff] %v5490_v26  ;;  %v513_v1 = vld [vmem:[#allocation2 + $0x20] sm:$0xff] }
  0xa9   : > { %v5476_v40 = vpop.permute.xlu0 %847  ;;  %v5478_v35 = vpop.permute.xlu1 %841 }
  0xaa   : > { %8135 = vst [vmem:[#allocation13_spill] sm:$0xff] %v5476_v40  ;;  %8136 = vst [vmem:[#allocation14_spill] sm:$0xff] %v5478_v35 }
  0xab   : > { %1091 = vrot.lane.b32.xlu0 %v5480_v36, %s4955_s14  ;;  %1021 = vrot.lane.b32.xlu1 %v5474_v37, %s4954_s13  ;;  %v5499_v36 = vld [vmem:[#allocation2 + $0x60] sm:$0xff] }
  0xac   : > { %8143 = vst [vmem:[#allocation21_spill] sm:$0xff] %v5499_v36 }
  0xad   : > { %v5486_v44 = vpop.permute.xlu0 %851  ;;  %v5488_v7 = vpop.permute.xlu1 %845 }
  0xae   : > { %8138 = vst [vmem:[#allocation16_spill] sm:$0xff] %v5486_v44  ;;  %8139 = vst [vmem:[#allocation17_spill] sm:$0xff] %v5488_v7 }
  0xaf   : > { %1095 = vrot.lane.b32.xlu0 %v5490_v26, %s4955_s14  ;;  %1089 = vrot.lane.b32.xlu1 %v513_v1, %s4955_s14  ;;  %v5511_v26 = vld [vmem:[#allocation2 + $0x78] sm:$0xff]  ;;  %v5513_v1 = vld [vmem:[#allocation2 + $0x50] sm:$0xff] }
  0xb0   : > { %8147 = vst [vmem:[#allocation25_spill] sm:$0xff] %v5511_v26  ;;  %8148 = vst [vmem:[#allocation26_spill] sm:$0xff] %v5513_v1 }
  0xb1   : > { %v5495_v40 = vpop.permute.xlu0 %855  ;;  %v5497_v35 = vpop.permute.xlu1 %849 }
  0xb2   : > { %8141 = vst [vmem:[#allocation19_spill] sm:$0xff] %v5495_v40  ;;  %8142 = vst [vmem:[#allocation20_spill] sm:$0xff] %v5497_v35 }
  0xb3   : > { %1099 = vrot.lane.b32.xlu0 %v5499_v36, %s4955_s14  ;;  %1093 = vrot.lane.b32.xlu1 %v5501_v32, %s4955_s14  ;;  %v5523_v36 = vld [vmem:[#allocation2 + $0x90] sm:$0xff]  ;;  %v5525_v32 = vld [vmem:[#allocation2 + $0x68] sm:$0xff] }
  0xb4   : > { %8151 = vst [vmem:[#allocation29_spill] sm:$0xff] %v5523_v36  ;;  %8152 = vst [vmem:[#allocation30_spill] sm:$0xff] %v5525_v32 }
  0xb5   : > { %v5507_v44 = vpop.permute.xlu0 %859  ;;  %v5509_v7 = vpop.permute.xlu1 %853 }
  0xb6   : > { %8145 = vst [vmem:[#allocation23_spill] sm:$0xff] %v5507_v44  ;;  %8146 = vst [vmem:[#allocation24_spill] sm:$0xff] %v5509_v7 }
  0xb7   : > { %1103 = vrot.lane.b32.xlu0 %v5511_v26, %s4955_s14  ;;  %1097 = vrot.lane.b32.xlu1 %v5513_v1, %s4955_s14  ;;  %v5535_v26 = vld [vmem:[#allocation2 + $0xa8] sm:$0xff]  ;;  %v5537_v1 = vld [vmem:[#allocation2 + $0x80] sm:$0xff] }
  0xb8   : > { %8155 = vst [vmem:[#allocation33_spill] sm:$0xff] %v5535_v26  ;;  %8156 = vst [vmem:[#allocation34_spill] sm:$0xff] %v5537_v1 }
  0xb9   : > { %v5519_v40 = vpop.permute.xlu0 %863  ;;  %v5521_v35 = vpop.permute.xlu1 %857 }
  0xba   : > { %8149 = vst [vmem:[#allocation27_spill] sm:$0xff] %v5519_v40  ;;  %8150 = vst [vmem:[#allocation28_spill] sm:$0xff] %v5521_v35 }
  0xbb   : > { %1107 = vrot.lane.b32.xlu0 %v5523_v36, %s4955_s14  ;;  %1101 = vrot.lane.b32.xlu1 %v5525_v32, %s4955_s14  ;;  %v5547_v36 = vld [vmem:[#allocation2 + $0xc0] sm:$0xff]  ;;  %v5549_v32 = vld [vmem:[#allocation2 + $0x98] sm:$0xff] }
  0xbc   : > { %8159 = vst [vmem:[#allocation37_spill] sm:$0xff] %v5547_v36  ;;  %8160 = vst [vmem:[#allocation38_spill] sm:$0xff] %v5549_v32 }
  0xbd   : > { %v5531_v44 = vpop.permute.xlu0 %867  ;;  %v5533_v7 = vpop.permute.xlu1 %861 }
  0xbe   : > { %8153 = vst [vmem:[#allocation31_spill] sm:$0xff] %v5531_v44  ;;  %8154 = vst [vmem:[#allocation32_spill] sm:$0xff] %v5533_v7 }
  0xbf   : > { %1111 = vrot.lane.b32.xlu0 %v5535_v26, %s4955_s14  ;;  %1105 = vrot.lane.b32.xlu1 %v5537_v1, %s4955_s14  ;;  %v5559_v26 = vld [vmem:[#allocation2 + $0xd8] sm:$0xff]  ;;  %v5561_v1 = vld [vmem:[#allocation2 + $0xb0] sm:$0xff] }
  0xc0   : > { %8163 = vst [vmem:[#allocation41_spill] sm:$0xff] %v5559_v26  ;;  %8164 = vst [vmem:[#allocation42_spill] sm:$0xff] %v5561_v1 }
  0xc1   : > { %v5543_v40 = vpop.permute.xlu0 %871  ;;  %v5545_v35 = vpop.permute.xlu1 %865 }
  0xc2   : > { %8157 = vst [vmem:[#allocation35_spill] sm:$0xff] %v5543_v40  ;;  %8158 = vst [vmem:[#allocation36_spill] sm:$0xff] %v5545_v35 }
  0xc3   : > { %1115 = vrot.lane.b32.xlu0 %v5547_v36, %s4955_s14  ;;  %1109 = vrot.lane.b32.xlu1 %v5549_v32, %s4955_s14  ;;  %v5571_v36 = vld [vmem:[#allocation2 + $0xf0] sm:$0xff]  ;;  %v5573_v32 = vld [vmem:[#allocation2 + $0xc8] sm:$0xff] }
  0xc4   : > { %8167 = vst [vmem:[#allocation45_spill] sm:$0xff] %v5571_v36  ;;  %8168 = vst [vmem:[#allocation46_spill] sm:$0xff] %v5573_v32 }
  0xc5   : > { %v5555_v44 = vpop.permute.xlu0 %875  ;;  %v5557_v7 = vpop.permute.xlu1 %869 }
  0xc6   : > { %8161 = vst [vmem:[#allocation39_spill] sm:$0xff] %v5555_v44  ;;  %8162 = vst [vmem:[#allocation40_spill] sm:$0xff] %v5557_v7 }
  0xc7   : > { %1119 = vrot.lane.b32.xlu0 %v5559_v26, %s4955_s14  ;;  %1113 = vrot.lane.b32.xlu1 %v5561_v1, %s4955_s14  ;;  %v5583_v26 = vld [vmem:[#allocation2 + $0x108] sm:$0xff]  ;;  %v5585_v1 = vld [vmem:[#allocation2 + $0xe0] sm:$0xff] }
  0xc8   : > { %8171 = vst [vmem:[#allocation49_spill] sm:$0xff] %v5583_v26  ;;  %8172 = vst [vmem:[#allocation50_spill] sm:$0xff] %v5585_v1 }
  0xc9   : > { %v5567_v40 = vpop.permute.xlu0 %879  ;;  %v5569_v35 = vpop.permute.xlu1 %873 }
  0xca   : > { %8165 = vst [vmem:[#allocation43_spill] sm:$0xff] %v5567_v40  ;;  %8166 = vst [vmem:[#allocation44_spill] sm:$0xff] %v5569_v35 }
  0xcb   : > { %1123 = vrot.lane.b32.xlu0 %v5571_v36, %s4955_s14  ;;  %1117 = vrot.lane.b32.xlu1 %v5573_v32, %s4955_s14  ;;  %v5595_v36 = vld [vmem:[#allocation2 + $0x120] sm:$0xff]  ;;  %v5597_v32 = vld [vmem:[#allocation2 + $0xf8] sm:$0xff] }
  0xcc   : > { %8175 = vst [vmem:[#allocation53_spill] sm:$0xff] %v5595_v36  ;;  %8176 = vst [vmem:[#allocation54_spill] sm:$0xff] %v5597_v32 }
  0xcd   : > { %v5579_v44 = vpop.permute.xlu0 %883  ;;  %v5581_v7 = vpop.permute.xlu1 %877 }
  0xce   : > { %8169 = vst [vmem:[#allocation47_spill] sm:$0xff] %v5579_v44  ;;  %8170 = vst [vmem:[#allocation48_spill] sm:$0xff] %v5581_v7 }
  0xcf   : > { %1127 = vrot.lane.b32.xlu0 %v5583_v26, %s4955_s14  ;;  %1121 = vrot.lane.b32.xlu1 %v5585_v1, %s4955_s14  ;;  %v5607_v26 = vld [vmem:[#allocation2 + $0x138] sm:$0xff]  ;;  %v5609_v1 = vld [vmem:[#allocation2 + $0x110] sm:$0xff] }
  0xd0   : > { %8179 = vst [vmem:[#allocation57_spill] sm:$0xff] %v5607_v26  ;;  %8180 = vst [vmem:[#allocation58_spill] sm:$0xff] %v5609_v1 }
  0xd1   : > { %v5591_v40 = vpop.permute.xlu0 %887  ;;  %v5593_v35 = vpop.permute.xlu1 %881 }
  0xd2   : > { %8173 = vst [vmem:[#allocation51_spill] sm:$0xff] %v5591_v40  ;;  %8174 = vst [vmem:[#allocation52_spill] sm:$0xff] %v5593_v35 }
  0xd3   : > { %1131 = vrot.lane.b32.xlu0 %v5595_v36, %s4955_s14  ;;  %1125 = vrot.lane.b32.xlu1 %v5597_v32, %s4955_s14  ;;  %v5619_v36 = vld [vmem:[#allocation2 + $0x150] sm:$0xff]  ;;  %v5621_v32 = vld [vmem:[#allocation2 + $0x128] sm:$0xff] }
  0xd4   : > { %8183 = vst [vmem:[#allocation61_spill] sm:$0xff] %v5619_v36  ;;  %8184 = vst [vmem:[#allocation62_spill] sm:$0xff] %v5621_v32 }
  0xd5   : > { %v5603_v44 = vpop.permute.xlu0 %891  ;;  %v5605_v7 = vpop.permute.xlu1 %885 }
  0xd6   : > { %8177 = vst [vmem:[#allocation55_spill] sm:$0xff] %v5603_v44  ;;  %8178 = vst [vmem:[#allocation56_spill] sm:$0xff] %v5605_v7 }
  0xd7   : > { %1135 = vrot.lane.b32.xlu0 %v5607_v26, %s4955_s14  ;;  %1129 = vrot.lane.b32.xlu1 %v5609_v1, %s4955_s14  ;;  %v5631_v26 = vld [vmem:[#allocation2 + $0x168] sm:$0xff]  ;;  %v5633_v1 = vld [vmem:[#allocation2 + $0x140] sm:$0xff] }
  0xd8   : > { %8187 = vst [vmem:[#allocation65_spill] sm:$0xff] %v5631_v26 }
  0xd9   : > { %v5615_v40 = vpop.permute.xlu0 %959  ;;  %v5617_v35 = vpop.permute.xlu1 %889 }
  0xda   : > { %8181 = vst [vmem:[#allocation59_spill] sm:$0xff] %v5615_v40  ;;  %8182 = vst [vmem:[#allocation60_spill] sm:$0xff] %v5617_v35  ;;  %v5639_v35 = vld [vmem:[#allocation2 + $0x180] sm:$0xff] }
  0xdb   : > { %1139 = vrot.lane.b32.xlu0 %v5619_v36, %s4955_s14  ;;  %1133 = vrot.lane.b32.xlu1 %v5621_v32, %s4955_s14  ;;  %8188 = vst [vmem:[#allocation66_spill] sm:$0xff] %v5639_v35  ;;  %v5645_v32 = vld [vmem:[#allocation2 + $0x158] sm:$0xff] }
  0xdd   : > { %v5627_v44 = vpop.permute.xlu0 %963  ;;  %v5629_v7 = vpop.permute.xlu1 %893 }
  0xde   : > { %8185 = vst [vmem:[#allocation63_spill] sm:$0xff] %v5627_v44  ;;  %8186 = vst [vmem:[#allocation64_spill] sm:$0xff] %v5629_v7 }
  0xdf   : > { %1143 = vrot.lane.b32.xlu0 %v5631_v26, %s4955_s14  ;;  %1137 = vrot.lane.b32.xlu1 %v5633_v1, %s4955_s14  ;;  %v5655_v26 = vld [vmem:[#allocation2 + $0x170] sm:$0xff] }
  0xe1   : > { %v5641_v40 = vpop.permute.xlu0 %967  ;;  %v5643_v36 = vpop.permute.xlu1 %961 }
  0xe2   : > { %8189 = vst [vmem:[#allocation67_spill] sm:$0xff] %v5641_v40  ;;  %8190 = vst [vmem:[#allocation68_spill] sm:$0xff] %v5643_v36  ;;  %v5661_v40 = vld [vmem:[#allocation2 + $0x188] sm:$0xff] }
  0xe3   : > { %1147 = vrot.lane.b32.xlu0 %v5639_v35, %s4955_s14  ;;  %1141 = vrot.lane.b32.xlu1 %v5645_v32, %s4955_s14 }
  0xe5   : > { %v5651_v7 = vpop.permute.xlu0 %971  ;;  %v5653_v44 = vpop.permute.xlu1 %965 }
  0xe6   : > { %8191 = vst [vmem:[#allocation69_spill] sm:$0xff] %v5651_v7  ;;  %8192 = vst [vmem:[#allocation70_spill] sm:$0xff] %v5653_v44 }
  0xe7   : > { %1215 = vrot.lane.b32.xlu0 %v5166_v17, %s4956_s15  ;;  %1145 = vrot.lane.b32.xlu1 %v5655_v26, %s4955_s14 }
  0xe9   : > { %v5663_v36 = vpop.permute.xlu0 %975  ;;  %v5665_v35 = vpop.permute.xlu1 %969 }
  0xea   : > { %8193 = vst [vmem:[#allocation71_spill] sm:$0xff] %v5663_v36 }
  0xeb   : > { %1219 = vrot.lane.b32.xlu0 %v5164_v16, %s4956_s15  ;;  %1149 = vrot.lane.b32.xlu1 %v5661_v40, %s4955_s14 }
  0xed   : > { %v5671_v7 = vpop.permute.xlu0 %979  ;;  %v5673_v44 = vpop.permute.xlu1 %973 }
  0xee   : > { %8194 = vst [vmem:[#allocation72_spill] sm:$0xff] %v5671_v7 }
  0xef   : > { %1223 = vrot.lane.b32.xlu0 %v5184_v27, %s4956_s15  ;;  %1217 = vrot.lane.b32.xlu1 %v5186_v28, %s4956_s15 }
  0xf1   : > { %v5679_v17 = vpop.permute.xlu0 %983  ;;  %v5681_v36 = vpop.permute.xlu1 %977 }
  0xf2   : > { %8195 = vst [vmem:[#allocation73_spill] sm:$0xff] %v5679_v17 }
  0xf3   : > { %1227 = vrot.lane.b32.xlu0 %v5210_v49, %s4956_s15  ;;  %1221 = vrot.lane.b32.xlu1 %v5212_v50, %s4956_s15 }
  0xf5   : > { %v5687_v16 = vpop.permute.xlu0 %987  ;;  %v5689_v7 = vpop.permute.xlu1 %981 }
  0xf6   : > { %8196 = vst [vmem:[#allocation74_spill] sm:$0xff] %v5687_v16  ;;  %8197 = vst [vmem:[#allocation75_spill] sm:$0xff] %v5689_v7 }
  0xf7   : > { %1231 = vrot.lane.b32.xlu0 %v5233_v3, %s4956_s15  ;;  %1225 = vrot.lane.b32.xlu1 %v5235_v4, %s4956_s15 }
  0xf9   : > { %v5695_v27 = vpop.permute.xlu0 %991  ;;  %v5697_v28 = vpop.permute.xlu1 %985 }
  0xfa   : > { %8198 = vst [vmem:[#allocation76_spill] sm:$0xff] %v5695_v27  ;;  %8199 = vst [vmem:[#allocation77_spill] sm:$0xff] %v5697_v28 }
  0xfb   : > { %1235 = vrot.lane.b32.xlu0 %v5247_v9, %s4956_s15  ;;  %1229 = vrot.lane.b32.xlu1 %v5249_v10, %s4956_s15 }
  0xfd   : > { %v5703_v49 = vpop.permute.xlu0 %995  ;;  %v5705_v50 = vpop.permute.xlu1 %989 }
  0xfe   : > { %8200 = vst [vmem:[#allocation78_spill] sm:$0xff] %v5703_v49  ;;  %8201 = vst [vmem:[#allocation79_spill] sm:$0xff] %v5705_v50 }
  0xff   : > { %1239 = vrot.lane.b32.xlu0 %v5255_v11, %s4956_s15  ;;  %1233 = vrot.lane.b32.xlu1 %v5257_v12, %s4956_s15 }
 0x101   : > { %v5711_v3 = vpop.permute.xlu0 %999  ;;  %v5713_v4 = vpop.permute.xlu1 %993 }
 0x102   : > { %8202 = vst [vmem:[#allocation80_spill] sm:$0xff] %v5711_v3  ;;  %8203 = vst [vmem:[#allocation81_spill] sm:$0xff] %v5713_v4  ;;  %v8262_v3 = vld [vmem:[#allocation41_spill] sm:$0xff] }
 0x103   : > { %1243 = vrot.lane.b32.xlu0 %v5263_v13, %s4956_s15  ;;  %1237 = vrot.lane.b32.xlu1 %v5265_v14, %s4956_s15 }
 0x105   : > { %v5719_v9 = vpop.permute.xlu0 %1003  ;;  %v5721_v10 = vpop.permute.xlu1 %997 }
 0x106   : > { %8204 = vst [vmem:[#allocation82_spill] sm:$0xff] %v5719_v9  ;;  %8205 = vst [vmem:[#allocation83_spill] sm:$0xff] %v5721_v10  ;;  %v8254_v9 = vld [vmem:[#allocation33_spill] sm:$0xff] }
 0x107   : > { %1247 = vrot.lane.b32.xlu0 %v5271_v15, %s4956_s15  ;;  %1241 = vrot.lane.b32.xlu1 %v5273_v18, %s4956_s15 }
 0x109   : > { %v5727_v11 = vpop.permute.xlu0 %1007  ;;  %v5729_v12 = vpop.permute.xlu1 %1001 }
 0x10a   : > { %8206 = vst [vmem:[#allocation84_spill] sm:$0xff] %v5727_v11  ;;  %8207 = vst [vmem:[#allocation85_spill] sm:$0xff] %v5729_v12 }
 0x10b   : > { %1251 = vrot.lane.b32.xlu0 %v5279_v19, %s4956_s15  ;;  %1245 = vrot.lane.b32.xlu1 %v5281_v20, %s4956_s15 }
 0x10d   : > { %v5735_v13 = vpop.permute.xlu0 %1011  ;;  %v5737_v14 = vpop.permute.xlu1 %1005 }
 0x10e   : > { %8208 = vst [vmem:[#allocation86_spill] sm:$0xff] %v5735_v13  ;;  %8209 = vst [vmem:[#allocation87_spill] sm:$0xff] %v5737_v14 }
 0x10f   : > { %1255 = vrot.lane.b32.xlu0 %v5287_v21, %s4956_s15  ;;  %1249 = vrot.lane.b32.xlu1 %v5289_v22, %s4956_s15 }
 0x111   : > { %v5743_v15 = vpop.permute.xlu0 %1015  ;;  %v5745_v18 = vpop.permute.xlu1 %1009 }
 0x112   : > { %8210 = vst [vmem:[#allocation88_spill] sm:$0xff] %v5743_v15  ;;  %8211 = vst [vmem:[#allocation89_spill] sm:$0xff] %v5745_v18 }
 0x113   : > { %1259 = vrot.lane.b32.xlu0 %v5295_v23, %s4956_s15  ;;  %1253 = vrot.lane.b32.xlu1 %v5297_v24, %s4956_s15 }
 0x115   : > { %v5751_v19 = vpop.permute.xlu0 %1019  ;;  %v5753_v20 = vpop.permute.xlu1 %1013 }
 0x116   : > { %8212 = vst [vmem:[#allocation90_spill] sm:$0xff] %v5751_v19  ;;  %8213 = vst [vmem:[#allocation91_spill] sm:$0xff] %v5753_v20 }
 0x117   : > { %1263 = vrot.lane.b32.xlu0 %v5306_v30, %s4956_s15  ;;  %1257 = vrot.lane.b32.xlu1 %v5308_v31, %s4956_s15  ;;  %v5775_v30 = vld [vmem:[#allocation2 + $0x181] sm:$0xff] }
 0x119   : > { %v5759_v21 = vpop.permute.xlu0 %1087  ;;  %v5761_v22 = vpop.permute.xlu1 %1017 }
 0x11a   : > { %8214 = vst [vmem:[#allocation92_spill] sm:$0xff] %v5761_v22 }
 0x11b   : > { %1267 = vrot.lane.b32.xlu0 %v5315_v33, %s4956_s15  ;;  %1261 = vrot.lane.b32.xlu1 %v5317_v34, %s4956_s15 }
 0x11d   : > { %v5767_v23 = vpop.permute.xlu0 %1091  ;;  %v5769_v24 = vpop.permute.xlu1 %1021 }
 0x11e   : > { %8215 = vst [vmem:[#allocation93_spill] sm:$0xff] %v5769_v24 }
 0x11f   : > { %1271 = vrot.lane.b32.xlu0 %v5326_v38, %s4956_s15  ;;  %1265 = vrot.lane.b32.xlu1 %v5328_v39, %s4956_s15  ;;  %v5793_v38 = vld [vmem:[#allocation2 + $0x189] sm:$0xff] }
 0x121   : > { %v5777_v31 = vpop.permute.xlu0 %1095  ;;  %v5779_v22 = vpop.permute.xlu1 %1089 }
 0x123   : > { %1275 = vrot.lane.b32.xlu0 %v5775_v30, %s4956_s15  ;;  %1269 = vrot.lane.b32.xlu1 %v5335_v41, %s4956_s15 }
 0x125   : > { %v5785_v33 = vpop.permute.xlu0 %1099  ;;  %v5787_v34 = vpop.permute.xlu1 %1093 }
 0x127   : > { %1343 = vrot.lane.b32.xlu0 %v5340_v2, %s4957_s16  ;;  %1273 = vrot.lane.b32.xlu1 %v5342_v42, %s4956_s15 }
 0x129   : > { %v5795_v39 = vpop.permute.xlu0 %1103  ;;  %v5797_v24 = vpop.permute.xlu1 %1097 }
 0x12b   : > { %1347 = vrot.lane.b32.xlu0 %v5348_v43, %s4957_s16  ;;  %1277 = vrot.lane.b32.xlu1 %v5793_v38, %s4956_s15 }
 0x12d   : > { %v5803_v41 = vpop.permute.xlu0 %1107  ;;  %v5805_v19 = vpop.permute.xlu1 %1101 }
 0x12f   : > { %1351 = vrot.lane.b32.xlu0 %v5353_v45, %s4957_s16  ;;  %1345 = vrot.lane.b32.xlu1 %v5355_v46, %s4957_s16 }
 0x131   : > { %v5811_v2 = vpop.permute.xlu0 %1111  ;;  %v5813_v42 = vpop.permute.xlu1 %1105 }
 0x132   : > { %8216 = vst [vmem:[#allocation94_spill] sm:$0xff] %v5811_v2 }
 0x133   : > { %1355 = vrot.lane.b32.xlu0 %v5361_v47, %s4957_s16  ;;  %1349 = vrot.lane.b32.xlu1 %v5363_v48, %s4957_s16 }
 0x135   : > { %v5819_v43 = vpop.permute.xlu0 %1115  ;;  %v5821_v20 = vpop.permute.xlu1 %1109 }
 0x136   : > { %8217 = vst [vmem:[#allocation95_spill] sm:$0xff] %v5819_v43  ;;  %8218 = vst [vmem:[#allocation96_spill] sm:$0xff] %v5821_v20 }
 0x137   : > { %1359 = vrot.lane.b32.xlu0 %v5369_v51, %s4957_s16  ;;  %1353 = vrot.lane.b32.xlu1 %v5371_v52, %s4957_s16 }
 0x139   : > { %v5827_v45 = vpop.permute.xlu0 %1119  ;;  %v5829_v46 = vpop.permute.xlu1 %1113 }
 0x13a   : > { %8219 = vst [vmem:[#allocation97_spill] sm:$0xff] %v5827_v45  ;;  %8220 = vst [vmem:[#allocation98_spill] sm:$0xff] %v5829_v46 }
 0x13b   : > { %1363 = vrot.lane.b32.xlu0 %v5377_v53, %s4957_s16  ;;  %1357 = vrot.lane.b32.xlu1 %v5379_v54, %s4957_s16 }
 0x13d   : > { %v5835_v47 = vpop.permute.xlu0 %1123  ;;  %v5837_v48 = vpop.permute.xlu1 %1117 }
 0x13e   : > { %8221 = vst [vmem:[#allocation99_spill] sm:$0xff] %v5835_v47  ;;  %8222 = vst [vmem:[#allocation100_spill] sm:$0xff] %v5837_v48 }
 0x13f   : > { %1367 = vrot.lane.b32.xlu0 %v5385_v55, %s4957_s16  ;;  %1361 = vrot.lane.b32.xlu1 %v5387_v56, %s4957_s16 }
 0x141   : > { %v5843_v51 = vpop.permute.xlu0 %1127  ;;  %v5845_v52 = vpop.permute.xlu1 %1121 }
 0x142   : > { %8223 = vst [vmem:[#allocation101_spill] sm:$0xff] %v5843_v51  ;;  %8224 = vst [vmem:[#allocation102_spill] sm:$0xff] %v5845_v52  ;;  %v8258_v51 = vld [vmem:[#allocation37_spill] sm:$0xff] }
 0x143   : > { %1371 = vrot.lane.b32.xlu0 %v5393_v57, %s4957_s16  ;;  %1365 = vrot.lane.b32.xlu1 %v5395_v58, %s4957_s16 }
 0x145   : > { %v5851_v53 = vpop.permute.xlu0 %1131  ;;  %v5853_v54 = vpop.permute.xlu1 %1125 }
 0x146   : > { %8225 = vst [vmem:[#allocation103_spill] sm:$0xff] %v5851_v53  ;;  %8226 = vst [vmem:[#allocation104_spill] sm:$0xff] %v5853_v54  ;;  %v8250_v53 = vld [vmem:[#allocation29_spill] sm:$0xff] }
 0x147   : > { %1375 = vrot.lane.b32.xlu0 %v5401_v59, %s4957_s16  ;;  %1369 = vrot.lane.b32.xlu1 %v5403_v60, %s4957_s16 }
 0x149   : > { %v5859_v55 = vpop.permute.xlu0 %1135  ;;  %v5861_v56 = vpop.permute.xlu1 %1129 }
 0x14a   : > { %8227 = vst [vmem:[#allocation105_spill] sm:$0xff] %v5859_v55  ;;  %8228 = vst [vmem:[#allocation106_spill] sm:$0xff] %v5861_v56  ;;  %v8246_v55 = vld [vmem:[#allocation25_spill] sm:$0xff] }
 0x14b   : > { %1379 = vrot.lane.b32.xlu0 %v5409_v61, %s4957_s16  ;;  %1373 = vrot.lane.b32.xlu1 %v5411_v62, %s4957_s16 }
 0x14d   : > { %v5867_v57 = vpop.permute.xlu0 %1139  ;;  %v5869_v58 = vpop.permute.xlu1 %1133 }
 0x14e   : > { %8229 = vst [vmem:[#allocation107_spill] sm:$0xff] %v5867_v57  ;;  %8230 = vst [vmem:[#allocation108_spill] sm:$0xff] %v5869_v58  ;;  %v8242_v57 = vld [vmem:[#allocation18_spill] sm:$0xff] }
 0x14f   : > { %1383 = vrot.lane.b32.xlu0 %v5417_v63, %s4957_s16  ;;  %1377 = vrot.lane.b32.xlu1 %v5419_v0, %s4957_s16 }
 0x151   : > { %v5875_v59 = vpop.permute.xlu0 %1143  ;;  %v5877_v60 = vpop.permute.xlu1 %1137 }
 0x152   : > { %8231 = vst [vmem:[#allocation109_spill] sm:$0xff] %v5875_v59  ;;  %8232 = vst [vmem:[#allocation110_spill] sm:$0xff] %v5877_v60 }
 0x153   : > { %1387 = vrot.lane.b32.xlu0 %v5425_v5, %s4957_s16  ;;  %1381 = vrot.lane.b32.xlu1 %v5427_v6, %s4957_s16  ;;  %v8236_v5 = vld [vmem:[#allocation5_spill] sm:$0xff] }
 0x155   : > { %v5883_v61 = vpop.permute.xlu0 %1147  ;;  %v5885_v62 = vpop.permute.xlu1 %1141 }
 0x156   : > { %8233 = vst [vmem:[#allocation111_spill] sm:$0xff] %v5883_v61  ;;  %8234 = vst [vmem:[#allocation112_spill] sm:$0xff] %v5885_v62  ;;  %v8238_v62 = vld [vmem:[#allocation6_spill] sm:$0xff] }
 0x157   : > { %1391 = vrot.lane.b32.xlu0 %v5435_v8, %s4957_s16  ;;  %1385 = vrot.lane.b32.xlu1 %v5437_v25, %s4957_s16  ;;  %v8239_v8 = vld [vmem:[#allocation7_spill] sm:$0xff]  ;;  %v5907_v25 = vld [vmem:[#allocation2 + $0x182] sm:$0xff] }
 0x159   : > { %v5891_v63 = vpop.permute.xlu0 %1215  ;;  %v5893_v0 = vpop.permute.xlu1 %1145 }
 0x15a   : > { %8235 = vst [vmem:[#allocation113_spill] sm:$0xff] %v5893_v0 }
 0x15b   : > { %1395 = vrot.lane.b32.xlu0 %v5445_v29, %s4957_s16  ;;  %1389 = vrot.lane.b32.xlu1 %v8236_v5, %s4957_s16  ;;  %v8240_v29 = vld [vmem:[#allocation10_spill] sm:$0xff] }
 0x15d   : > { %v5899_v6 = vpop.permute.xlu0 %1219  ;;  %v5901_v61 = vpop.permute.xlu1 %1149 }
 0x15e   : > { %8237 = vst [vmem:[#allocation5_spill] sm:$0xff] %v5901_v61 }
 0x15f   : > { %1399 = vrot.lane.b32.xlu0 %v8238_v62, %s4957_s16  ;;  %1393 = vrot.lane.b32.xlu1 %v8239_v8, %s4957_s16  ;;  %v8241_v62 = vld [vmem:[#allocation15_spill] sm:$0xff] }
 0x160   : > { %v5925_v8 = vld [vmem:[#allocation2 + $0x18a] sm:$0xff] }
 0x161   : > { %v5909_v59 = vpop.permute.xlu0 %1223  ;;  %v5911_v0 = vpop.permute.xlu1 %1217 }
 0x163   : > { %1403 = vrot.lane.b32.xlu0 %v5907_v25, %s4957_s16  ;;  %1397 = vrot.lane.b32.xlu1 %v8240_v29, %s4957_s16 }
 0x165   : > { %v5917_v5 = vpop.permute.xlu0 %1227  ;;  %v5919_v61 = vpop.permute.xlu1 %1221 }
 0x167   : > { %1471 = vrot.lane.b32.xlu0 %v8241_v62, %s4958_s17  ;;  %1401 = vrot.lane.b32.xlu1 %v5474_v37, %s4957_s16  ;;  %v8243_v62 = vld [vmem:[#allocation21_spill] sm:$0xff]  ;;  %v8244_v37 = vld [vmem:[#allocation22_spill] sm:$0xff] }
 0x169   : > { %v5927_v15 = vpop.permute.xlu0 %1231  ;;  %v5929_v60 = vpop.permute.xlu1 %1225 }
 0x16b   : > { %1475 = vrot.lane.b32.xlu0 %v8242_v57, %s4958_s17  ;;  %1405 = vrot.lane.b32.xlu1 %v5925_v8, %s4957_s16  ;;  %v8247_v57 = vld [vmem:[#allocation26_spill] sm:$0xff] }
 0x16d   : > { %v5935_v29 = vpop.permute.xlu0 %1235  ;;  %v5937_v18 = vpop.permute.xlu1 %1229 }
 0x16f   : > { %1479 = vrot.lane.b32.xlu0 %v8243_v62, %s4958_s17  ;;  %1473 = vrot.lane.b32.xlu1 %v8244_v37, %s4958_s17  ;;  %v8251_v62 = vld [vmem:[#allocation30_spill] sm:$0xff] }
 0x171   : > { %v5943_v13 = vpop.permute.xlu0 %1239  ;;  %v5945_v58 = vpop.permute.xlu1 %1233 }
 0x172   : > { %8245 = vst [vmem:[#allocation6_spill] sm:$0xff] %v5943_v13 }
 0x173   : > { %1483 = vrot.lane.b32.xlu0 %v8246_v55, %s4958_s17  ;;  %1477 = vrot.lane.b32.xlu1 %v8247_v57, %s4958_s17  ;;  %v8255_v55 = vld [vmem:[#allocation34_spill] sm:$0xff] }
 0x175   : > { %v5951_v14 = vpop.permute.xlu0 %1243  ;;  %v5953_v11 = vpop.permute.xlu1 %1237 }
 0x176   : > { %8248 = vst [vmem:[#allocation7_spill] sm:$0xff] %v5951_v14  ;;  %8249 = vst [vmem:[#allocation10_spill] sm:$0xff] %v5953_v11 }
 0x177   : > { %1487 = vrot.lane.b32.xlu0 %v8250_v53, %s4958_s17  ;;  %1481 = vrot.lane.b32.xlu1 %v8251_v62, %s4958_s17  ;;  %v8259_v53 = vld [vmem:[#allocation38_spill] sm:$0xff] }
 0x179   : > { %v5959_v37 = vpop.permute.xlu0 %1247  ;;  %v5961_v56 = vpop.permute.xlu1 %1241 }
 0x17a   : > { %8252 = vst [vmem:[#allocation15_spill] sm:$0xff] %v5959_v37  ;;  %8253 = vst [vmem:[#allocation18_spill] sm:$0xff] %v5961_v56 }
 0x17b   : > { %1491 = vrot.lane.b32.xlu0 %v8254_v9, %s4958_s17  ;;  %1485 = vrot.lane.b32.xlu1 %v8255_v55, %s4958_s17  ;;  %v8263_v9 = vld [vmem:[#allocation42_spill] sm:$0xff] }
 0x17d   : > { %v5967_v57 = vpop.permute.xlu0 %1251  ;;  %v5969_v12 = vpop.permute.xlu1 %1245 }
 0x17e   : > { %8256 = vst [vmem:[#allocation21_spill] sm:$0xff] %v5967_v57  ;;  %8257 = vst [vmem:[#allocation22_spill] sm:$0xff] %v5969_v12  ;;  %v8266_v57 = vld [vmem:[#allocation45_spill] sm:$0xff] }
 0x17f   : > { %1495 = vrot.lane.b32.xlu0 %v8258_v51, %s4958_s17  ;;  %1489 = vrot.lane.b32.xlu1 %v8259_v53, %s4958_s17  ;;  %v8267_v51 = vld [vmem:[#allocation46_spill] sm:$0xff] }
 0x181   : > { %v5975_v62 = vpop.permute.xlu0 %1255  ;;  %v5977_v54 = vpop.permute.xlu1 %1249 }
 0x182   : > { %8260 = vst [vmem:[#allocation25_spill] sm:$0xff] %v5975_v62  ;;  %8261 = vst [vmem:[#allocation26_spill] sm:$0xff] %v5977_v54  ;;  %v8270_v54 = vld [vmem:[#allocation49_spill] sm:$0xff] }
 0x183   : > { %1499 = vrot.lane.b32.xlu0 %v8262_v3, %s4958_s17  ;;  %1493 = vrot.lane.b32.xlu1 %v8263_v9, %s4958_s17  ;;  %v8271_v3 = vld [vmem:[#allocation50_spill] sm:$0xff] }
 0x185   : > { %v5983_v55 = vpop.permute.xlu0 %1259  ;;  %v5985_v10 = vpop.permute.xlu1 %1253 }
 0x186   : > { %8264 = vst [vmem:[#allocation29_spill] sm:$0xff] %v5983_v55  ;;  %8265 = vst [vmem:[#allocation30_spill] sm:$0xff] %v5985_v10  ;;  %v8274_v10 = vld [vmem:[#allocation53_spill] sm:$0xff] }
 0x187   : > { %1503 = vrot.lane.b32.xlu0 %v8266_v57, %s4958_s17  ;;  %1497 = vrot.lane.b32.xlu1 %v8267_v51, %s4958_s17  ;;  %v8275_v57 = vld [vmem:[#allocation54_spill] sm:$0xff] }
 0x189   : > { %v5991_v53 = vpop.permute.xlu0 %1263  ;;  %v5993_v62 = vpop.permute.xlu1 %1257 }
 0x18a   : > { %8268 = vst [vmem:[#allocation33_spill] sm:$0xff] %v5991_v53  ;;  %8269 = vst [vmem:[#allocation34_spill] sm:$0xff] %v5993_v62  ;;  %v8278_v62 = vld [vmem:[#allocation57_spill] sm:$0xff] }
 0x18b   : > { %1507 = vrot.lane.b32.xlu0 %v8270_v54, %s4958_s17  ;;  %1501 = vrot.lane.b32.xlu1 %v8271_v3, %s4958_s17  ;;  %v8279_v54 = vld [vmem:[#allocation58_spill] sm:$0xff] }
 0x18d   : > { %v5999_v9 = vpop.permute.xlu0 %1267  ;;  %v6001_v55 = vpop.permute.xlu1 %1261 }
 0x18e   : > { %8272 = vst [vmem:[#allocation37_spill] sm:$0xff] %v5999_v9  ;;  %8273 = vst [vmem:[#allocation38_spill] sm:$0xff] %v6001_v55  ;;  %v8282_v55 = vld [vmem:[#allocation61_spill] sm:$0xff] }
 0x18f   : > { %1511 = vrot.lane.b32.xlu0 %v8274_v10, %s4958_s17  ;;  %1505 = vrot.lane.b32.xlu1 %v8275_v57, %s4958_s17  ;;  %v8283_v10 = vld [vmem:[#allocation62_spill] sm:$0xff] }
 0x191   : > { %v6007_v51 = vpop.permute.xlu0 %1271  ;;  %v6009_v53 = vpop.permute.xlu1 %1265 }
 0x192   : > { %8276 = vst [vmem:[#allocation41_spill] sm:$0xff] %v6007_v51  ;;  %8277 = vst [vmem:[#allocation42_spill] sm:$0xff] %v6009_v53  ;;  %v8285_v53 = vld [vmem:[#allocation65_spill] sm:$0xff] }
 0x193   : > { %1515 = vrot.lane.b32.xlu0 %v8278_v62, %s4958_s17  ;;  %1509 = vrot.lane.b32.xlu1 %v8279_v54, %s4958_s17 }
 0x195   : > { %v6015_v3 = vpop.permute.xlu0 %1275  ;;  %v6017_v9 = vpop.permute.xlu1 %1269 }
 0x196   : > { %8280 = vst [vmem:[#allocation45_spill] sm:$0xff] %v6015_v3  ;;  %8281 = vst [vmem:[#allocation46_spill] sm:$0xff] %v6017_v9  ;;  %v8287_v3 = vld [vmem:[#allocation66_spill] sm:$0xff] }
 0x197   : > { %1519 = vrot.lane.b32.xlu0 %v8282_v55, %s4958_s17  ;;  %1513 = vrot.lane.b32.xlu1 %v8283_v10, %s4958_s17  ;;  %v733_v55 = vld [vmem:[#allocation2 + $0x198] sm:$0xff] }
 0x199   : > { %v6023_v57 = vpop.permute.xlu0 %1343  ;;  %v6025_v51 = vpop.permute.xlu1 %1273 }
 0x19a   : > { %8284 = vst [vmem:[#allocation49_spill] sm:$0xff] %v6025_v51 }
 0x19b   : > { %1523 = vrot.lane.b32.xlu0 %v8285_v53, %s4958_s17  ;;  %1517 = vrot.lane.b32.xlu1 %v5633_v1, %s4958_s17  ;;  %v735_v1 = vld [vmem:[#allocation2 + $0x31] sm:$0xff] }
 0x19d   : > { %v6031_v62 = vpop.permute.xlu0 %1347  ;;  %v6033_v54 = vpop.permute.xlu1 %1277 }
 0x19e   : > { %8286 = vst [vmem:[#allocation50_spill] sm:$0xff] %v6033_v54 }
 0x19f   : > { %1527 = vrot.lane.b32.xlu0 %v8287_v3, %s4958_s17  ;;  %1521 = vrot.lane.b32.xlu1 %v5645_v32, %s4958_s17  ;;  %v737_v32 = vld [vmem:[#allocation2 + $0x49] sm:$0xff]  ;;  %v734_v3 = vld [vmem:[#allocation2 + $0x1a0] sm:$0xff] }
 0x1a1   : > { %v6039_v10 = vpop.permute.xlu0 %1351  ;;  %v6041_v51 = vpop.permute.xlu1 %1345 }
 0x1a3   : > { %1531 = vrot.lane.b32.xlu0 %v733_v55, %s4958_s17  ;;  %1525 = vrot.lane.b32.xlu1 %v5655_v26, %s4958_s17  ;;  %v739_v26 = vld [vmem:[#allocation2 + $0x61] sm:$0xff]  ;;  %v736_v55 = vld [vmem:[#allocation2 + $0x39] sm:$0xff] }
 0x1a5   : > { %v6046_v53 = vpop.permute.xlu0 %1355  ;;  %v6048_v54 = vpop.permute.xlu1 %1349 }
 0x1a7   : > { %1599 = vrot.lane.b32.xlu0 %v735_v1, %s4959_s18  ;;  %1529 = vrot.lane.b32.xlu1 %v5661_v40, %s4958_s17  ;;  %v741_v40 = vld [vmem:[#allocation2 + $0x79] sm:$0xff]  ;;  %v738_v1 = vld [vmem:[#allocation2 + $0x51] sm:$0xff] }
 0x1a9   : > { %v6053_v9 = vpop.permute.xlu0 %1359  ;;  %v6055_v47 = vpop.permute.xlu1 %1353 }
 0x1ab   : > { %1603 = vrot.lane.b32.xlu0 %v737_v32, %s4959_s18  ;;  %1533 = vrot.lane.b32.xlu1 %v734_v3, %s4958_s17  ;;  %v743_v32 = vld [vmem:[#allocation2 + $0x91] sm:$0xff]  ;;  %v740_v3 = vld [vmem:[#allocation2 + $0x69] sm:$0xff] }
 0x1ad   : > { %v6059_v52 = vpop.permute.xlu0 %1363  ;;  %v6061_v49 = vpop.permute.xlu1 %1357 }
 0x1ae   : > { %8288 = vst [vmem:[#allocation53_spill] sm:$0xff] %v6059_v52 }
 0x1af   : > { %1607 = vrot.lane.b32.xlu0 %v739_v26, %s4959_s18  ;;  %1601 = vrot.lane.b32.xlu1 %v736_v55, %s4959_s18  ;;  %v745_v26 = vld [vmem:[#allocation2 + $0xa9] sm:$0xff]  ;;  %v742_v55 = vld [vmem:[#allocation2 + $0x81] sm:$0xff] }
 0x1b1   : > { %v6065_v4 = vpop.permute.xlu0 %1367  ;;  %v6067_v37 = vpop.permute.xlu1 %1361 }
 0x1b2   : > { %8289 = vst [vmem:[#allocation54_spill] sm:$0xff] %v6065_v4 }
 0x1b3   : > { %1611 = vrot.lane.b32.xlu0 %v741_v40, %s4959_s18  ;;  %1605 = vrot.lane.b32.xlu1 %v738_v1, %s4959_s18  ;;  %v747_v40 = vld [vmem:[#allocation2 + $0xc1] sm:$0xff]  ;;  %v744_v1 = vld [vmem:[#allocation2 + $0x99] sm:$0xff] }
 0x1b5   : > { %v6071_v12 = vpop.permute.xlu0 %1371  ;;  %v6073_v45 = vpop.permute.xlu1 %1365 }
 0x1b6   : > { %8290 = vst [vmem:[#allocation57_spill] sm:$0xff] %v6071_v12  ;;  %8291 = vst [vmem:[#allocation58_spill] sm:$0xff] %v6073_v45 }
 0x1b7   : > { %1615 = vrot.lane.b32.xlu0 %v743_v32, %s4959_s18  ;;  %1609 = vrot.lane.b32.xlu1 %v740_v3, %s4959_s18  ;;  %v749_v32 = vld [vmem:[#allocation2 + $0xd9] sm:$0xff]  ;;  %v746_v3 = vld [vmem:[#allocation2 + $0xb1] sm:$0xff] }
 0x1b9   : > { %v6077_v48 = vpop.permute.xlu0 %1375  ;;  %v6079_v27 = vpop.permute.xlu1 %1369 }
 0x1ba   : > { %8292 = vst [vmem:[#allocation61_spill] sm:$0xff] %v6077_v48  ;;  %8293 = vst [vmem:[#allocation62_spill] sm:$0xff] %v6079_v27 }
 0x1bb   : > { %1619 = vrot.lane.b32.xlu0 %v745_v26, %s4959_s18  ;;  %1613 = vrot.lane.b32.xlu1 %v742_v55, %s4959_s18  ;;  %v751_v26 = vld [vmem:[#allocation2 + $0xf1] sm:$0xff]  ;;  %v748_v55 = vld [vmem:[#allocation2 + $0xc9] sm:$0xff] }
 0x1bd   : > { %v6083_v50 = vpop.permute.xlu0 %1379  ;;  %v6085_v12 = vpop.permute.xlu1 %1373 }
 0x1be   : > { %8294 = vst [vmem:[#allocation65_spill] sm:$0xff] %v6083_v50  ;;  %8295 = vst [vmem:[#allocation66_spill] sm:$0xff] %v6085_v12 }
 0x1bf   : > { %1623 = vrot.lane.b32.xlu0 %v747_v40, %s4959_s18  ;;  %1617 = vrot.lane.b32.xlu1 %v744_v1, %s4959_s18  ;;  %v2090_v40 = vld [vmem:[%s8086_s3 + $0x20] sm:$0xf]  ;;  %v753_v1 = vld [vmem:[#allocation2 + $0x109] sm:$0xff] }
 0x1c0   : > { %4764 = vmatprep.subr.msk.mxu0 %vm2188_vm2, %v2090_v40 }
 0x1c1   : > { %v6089_v14 = vpop.permute.xlu0 %1383  ;;  %v6091_v48 = vpop.permute.xlu1 %1377  ;;  %4765 = vmatpush3.msk.msra.mxu0 %vm2188_vm2, %v2090_v40  ;;  %v2087_v40 = vld [vmem:[%s8086_s3 + $0x8] sm:$0xff] }
 0x1c2   : > { %8296 = vst [vmem:[#allocation114_spill] sm:$0xff] %v6089_v14  ;;  %8297 = vst [vmem:[#allocation115_spill] sm:$0xff] %v6091_v48  ;;  %v750_v14 = vld [vmem:[#allocation2 + $0xe1] sm:$0xff] }
 0x1c3   : > { %1627 = vrot.lane.b32.xlu0 %v749_v32, %s4959_s18  ;;  %1621 = vrot.lane.b32.xlu1 %v746_v3, %s4959_s18 }
 0x1c5   : > { %v6095_v27 = vpop.permute.xlu0 %1387  ;;  %v6097_v50 = vpop.permute.xlu1 %1381 }
 0x1c6   : > { %8298 = vst [vmem:[#allocation116_spill] sm:$0xff] %v6095_v27  ;;  %8299 = vst [vmem:[#allocation117_spill] sm:$0xff] %v6097_v50  ;;  %v2089_v27 = vld [vmem:[%s8086_s3 + $0x18] sm:$0xff] }
 0x1c7   : > { %1631 = vrot.lane.b32.xlu0 %v751_v26, %s4959_s18  ;;  %1625 = vrot.lane.b32.xlu1 %v748_v55, %s4959_s18  ;;  %v2088_v26 = vld [vmem:[%s8086_s3 + $0x10] sm:$0xff]  ;;  %v755_v55 = vld [vmem:[#allocation2 + $0x121] sm:$0xff]  ;;  %v752_v50 = vld [vmem:[#allocation2 + $0xf9] sm:$0xff] }
 0x1c8   : > { %4766 = vmatprep.subr.mxu0 %v2089_v27 }
 0x1c9   : > { %v6105_v32 = vpop.permute.xlu0 %1391  ;;  %v6107_v3 = vpop.permute.xlu1 %1385  ;;  %4767 = vmatpush3.msra.mxu0 %v2089_v27  ;;  %v2086_v27 = vld [vmem:[%s8086_s3] sm:$0xff] }
 0x1ca   : > { %8300 = vst [vmem:[#allocation118_spill] sm:$0xff] %v6105_v32  ;;  %8301 = vst [vmem:[#allocation119_spill] sm:$0xff] %v6107_v3  ;;  %4768 = vmatprep.subr.mxu0 %v2088_v26 }
 0x1cb   : > { %1635 = vrot.lane.b32.xlu0 %v753_v1, %s4959_s18  ;;  %1629 = vrot.lane.b32.xlu1 %v750_v14, %s4959_s18  ;;  %v757_v14 = vld [vmem:[#allocation2 + $0x139] sm:$0xff]  ;;  %v754_v1 = vld [vmem:[#allocation2 + $0x111] sm:$0xff] }
 0x1cc   : > { %4769 = vmatpush3.msra.mxu0 %v2088_v26 }
 0x1cd   : > { %v6118_v32 = vpop.permute.xlu0 %1395  ;;  %v6120_v3 = vpop.permute.xlu1 %1389  ;;  %4770 = vmatprep.subr.mxu0 %v2087_v40 }
 0x1ce   : > { %8302 = vst [vmem:[#allocation120_spill] sm:$0xff] %v6118_v32  ;;  %8303 = vst [vmem:[#allocation121_spill] sm:$0xff] %v6120_v3  ;;  %4771 = vmatpush3.msra.mxu0 %v2087_v40  ;;  %v756_v32 = vld [vmem:[#allocation2 + $0x129] sm:$0xff] }
 0x1cf   : > { %1639 = vrot.lane.b32.xlu0 %v755_v55, %s4959_s18  ;;  %1633 = vrot.lane.b32.xlu1 %v752_v50, %s4959_s18  ;;  %v767_v55 = vld [vmem:[#allocation2 + $0x32] sm:$0xff] }
 0x1d0   : > { %4772 = vmatprep.subr.mxu0 %v2086_v27 }
 0x1d1   : > { %v6127_v48 = vpop.permute.xlu0 %1399  ;;  %v6129_v12 = vpop.permute.xlu1 %1393  ;;  %4773 = vmatpush3.msra.mxu0 %v2086_v27 }
 0x1d2   : > { %8304 = vst [vmem:[#allocation122_spill] sm:$0xff] %v6127_v48  ;;  %8305 = vst [vmem:[#allocation123_spill] sm:$0xff] %v6129_v12  ;;  %v769_v48 = vld [vmem:[#allocation2 + $0x4a] sm:$0xff]  ;;  %v758_v12 = vld [vmem:[#allocation2 + $0x141] sm:$0xff] }
 0x1d3   : > { %1643 = vrot.lane.b32.xlu0 %v757_v14, %s4959_s18  ;;  %1637 = vrot.lane.b32.xlu1 %v754_v1, %s4959_s18  ;;  %v771_v1 = vld [vmem:[#allocation2 + $0x62] sm:$0xff] }
 0x1d5   : > { %v6136_v50 = vpop.permute.xlu0 %1403  ;;  %v6138_v26 = vpop.permute.xlu1 %1397 }
 0x1d6   : > { %8306 = vst [vmem:[#allocation124_spill] sm:$0xff] %v6136_v50  ;;  %8307 = vst [vmem:[#allocation125_spill] sm:$0xff] %v6138_v26  ;;  %v768_v50 = vld [vmem:[#allocation2 + $0x3a] sm:$0xff] }
 0x1d7   : > { %1727 = vrot.lane.b32.xlu0 %v767_v55, %s4960_s10  ;;  %1641 = vrot.lane.b32.xlu1 %v756_v32, %s4959_s18  ;;  %v773_v32 = vld [vmem:[#allocation2 + $0x7a] sm:$0xff]  ;;  %v770_v55 = vld [vmem:[#allocation2 + $0x52] sm:$0xff] }
 0x1d9   : > { %v6142_v40 = vpop.permute.xlu0 %1471  ;;  %v6144_v14 = vpop.permute.xlu1 %1401 }
 0x1da   : > { %8308 = vst [vmem:[#allocation126_spill] sm:$0xff] %v6144_v14 }
 0x1db   : > { %1731 = vrot.lane.b32.xlu0 %v769_v48, %s4960_s10  ;;  %1645 = vrot.lane.b32.xlu1 %v758_v12, %s4959_s18  ;;  %v775_v12 = vld [vmem:[#allocation2 + $0x92] sm:$0xff]  ;;  %v772_v48 = vld [vmem:[#allocation2 + $0x6a] sm:$0xff] }
 0x1dd   : > { %v6148_v3 = vpop.permute.xlu0 %1475  ;;  %v6150_v27 = vpop.permute.xlu1 %1405 }
 0x1de   : > { %8309 = vst [vmem:[#allocation127_spill] sm:$0xff] %v6150_v27 }
 0x1df   : > { %1735 = vrot.lane.b32.xlu0 %v771_v1, %s4960_s10  ;;  %1729 = vrot.lane.b32.xlu1 %v768_v50, %s4960_s10  ;;  %v777_v50 = vld [vmem:[#allocation2 + $0xaa] sm:$0xff]  ;;  %v774_v1 = vld [vmem:[#allocation2 + $0x82] sm:$0xff] }
 0x1e1   : > { %v6154_v26 = vpop.permute.xlu0 %1479  ;;  %v6156_v56 = vpop.permute.xlu1 %1473 }
 0x1e3   : > { %1739 = vrot.lane.b32.xlu0 %v773_v32, %s4960_s10  ;;  %1733 = vrot.lane.b32.xlu1 %v770_v55, %s4960_s10  ;;  %v779_v32 = vld [vmem:[#allocation2 + $0xc2] sm:$0xff]  ;;  %v776_v55 = vld [vmem:[#allocation2 + $0x9a] sm:$0xff] }
 0x1e5   : > { %v6160_v14 = vpop.permute.xlu0 %1483  ;;  %v6162_v43 = vpop.permute.xlu1 %1477 }
 0x1e7   : > { %1743 = vrot.lane.b32.xlu0 %v775_v12, %s4960_s10  ;;  %1737 = vrot.lane.b32.xlu1 %v772_v48, %s4960_s10  ;;  %v781_v12 = vld [vmem:[#allocation2 + $0xda] sm:$0xff]  ;;  %v778_v48 = vld [vmem:[#allocation2 + $0xb2] sm:$0xff] }
 0x1e9   : > { %v6166_v27 = vpop.permute.xlu0 %1487  ;;  %v6168_v46 = vpop.permute.xlu1 %1481 }
 0x1eb   : > { %1747 = vrot.lane.b32.xlu0 %v777_v50, %s4960_s10  ;;  %1741 = vrot.lane.b32.xlu1 %v774_v1, %s4960_s10  ;;  %v783_v50 = vld [vmem:[#allocation2 + $0xf2] sm:$0xff]  ;;  %v780_v1 = vld [vmem:[#allocation2 + $0xca] sm:$0xff] }
 0x1ed   : > { %v6172_v16 = vpop.permute.xlu0 %1491  ;;  %v6174_v4 = vpop.permute.xlu1 %1485 }
 0x1ee   : > { %8310 = vst [vmem:[#allocation128_spill] sm:$0xff] %v6172_v16 }
 0x1ef   : > { %1751 = vrot.lane.b32.xlu0 %v779_v32, %s4960_s10  ;;  %1745 = vrot.lane.b32.xlu1 %v776_v55, %s4960_s10  ;;  %v785_v32 = vld [vmem:[#allocation2 + $0x10a] sm:$0xff]  ;;  %v782_v55 = vld [vmem:[#allocation2 + $0xe2] sm:$0xff] }
 0x1f1   : > { %v6178_v28 = vpop.permute.xlu0 %1495  ;;  %v6180_v45 = vpop.permute.xlu1 %1489 }
 0x1f2   : > { %8311 = vst [vmem:[#allocation129_spill] sm:$0xff] %v6178_v28  ;;  %8312 = vst [vmem:[#allocation130_spill] sm:$0xff] %v6180_v45 }
 0x1f3   : > { %1755 = vrot.lane.b32.xlu0 %v781_v12, %s4960_s10  ;;  %1749 = vrot.lane.b32.xlu1 %v778_v48, %s4960_s10  ;;  %v787_v12 = vld [vmem:[#allocation2 + $0x122] sm:$0xff]  ;;  %v784_v48 = vld [vmem:[#allocation2 + $0xfa] sm:$0xff] }
 0x1f5   : > { %v6184_v13 = vpop.permute.xlu0 %1499  ;;  %v6186_v11 = vpop.permute.xlu1 %1493 }
 0x1f6   : > { %8313 = vst [vmem:[#allocation131_spill] sm:$0xff] %v6184_v13  ;;  %8314 = vst [vmem:[#allocation132_spill] sm:$0xff] %v6186_v11 }
 0x1f7   : > { %1759 = vrot.lane.b32.xlu0 %v783_v50, %s4960_s10  ;;  %1753 = vrot.lane.b32.xlu1 %v780_v1, %s4960_s10  ;;  %v789_v50 = vld [vmem:[#allocation2 + $0x13a] sm:$0xff]  ;;  %v786_v1 = vld [vmem:[#allocation2 + $0x112] sm:$0xff] }
 0x1f9   : > { %v6190_v2 = vpop.permute.xlu0 %1503  ;;  %v6192_v28 = vpop.permute.xlu1 %1497 }
 0x1fa   : > { %8315 = vst [vmem:[#allocation133_spill] sm:$0xff] %v6190_v2  ;;  %8316 = vst [vmem:[#allocation134_spill] sm:$0xff] %v6192_v28 }
 0x1fb   : > { %1763 = vrot.lane.b32.xlu0 %v785_v32, %s4960_s10  ;;  %1757 = vrot.lane.b32.xlu1 %v782_v55, %s4960_s10  ;;  %v759_v32 = vld [vmem:[#allocation2 + $0x151] sm:$0xff] }
 0x1fc   : > { %v788_v55 = vld [vmem:[#allocation2 + $0x12a] sm:$0xff] }
 0x1fd   : > { %v6196_v16 = vpop.permute.xlu0 %1507  ;;  %v6198_v13 = vpop.permute.xlu1 %1501 }
 0x1fe   : > { %8317 = vst [vmem:[#allocation135_spill] sm:$0xff] %v6196_v16  ;;  %8318 = vst [vmem:[#allocation136_spill] sm:$0xff] %v6198_v13 }
 0x1ff   : > { %1767 = vrot.lane.b32.xlu0 %v787_v12, %s4960_s10  ;;  %1761 = vrot.lane.b32.xlu1 %v784_v48, %s4960_s10  ;;  %v791_v12 = vld [vmem:[#allocation2 + $0x152] sm:$0xff]  ;;  %v790_v48 = vld [vmem:[#allocation2 + $0x142] sm:$0xff] }
 0x201   : > { %v6202_v11 = vpop.permute.xlu0 %1511  ;;  %v6204_v2 = vpop.permute.xlu1 %1505 }
 0x202   : > { %8319 = vst [vmem:[#allocation137_spill] sm:$0xff] %v6202_v11  ;;  %8320 = vst [vmem:[#allocation138_spill] sm:$0xff] %v6204_v2 }
 0x203   : > { %1771 = vrot.lane.b32.xlu0 %v789_v50, %s4960_s10  ;;  %1765 = vrot.lane.b32.xlu1 %v786_v1, %s4960_s10  ;;  %v761_v50 = vld [vmem:[#allocation2 + $0x169] sm:$0xff]  ;;  %v760_v1 = vld [vmem:[#allocation2 + $0x159] sm:$0xff] }
 0x205   : > { %v6208_v28 = vpop.permute.xlu0 %1515  ;;  %v6210_v16 = vpop.permute.xlu1 %1509 }
 0x206   : > { %8321 = vst [vmem:[#allocation139_spill] sm:$0xff] %v6208_v28  ;;  %8322 = vst [vmem:[#allocation140_spill] sm:$0xff] %v6210_v16 }
 0x207   : > { %1647 = vrot.lane.b32.xlu0 %v759_v32, %s4959_s18  ;;  %1769 = vrot.lane.b32.xlu1 %v788_v55, %s4960_s10  ;;  %v793_v32 = vld [vmem:[#allocation2 + $0x16a] sm:$0xff]  ;;  %v792_v55 = vld [vmem:[#allocation2 + $0x15a] sm:$0xff] }
 0x209   : > { %v6214_v13 = vpop.permute.xlu0 %1519  ;;  %v6216_v11 = vpop.permute.xlu1 %1513 }
 0x20a   : > { %8323 = vst [vmem:[#allocation141_spill] sm:$0xff] %v6214_v13  ;;  %8324 = vst [vmem:[#allocation142_spill] sm:$0xff] %v6216_v11 }
 0x20b   : > { %1775 = vrot.lane.b32.xlu0 %v791_v12, %s4960_s10  ;;  %1773 = vrot.lane.b32.xlu1 %v790_v48, %s4960_s10  ;;  %v762_v12 = vld [vmem:[#allocation2 + $0x171] sm:$0xff] }
 0x20d   : > { %v6220_v2 = vpop.permute.xlu0 %1523  ;;  %v6222_v28 = vpop.permute.xlu1 %1517 }
 0x20e   : > { %8325 = vst [vmem:[#allocation143_spill] sm:$0xff] %v6220_v2  ;;  %8326 = vst [vmem:[#allocation144_spill] sm:$0xff] %v6222_v28 }
 0x20f   : > { %1651 = vrot.lane.b32.xlu0 %v761_v50, %s4959_s18  ;;  %1649 = vrot.lane.b32.xlu1 %v760_v1, %s4959_s18  ;;  %v794_v50 = vld [vmem:[#allocation2 + $0x172] sm:$0xff] }
 0x211   : > { %v6226_v16 = vpop.permute.xlu0 %1527  ;;  %v6228_v13 = vpop.permute.xlu1 %1521 }
 0x212   : > { %8327 = vst [vmem:[#allocation145_spill] sm:$0xff] %v6226_v16  ;;  %8328 = vst [vmem:[#allocation146_spill] sm:$0xff] %v6228_v13 }
 0x213   : > { %1779 = vrot.lane.b32.xlu0 %v793_v32, %s4960_s10  ;;  %1777 = vrot.lane.b32.xlu1 %v792_v55, %s4960_s10  ;;  %v765_v32 = vld [vmem:[#allocation2 + $0x199] sm:$0xff] }
 0x215   : > { %v6232_v48 = vpop.permute.xlu0 %1531  ;;  %v6234_v2 = vpop.permute.xlu1 %1525 }
 0x216   : > { %8329 = vst [vmem:[#allocation147_spill] sm:$0xff] %v6232_v48  ;;  %8330 = vst [vmem:[#allocation148_spill] sm:$0xff] %v6234_v2 }
 0x217   : > { %1655 = vrot.lane.b32.xlu0 %v5775_v30, %s4959_s18  ;;  %1653 = vrot.lane.b32.xlu1 %v762_v12, %s4959_s18  ;;  %v797_v30 = vld [vmem:[#allocation2 + $0x19a] sm:$0xff] }
 0x219   : > { %v1600_v1 = vpop.permute.xlu0 %1599  ;;  %v6239_v28 = vpop.permute.xlu1 %1529 }
 0x21a   : > { %8331 = vst [vmem:[#allocation149_spill] sm:$0xff] %v6239_v28 }
 0x21b   : > { %1783 = vrot.lane.b32.xlu0 %v5907_v25, %s4960_s10  ;;  %1781 = vrot.lane.b32.xlu1 %v794_v50, %s4960_s10  ;;  %v766_v25 = vld [vmem:[#allocation2 + $0x1a1] sm:$0xff] }
 0x21d   : > { %v6244_v55 = vpop.permute.xlu0 %1603  ;;  %v6246_v48 = vpop.permute.xlu1 %1533 }
 0x21e   : > { %8332 = vst [vmem:[#allocation150_spill] sm:$0xff] %v6246_v48 }
 0x21f   : > { %1659 = vrot.lane.b32.xlu0 %v765_v32, %s4959_s18  ;;  %1657 = vrot.lane.b32.xlu1 %v5793_v38, %s4959_s18  ;;  %v798_v32 = vld [vmem:[#allocation2 + $0x1a2] sm:$0xff] }
 0x221   : > { %v6251_v12 = vpop.permute.xlu0 %1607  ;;  %v6253_v2 = vpop.permute.xlu1 %1601 }
 0x223   : > { %1787 = vrot.lane.b32.xlu0 %v797_v30, %s4960_s10  ;;  %1785 = vrot.lane.b32.xlu1 %v5925_v8, %s4960_s10 }
 0x225   : > { %v6258_v50 = vpop.permute.xlu0 %1611  ;;  %v6260_v28 = vpop.permute.xlu1 %1605 }
 0x227   : > { %1661 = vrot.lane.b32.xlu1 %v766_v25, %s4959_s18 }
 0x229   : > { %v6263_v48 = vpop.permute.xlu0 %1615  ;;  %v6265_v38 = vpop.permute.xlu1 %1609 }
 0x22b   : > { %1789 = vrot.lane.b32.xlu1 %v798_v32, %s4960_s10  ;;  %v510_v32 = vld [vmem:[#allocation2] sm:$0xff] }
 0x22d   : > { %v6268_v16 = vpop.permute.xlu0 %1619  ;;  %v6270_v30 = vpop.permute.xlu1 %1613 }
 0x22e   : > { %8333 = vst [vmem:[#allocation151_spill] sm:$0xff] %v6268_v16 }
 0x231   : > { %v6272_v13 = vpop.permute.xlu0 %1623  ;;  %v6274_v8 = vpop.permute.xlu1 %1617 }
 0x232   : > { %8334 = vst [vmem:[#allocation152_spill] sm:$0xff] %v6272_v13  ;;  %v8343_v13 = vld [vmem:[#allocation3_spill] sm:$0xff] }
 0x235   : > { %v6276_v11 = vpop.permute.xlu0 %1627  ;;  %v6278_v20 = vpop.permute.xlu1 %1621 }
 0x236   : > { %8335 = vst [vmem:[#allocation153_spill] sm:$0xff] %v6276_v11  ;;  %8336 = vst [vmem:[#allocation154_spill] sm:$0xff] %v6278_v20  ;;  %v1823_v11 = vsel %vm279_vm0, %v510_v32, %v8343_v13  ;;  %v8344_v20 = vld [vmem:[#allocation59_spill] sm:$0xff]  ;;  %v511_v32 = vld [vmem:[#allocation2 + $0x8] sm:$0xff] }
 0x239   : > { %v6280_v25 = vpop.permute.xlu0 %1631  ;;  %v6282_v17 = vpop.permute.xlu1 %1625 }
 0x23a   : > { %8337 = vst [vmem:[#allocation155_spill] sm:$0xff] %v6280_v25  ;;  %8338 = vst [vmem:[#allocation156_spill] sm:$0xff] %v6282_v17  ;;  %v1856_v25 = vsel %vm1855_vm3, %v1823_v11, %v8344_v20 }
 0x23d   : > { %v6284_v45 = vpop.permute.xlu0 %1635  ;;  %v6286_v52 = vpop.permute.xlu1 %1629 }
 0x23e   : > { %8339 = vst [vmem:[#allocation157_spill] sm:$0xff] %v6284_v45  ;;  %8340 = vst [vmem:[#allocation158_spill] sm:$0xff] %v6286_v52  ;;  %v1889_v45 = vsel %vm1888_vm4, %v1856_v25, %v5759_v21 }
 0x241   : > { %v6288_v16 = vpop.permute.xlu0 %1639  ;;  %v6290_v7 = vpop.permute.xlu1 %1633 }
 0x242   : > { %8341 = vst [vmem:[#allocation159_spill] sm:$0xff] %v6288_v16  ;;  %8342 = vst [vmem:[#allocation160_spill] sm:$0xff] %v6290_v7  ;;  %v1922_v16 = vsel %vm1921_vm5, %v1889_v45, %v5891_v63  ;;  %v4897_v63 = vld [vmem:[#allocation2 + $0x18] sm:$0xff] }
 0x243   : > { %v1955_v13 = vsel %vm1954_vm6, %v1922_v16, %v6023_v57  ;;  %v8349_v16 = vld [vmem:[#allocation9_spill] sm:$0xff]  ;;  %v8350_v7 = vld [vmem:[#allocation68_spill] sm:$0xff] }
 0x244   : > { %v1988_v11 = vsel %vm1987_vm7, %v1955_v13, %v6142_v40  ;;  %v1825_v57 = vsel %vm279_vm0, %v4897_v63, %v8349_v16  ;;  %v8351_v13 = vld [vmem:[#allocation63_spill] sm:$0xff] }
 0x245   : > { %v6298_v52 = vpop.permute.xlu0 %1643  ;;  %v6300_v17 = vpop.permute.xlu1 %1637  ;;  %v2021_v20 = vsel %vm2020_vm8, %v1988_v11, %v1600_v1  ;;  %v1858_v1 = vsel %vm1855_vm3, %v1825_v57, %v8351_v13  ;;  %v8354_v13 = vld [vmem:[#allocation11_spill] sm:$0xff] }
 0x246   : > { %8345 = vst [vmem:[#allocation3_spill] sm:$0xff] %v6298_v52  ;;  %8346 = vst [vmem:[#allocation59_spill] sm:$0xff] %v6300_v17  ;;  %v8348_v17 = vld [vmem:[#allocation4_spill] sm:$0xff] }
 0x247   : > { %v1824_v45 = vsel %vm279_vm0, %v511_v32, %v8348_v17  ;;  %v1891_v17 = vsel %vm1888_vm4, %v1858_v1, %v5767_v23  ;;  %v4898_v32 = vld [vmem:[#allocation2 + $0x30] sm:$0xff]  ;;  %v8355_v1 = vld [vmem:[#allocation70_spill] sm:$0xff] }
 0x248   : > { %v1857_v40 = vsel %vm1855_vm3, %v1824_v45, %v8350_v7  ;;  %v4899_v7 = vld [vmem:[#allocation2 + $0x20] sm:$0xff]  ;;  %v8353_v45 = vld [vmem:[#allocation12_spill] sm:$0xff] }
 0x249   : > { %v1728_v21 = vpop.permute.xlu0 %1727  ;;  %v6309_v25 = vpop.permute.xlu1 %1641  ;;  %v1890_v11 = vsel %vm1888_vm4, %v1857_v40, %v5779_v22  ;;  %v1826_v16 = vsel %vm279_vm0, %v4899_v7, %v8353_v45  ;;  %v1924_v22 = vsel %vm1921_vm5, %v1891_v17, %v5899_v6  ;;  %v4900_v40 = vld [vmem:[#allocation2 + $0x48] sm:$0xff] }
 0x24a   : > { %8347 = vst [vmem:[#allocation161_spill] sm:$0xff] %v6309_v25  ;;  %v2054_v52 = vsel %vm2053_vm9, %v2021_v20, %v1728_v21  ;;  %v8352_v21 = vld [vmem:[#allocation8_spill] sm:$0xff]  ;;  %v1829_v23 = vsel %vm279_vm0, %v4900_v40, %v8354_v13  ;;  %v8358_v40 = vld [vmem:[#allocation13_spill] sm:$0xff] }
 0x24b   : > { %4774 = vmatprep.mubr.msk.f32.mxu0 %vm2091_vm10, %v2054_v52  ;;  %v1923_v52 = vsel %vm1921_vm5, %v1890_v11, %v5911_v0  ;;  %v1827_v63 = vsel %vm279_vm0, %v4898_v32, %v8352_v21  ;;  %v1859_v0 = vsel %vm1855_vm3, %v1826_v16, %v8355_v1  ;;  %v1957_v11 = vsel %vm1954_vm6, %v1924_v22, %v6031_v62  ;;  %v8356_v21 = vld [vmem:[#allocation67_spill] sm:$0xff]  ;;  %v8357_v22 = vld [vmem:[#allocation14_spill] sm:$0xff] }
 0x24c   : > { %v1956_v57 = vsel %vm1954_vm6, %v1923_v52, %v6041_v51  ;;  %v1860_v7 = vsel %vm1855_vm3, %v1827_v63, %v8356_v21  ;;  %v1892_v6 = vsel %vm1888_vm4, %v1859_v0, %v5787_v34  ;;  %v1990_v51 = vsel %vm1987_vm7, %v1957_v11, %v6148_v3  ;;  %v4901_v34 = vld [vmem:[#allocation2 + $0x38] sm:$0xff] }
 0x24d   : > { %v1732_v25 = vpop.permute.xlu0 %1731  ;;  %v6323_v20 = vpop.permute.xlu1 %1645  ;;  %v1989_v32 = vsel %vm1987_vm7, %v1956_v57, %v6156_v56  ;;  %v1893_v62 = vsel %vm1888_vm4, %v1860_v7, %v5777_v31  ;;  %v1925_v56 = vsel %vm1921_vm5, %v1892_v6, %v5919_v61  ;;  %v2023_v63 = vsel %vm2020_vm8, %v1990_v51, %v6244_v55  ;;  %v4902_v61 = vld [vmem:[#allocation2 + $0x60] sm:$0xff] }
 0x24e   : > { %v2022_v17 = vsel %vm2020_vm8, %v1989_v32, %v6253_v2  ;;  %v1828_v3 = vsel %vm279_vm0, %v4901_v34, %v8357_v22  ;;  %v1926_v2 = vsel %vm1921_vm5, %v1893_v62, %v5909_v59  ;;  %v1958_v57 = vsel %vm1954_vm6, %v1925_v56, %v6048_v54  ;;  %v8359_v54 = vld [vmem:[#allocation69_spill] sm:$0xff] }
 0x24f   : > { %v2056_v31 = vsel %vm2053_vm9, %v2023_v63, %v1732_v25  ;;  %v1831_v55 = vsel %vm279_vm0, %v4902_v61, %v8358_v40  ;;  %v1861_v13 = vsel %vm1855_vm3, %v1828_v3, %v5665_v35  ;;  %v1959_v1 = vsel %vm1954_vm6, %v1926_v2, %v6039_v10  ;;  %v8360_v6 = vld [vmem:[#allocation17_spill] sm:$0xff]  ;;  %v8363_v2 = vld [vmem:[#allocation20_spill] sm:$0xff] }
 0x250   : > { %v1991_v59 = vsel %vm1987_vm7, %v1958_v57, %v6162_v43  ;;  %v1862_v25 = vsel %vm1855_vm3, %v1829_v23, %v8359_v54  ;;  %v1894_v0 = vsel %vm1888_vm4, %v1861_v13, %v5797_v24  ;;  %v1992_v11 = vsel %vm1987_vm7, %v1959_v1, %v6154_v26  ;;  %v4903_v24 = vld [vmem:[#allocation2 + $0x50] sm:$0xff] }
 0x251   : > { %v1736_v52 = vpop.permute.xlu0 %1735  ;;  %v1730_v45 = vpop.permute.xlu1 %1729  ;;  %v2024_v35 = vsel %vm2020_vm8, %v1991_v59, %v6260_v28  ;;  %v1895_v10 = vsel %vm1888_vm4, %v1862_v25, %v5785_v33  ;;  %v1927_v43 = vsel %vm1921_vm5, %v1894_v0, %v5929_v60  ;;  %v2025_v23 = vsel %vm2020_vm8, %v1992_v11, %v6251_v12  ;;  %v4904_v60 = vld [vmem:[#allocation2 + $0x78] sm:$0xff] }
 0x252   : > { %v2055_v16 = vsel %vm2053_vm9, %v2022_v17, %v1730_v45  ;;  %v1830_v26 = vsel %vm279_vm0, %v4903_v24, %v8360_v6  ;;  %v1928_v28 = vsel %vm1921_vm5, %v1895_v10, %v5917_v5  ;;  %v1960_v51 = vsel %vm1954_vm6, %v1927_v43, %v6055_v47  ;;  %v8361_v17 = vld [vmem:[#allocation16_spill] sm:$0xff]  ;;  %v8362_v47 = vld [vmem:[#allocation71_spill] sm:$0xff]  ;;  %v8369_v43 = vld [vmem:[#allocation53_spill] sm:$0xff] }
 0x253   : > { %4775 = vmatmul.mubr.msk.f32.vlgmr.msra.gmra.mxu0 %vm2091_vm10, %v2055_v16  ;;  %v2058_v33 = vsel %vm2053_vm9, %v2025_v23, %v1736_v52  ;;  %v1833_v12 = vsel %vm279_vm0, %v4904_v60, %v8361_v17  ;;  %v1863_v45 = vsel %vm1855_vm3, %v1830_v26, %v5673_v44  ;;  %v1961_v62 = vsel %vm1954_vm6, %v1928_v28, %v6046_v53  ;;  %v8366_v11 = vld [vmem:[#allocation24_spill] sm:$0xff] }
 0x254   : > { %4777 = vmatprep.mubr.msk.f32.mxu0 %vm2091_vm10, %v2056_v31  ;;  %v1993_v5 = vsel %vm1987_vm7, %v1960_v51, %v6168_v46  ;;  %v1864_v52 = vsel %vm1855_vm3, %v1831_v55, %v8362_v47  ;;  %v1896_v56 = vsel %vm1888_vm4, %v1863_v45, %v5805_v19  ;;  %v1994_v63 = vsel %vm1987_vm7, %v1961_v62, %v6160_v14  ;;  %v4905_v19 = vld [vmem:[#allocation2 + $0x68] sm:$0xff]  ;;  %v8364_v31 = vld [vmem:[#allocation19_spill] sm:$0xff]  ;;  %v8372_v6 = vld [vmem:[#allocation96_spill] sm:$0xff] }
 0x255   : > { %v1740_v32 = vpop.permute.xlu0 %1739  ;;  %v1734_v21 = vpop.permute.xlu1 %1733  ;;  %v2026_v44 = vsel %vm2020_vm8, %v1993_v5, %v6265_v38  ;;  %v1897_v53 = vsel %vm1888_vm4, %v1864_v52, %v5795_v39  ;;  %v1929_v46 = vsel %vm1921_vm5, %v1896_v56, %v5937_v18  ;;  %v2027_v22 = vsel %vm2020_vm8, %v1994_v63, %v6258_v50  ;;  %v4906_v18 = vld [vmem:[#allocation2 + $0x90] sm:$0xff]  ;;  %v8373_v28 = vld [vmem:[#allocation128_spill] sm:$0xff]  ;;  %v8375_v62 = vld [vmem:[#allocation10_spill] sm:$0xff] }
 0x256   : > { %v2057_v7 = vsel %vm2053_vm9, %v2024_v35, %v1734_v21  ;;  %v1832_v14 = vsel %vm279_vm0, %v4905_v19, %v8363_v2  ;;  %v1930_v38 = vsel %vm1921_vm5, %v1897_v53, %v5927_v15  ;;  %v1962_v57 = vsel %vm1954_vm6, %v1929_v46, %v6061_v49  ;;  %v8365_v49 = vld [vmem:[#allocation72_spill] sm:$0xff]  ;;  %v8368_v21 = vld [vmem:[#allocation75_spill] sm:$0xff]  ;;  %v8379_v53 = vld [vmem:[#allocation58_spill] sm:$0xff] }
 0x257   : > { %4778 = vmatmul.mubr.msk.f32.gmra.mxu0 %vm2091_vm10, %v2057_v7  ;;  %v2060_v39 = vsel %vm2053_vm9, %v2027_v22, %v1740_v32  ;;  %v1835_v50 = vsel %vm279_vm0, %v4906_v18, %v8364_v31  ;;  %v1865_v61 = vsel %vm1855_vm3, %v1832_v14, %v5681_v36  ;;  %v1963_v40 = vsel %vm1954_vm6, %v1930_v38, %v6053_v9  ;;  %v8367_v32 = vld [vmem:[#allocation23_spill] sm:$0xff]  ;;  %v8370_v7 = vld [vmem:[#allocation130_spill] sm:$0xff]  ;;  %v4909_v63 = vld [vmem:[#allocation2 + $0x98] sm:$0xff] }
 0x258   : > { %4780 = vmatprep.mubr.msk.f32.mxu0 %vm2091_vm10, %v2058_v33  ;;  %v1995_v15 = vsel %vm1987_vm7, %v1962_v57, %v6174_v4  ;;  %v1866_v55 = vsel %vm1855_vm3, %v1833_v12, %v8365_v49  ;;  %v1898_v13 = vsel %vm1888_vm4, %v1865_v61, %v5813_v42  ;;  %v1996_v1 = vsel %vm1987_vm7, %v1963_v40, %v6166_v27  ;;  %v4907_v42 = vld [vmem:[#allocation2 + $0x80] sm:$0xff]  ;;  %v8374_v12 = vld [vmem:[#allocation94_spill] sm:$0xff]  ;;  %v8376_v47 = vld [vmem:[#allocation151_spill] sm:$0xff] }
 0x259   : > { %v1744_v16 = vpop.permute.xlu0 %1743  ;;  %v1738_v34 = vpop.permute.xlu1 %1737  ;;  %v2028_v36 = vsel %vm2020_vm8, %v1995_v15, %v6270_v30  ;;  %v1899_v9 = vsel %vm1888_vm4, %v1866_v55, %v5803_v41  ;;  %v1931_v4 = vsel %vm1921_vm5, %v1898_v13, %v5945_v58  ;;  %v2029_v25 = vsel %vm2020_vm8, %v1996_v1, %v6263_v48  ;;  %v4908_v58 = vld [vmem:[#allocation2 + $0xa8] sm:$0xff]  ;;  %v8380_v19 = vld [vmem:[#allocation27_spill] sm:$0xff]  ;;  %v8381_v14 = vld [vmem:[#allocation77_spill] sm:$0xff] }
 0x25a   : > { %v2059_v3 = vsel %vm2053_vm9, %v2026_v44, %v1738_v34  ;;  %v1834_v27 = vsel %vm279_vm0, %v4907_v42, %v8366_v11  ;;  %v1932_v30 = vsel %vm1921_vm5, %v1899_v9, %v5935_v29  ;;  %v1964_v35 = vsel %vm1954_vm6, %v1931_v4, %v6067_v37  ;;  %v8371_v37 = vld [vmem:[#allocation73_spill] sm:$0xff]  ;;  %v8377_v44 = vld [vmem:[#allocation28_spill] sm:$0xff]  ;;  %v8378_v34 = vld [vmem:[#allocation6_spill] sm:$0xff] }
 0x25b   : > { %4781 = vmatmul.mubr.msk.f32.gmra.mxu0 %vm2091_vm10, %v2059_v3  ;;  %v2062_v41 = vsel %vm2053_vm9, %v2029_v25, %v1744_v16  ;;  %v1837_v48 = vsel %vm279_vm0, %v4908_v58, %v8367_v32  ;;  %v1867_v10 = vsel %vm1855_vm3, %v1834_v27, %v8368_v21  ;;  %v1965_v23 = vsel %vm1954_vm6, %v1932_v30, %v8369_v43  ;;  %v4910_v3 = vld [vmem:[#allocation2 + $0xc0] sm:$0xff]  ;;  %v8382_v57 = vld [vmem:[#allocation54_spill] sm:$0xff]  ;;  %v8383_v18 = vld [vmem:[#allocation132_spill] sm:$0xff] }
 0x25c   : > { %4783 = vmatprep.mubr.msk.f32.mxu0 %vm2091_vm10, %v2060_v39  ;;  %v1997_v29 = vsel %vm1987_vm7, %v1964_v35, %v8370_v7  ;;  %v1868_v24 = vsel %vm1855_vm3, %v1835_v50, %v8371_v37  ;;  %v1900_v26 = vsel %vm1888_vm4, %v1867_v10, %v8372_v6  ;;  %v1998_v51 = vsel %vm1987_vm7, %v1965_v23, %v8373_v28  ;;  %v8384_v50 = vld [vmem:[#allocation74_spill] sm:$0xff]  ;;  %v8386_v49 = vld [vmem:[#allocation129_spill] sm:$0xff]  ;;  %v4911_v27 = vld [vmem:[#allocation2 + $0xb0] sm:$0xff] }
 0x25d   : > { %v1748_v59 = vpop.permute.xlu0 %1747  ;;  %v1742_v54 = vpop.permute.xlu1 %1741  ;;  %v2030_v33 = vsel %vm2020_vm8, %v1997_v29, %v6274_v8  ;;  %v1901_v45 = vsel %vm1888_vm4, %v1868_v24, %v8374_v12  ;;  %v1933_v5 = vsel %vm1921_vm5, %v1900_v26, %v8375_v62  ;;  %v2031_v52 = vsel %vm2020_vm8, %v1998_v51, %v8376_v47  ;;  %v8385_v40 = vld [vmem:[#allocation98_spill] sm:$0xff]  ;;  %v8391_v30 = vld [vmem:[#allocation32_spill] sm:$0xff]  ;;  %v8394_v43 = vld [vmem:[#allocation31_spill] sm:$0xff] }
 0x25e   : > { %v2061_v0 = vsel %vm2053_vm9, %v2028_v36, %v1742_v54  ;;  %v1836_v16 = vsel %vm279_vm0, %v4909_v63, %v8377_v44  ;;  %v1934_v8 = vsel %vm1921_vm5, %v1901_v45, %v8378_v34  ;;  %v1966_v46 = vsel %vm1954_vm6, %v1933_v5, %v8379_v53  ;;  %v8387_v13 = vld [vmem:[#allocation154_spill] sm:$0xff]  ;;  %v8388_v54 = vld [vmem:[#allocation95_spill] sm:$0xff]  ;;  %v4912_v10 = vld [vmem:[#allocation2 + $0xd8] sm:$0xff] }
 0x25f   : > { %4784 = vmatmul.mubr.msk.f32.gmra.mxu0 %vm2091_vm10, %v2061_v0  ;;  %v2064_v22 = vsel %vm2053_vm9, %v2031_v52, %v1748_v59  ;;  %v1839_v2 = vsel %vm279_vm0, %v4910_v3, %v8380_v19  ;;  %v1869_v38 = vsel %vm1855_vm3, %v1836_v16, %v8381_v14  ;;  %v1967_v39 = vsel %vm1954_vm6, %v1934_v8, %v8382_v57  ;;  %v8389_v4 = vld [vmem:[#allocation18_spill] sm:$0xff]  ;;  %v8390_v0 = vld [vmem:[#allocation152_spill] sm:$0xff]  ;;  %v8395_v7 = vld [vmem:[#allocation79_spill] sm:$0xff] }
 0x260   : > { %4786 = vmatprep.mubr.msk.f32.mxu0 %vm2091_vm10, %v2062_v41  ;;  %v1999_v31 = vsel %vm1987_vm7, %v1966_v46, %v8383_v18  ;;  %v1870_v61 = vsel %vm1855_vm3, %v1837_v48, %v8384_v50  ;;  %v1902_v15 = vsel %vm1888_vm4, %v1869_v38, %v8385_v40  ;;  %v2000_v55 = vsel %vm1987_vm7, %v1967_v39, %v8386_v49  ;;  %v8392_v41 = vld [vmem:[#allocation7_spill] sm:$0xff]  ;;  %v8393_v32 = vld [vmem:[#allocation62_spill] sm:$0xff]  ;;  %v8396_v37 = vld [vmem:[#allocation57_spill] sm:$0xff] }
 0x261   : > { %v1752_v60 = vpop.permute.xlu0 %1751  ;;  %v1746_v17 = vpop.permute.xlu1 %1745  ;;  %v2032_v1 = vsel %vm2020_vm8, %v1999_v31, %v8387_v13  ;;  %v1903_v9 = vsel %vm1888_vm4, %v1870_v61, %v8388_v54  ;;  %v1935_v25 = vsel %vm1921_vm5, %v1902_v15, %v8389_v4  ;;  %v2033_v42 = vsel %vm2020_vm8, %v2000_v55, %v8390_v0  ;;  %v8397_v6 = vld [vmem:[#allocation134_spill] sm:$0xff]  ;;  %v8398_v28 = vld [vmem:[#allocation76_spill] sm:$0xff]  ;;  %v8402_v52 = vld [vmem:[#allocation97_spill] sm:$0xff] }
 0x262   : > { %v2063_v56 = vsel %vm2053_vm9, %v2030_v33, %v1746_v17  ;;  %v1838_v35 = vsel %vm279_vm0, %v4911_v27, %v8391_v30  ;;  %v1936_v58 = vsel %vm1921_vm5, %v1903_v9, %v8392_v41  ;;  %v1968_v48 = vsel %vm1954_vm6, %v1935_v25, %v8393_v32  ;;  %v8399_v33 = vld [vmem:[#allocation100_spill] sm:$0xff]  ;;  %v8400_v17 = vld [vmem:[#allocation131_spill] sm:$0xff]  ;;  %v8403_v63 = vld [vmem:[#allocation22_spill] sm:$0xff] }
 0x263   : > { %4787 = vmatmul.mubr.msk.f32.gmra.mxu0 %vm2091_vm10, %v2063_v56  ;;  %v2066_v21 = vsel %vm2053_vm9, %v2033_v42, %v1752_v60  ;;  %v1841_v23 = vsel %vm279_vm0, %v4912_v10, %v8394_v43  ;;  %v1871_v29 = vsel %vm1855_vm3, %v1838_v35, %v8395_v7  ;;  %v1969_v24 = vsel %vm1954_vm6, %v1936_v58, %v8396_v37  ;;  %v8401_v45 = vld [vmem:[#allocation156_spill] sm:$0xff]  ;;  %v8404_v16 = vld [vmem:[#allocation153_spill] sm:$0xff]  ;;  %v4913_v53 = vld [vmem:[#allocation2 + $0xc8] sm:$0xff] }
 0x264   : > { %4789 = vmatprep.mubr.msk.f32.mxu0 %vm2091_vm10, %v2064_v22  ;;  %v2001_v26 = vsel %vm1987_vm7, %v1968_v48, %v8397_v6  ;;  %v1872_v51 = vsel %vm1855_vm3, %v1839_v2, %v8398_v28  ;;  %v1904_v60 = vsel %vm1888_vm4, %v1871_v29, %v8399_v33  ;;  %v2002_v12 = vsel %vm1987_vm7, %v1969_v24, %v8400_v17  ;;  %v8405_v46 = vld [vmem:[#allocation36_spill] sm:$0xff]  ;;  %v8406_v3 = vld [vmem:[#allocation15_spill] sm:$0xff]  ;;  %v8407_v2 = vld [vmem:[#allocation66_spill] sm:$0xff] }
 0x265   : > { %v1756_v36 = vpop.permute.xlu0 %1755  ;;  %v1750_v59 = vpop.permute.xlu1 %1749  ;;  %v2034_v62 = vsel %vm2020_vm8, %v2001_v26, %v8401_v45  ;;  %v1905_v56 = vsel %vm1888_vm4, %v1872_v51, %v8402_v52  ;;  %v1937_v44 = vsel %vm1921_vm5, %v1904_v60, %v8403_v63  ;;  %v2035_v34 = vsel %vm2020_vm8, %v2002_v12, %v8404_v16  ;;  %v4914_v57 = vld [vmem:[#allocation2 + $0xf0] sm:$0xff]  ;;  %v8409_v31 = vld [vmem:[#allocation81_spill] sm:$0xff]  ;;  %v8411_v15 = vld [vmem:[#allocation136_spill] sm:$0xff] }
 0x266   : > { %v2065_v11 = vsel %vm2053_vm9, %v2032_v1, %v1750_v59  ;;  %v1840_v22 = vsel %vm279_vm0, %v4913_v53, %v8405_v46  ;;  %v1938_v19 = vsel %vm1921_vm5, %v1905_v56, %v8406_v3  ;;  %v1970_v14 = vsel %vm1954_vm6, %v1937_v44, %v8407_v2  ;;  %v8408_v39 = vld [vmem:[#allocation35_spill] sm:$0xff]  ;;  %v8410_v61 = vld [vmem:[#allocation61_spill] sm:$0xff]  ;;  %v8412_v55 = vld [vmem:[#allocation78_spill] sm:$0xff] }
 0x267   : > { %4790 = vmatmul.mubr.msk.f32.gmra.mxu0 %vm2091_vm10, %v2065_v11  ;;  %v2068_v38 = vsel %vm2053_vm9, %v2035_v34, %v1756_v36  ;;  %v1843_v18 = vsel %vm279_vm0, %v4914_v57, %v8408_v39  ;;  %v1873_v50 = vsel %vm1855_vm3, %v1840_v22, %v8409_v31  ;;  %v1971_v40 = vsel %vm1954_vm6, %v1938_v19, %v8410_v61  ;;  %v8413_v1 = vld [vmem:[#allocation102_spill] sm:$0xff]  ;;  %v8414_v59 = vld [vmem:[#allocation133_spill] sm:$0xff]  ;;  %v8416_v42 = vld [vmem:[#allocation99_spill] sm:$0xff] }
 0x268   : > { %4792 = vmatprep.mubr.msk.f32.mxu0 %vm2091_vm10, %v2066_v21  ;;  %v2003_v49 = vsel %vm1987_vm7, %v1970_v14, %v8411_v15  ;;  %v1874_v13 = vsel %vm1855_vm3, %v1841_v23, %v8412_v55  ;;  %v1906_v36 = vsel %vm1888_vm4, %v1873_v50, %v8413_v1  ;;  %v2004_v54 = vsel %vm1987_vm7, %v1971_v40, %v8414_v59  ;;  %v8415_v9 = vld [vmem:[#allocation158_spill] sm:$0xff]  ;;  %v8418_v35 = vld [vmem:[#allocation155_spill] sm:$0xff]  ;;  %v4915_v32 = vld [vmem:[#allocation2 + $0xe0] sm:$0xff] }
 0x269   : > { %v1760_v5 = vpop.permute.xlu0 %1759  ;;  %v1754_v47 = vpop.permute.xlu1 %1753  ;;  %v2036_v4 = vsel %vm2020_vm8, %v2003_v49, %v8415_v9  ;;  %v1907_v11 = vsel %vm1888_vm4, %v1874_v13, %v8416_v42  ;;  %v8417_v27 = vld [vmem:[#allocation26_spill] sm:$0xff]  ;;  %v2037_v41 = vsel %vm2020_vm8, %v2004_v54, %v8418_v35  ;;  %v8419_v48 = vld [vmem:[#allocation40_spill] sm:$0xff]  ;;  %v8420_v10 = vld [vmem:[#allocation21_spill] sm:$0xff] }
 0x26a   : > { %v2067_v8 = vsel %vm2053_vm9, %v2034_v62, %v1754_v47  ;;  %v1939_v30 = vsel %vm1921_vm5, %v1906_v36, %v8417_v27  ;;  %v1842_v21 = vsel %vm279_vm0, %v4915_v32, %v8419_v48  ;;  %v1940_v43 = vsel %vm1921_vm5, %v1907_v11, %v8420_v10  ;;  %v8421_v23 = vld [vmem:[#allocation115_spill] sm:$0xff]  ;;  %v4916_v37 = vld [vmem:[#allocation2 + $0x108] sm:$0xff]  ;;  %v8424_v51 = vld [vmem:[#allocation65_spill] sm:$0xff] }
 0x26b   : > { %4793 = vmatmul.mubr.msk.f32.gmra.mxu0 %vm2091_vm10, %v2067_v8  ;;  %v1972_v7 = vsel %vm1954_vm6, %v1939_v30, %v8421_v23  ;;  %v2070_v29 = vsel %vm2053_vm9, %v2037_v41, %v1760_v5  ;;  %v8422_v24 = vld [vmem:[#allocation39_spill] sm:$0xff]  ;;  %v1973_v33 = vsel %vm1954_vm6, %v1940_v43, %v8424_v51  ;;  %v8425_v60 = vld [vmem:[#allocation138_spill] sm:$0xff]  ;;  %v8426_v12 = vld [vmem:[#allocation80_spill] sm:$0xff] }
 0x26c   : > { %4795 = vmatprep.mubr.msk.f32.mxu0 %vm2091_vm10, %v2068_v38  ;;  %v1845_v6 = vsel %vm279_vm0, %v4916_v37, %v8422_v24  ;;  %v8423_v26 = vld [vmem:[#allocation83_spill] sm:$0xff]  ;;  %v2005_v17 = vsel %vm1987_vm7, %v1972_v7, %v8425_v60  ;;  %v1876_v45 = vsel %vm1855_vm3, %v1843_v18, %v8426_v12  ;;  %v8427_v62 = vld [vmem:[#allocation104_spill] sm:$0xff]  ;;  %v8430_v34 = vld [vmem:[#allocation101_spill] sm:$0xff] }
 0x26d   : > { %v1764_v25 = vpop.permute.xlu0 %1763  ;;  %v1758_v0 = vpop.permute.xlu1 %1757  ;;  %v1875_v28 = vsel %vm1855_vm3, %v1842_v21, %v8423_v26  ;;  %v8428_v47 = vld [vmem:[#allocation135_spill] sm:$0xff]  ;;  %v8429_v56 = vld [vmem:[#allocation160_spill] sm:$0xff]  ;;  %v1909_v8 = vsel %vm1888_vm4, %v1876_v45, %v8430_v34  ;;  %v8431_v53 = vld [vmem:[#allocation30_spill] sm:$0xff] }
 0x26e   : > { %v2069_v58 = vsel %vm2053_vm9, %v2036_v4, %v1758_v0  ;;  %v1908_v5 = vsel %vm1888_vm4, %v1875_v28, %v8427_v62  ;;  %v2006_v52 = vsel %vm1987_vm7, %v1973_v33, %v8428_v47  ;;  %v2038_v63 = vsel %vm2020_vm8, %v2005_v17, %v8429_v56  ;;  %v8432_v22 = vld [vmem:[#allocation157_spill] sm:$0xff]  ;;  %v4917_v2 = vld [vmem:[#allocation2 + $0xf8] sm:$0xff]  ;;  %v8436_v40 = vld [vmem:[#allocation43_spill] sm:$0xff] }
 0x26f   : > { %4796 = vmatmul.mubr.msk.f32.gmra.mxu0 %vm2091_vm10, %v2069_v58  ;;  %v1941_v46 = vsel %vm1921_vm5, %v1908_v5, %v8431_v53  ;;  %v2039_v3 = vsel %vm2020_vm8, %v2006_v52, %v8432_v22  ;;  %v8433_v14 = vld [vmem:[#allocation44_spill] sm:$0xff]  ;;  %v8434_v57 = vld [vmem:[#allocation25_spill] sm:$0xff]  ;;  %v8438_v13 = vld [vmem:[#allocation114_spill] sm:$0xff] }
 0x270   : > { %4798 = vmatprep.mubr.msk.f32.mxu0 %vm2091_vm10, %v2070_v29  ;;  %v1844_v38 = vsel %vm279_vm0, %v4917_v2, %v8433_v14  ;;  %v1942_v39 = vsel %vm1921_vm5, %v1909_v8, %v8434_v57  ;;  %v8435_v18 = vld [vmem:[#allocation117_spill] sm:$0xff]  ;;  %v2072_v50 = vsel %vm2053_vm9, %v2039_v3, %v1764_v25  ;;  %v8439_v36 = vld [vmem:[#allocation140_spill] sm:$0xff]  ;;  %v8440_v54 = vld [vmem:[#allocation82_spill] sm:$0xff] }
 0x271   : > { %v1768_v44 = vpop.permute.xlu0 %1767  ;;  %v1762_v16 = vpop.permute.xlu1 %1761  ;;  %v1974_v31 = vsel %vm1954_vm6, %v1941_v46, %v8435_v18  ;;  %v4918_v61 = vld [vmem:[#allocation2 + $0x120] sm:$0xff]  ;;  %v1975_v1 = vsel %vm1954_vm6, %v1942_v39, %v8438_v13  ;;  %v1878_v9 = vsel %vm1855_vm3, %v1845_v6, %v8440_v54  ;;  %v8441_v4 = vld [vmem:[#allocation106_spill] sm:$0xff]  ;;  %v8443_v11 = vld [vmem:[#allocation59_spill] sm:$0xff] }
 0x272   : > { %v2071_v19 = vsel %vm2053_vm9, %v2038_v63, %v1762_v16  ;;  %v1847_v15 = vsel %vm279_vm0, %v4918_v61, %v8436_v40  ;;  %v8437_v49 = vld [vmem:[#allocation85_spill] sm:$0xff]  ;;  %v2007_v59 = vsel %vm1987_vm7, %v1974_v31, %v8439_v36  ;;  %v8444_v41 = vld [vmem:[#allocation103_spill] sm:$0xff]  ;;  %v8445_v32 = vld [vmem:[#allocation34_spill] sm:$0xff] }
 0x273   : > { %4799 = vmatmul.mubr.msk.f32.gmra.mxu0 %vm2091_vm10, %v2071_v19  ;;  %v1877_v55 = vsel %vm1855_vm3, %v1844_v38, %v8437_v49  ;;  %v8442_v0 = vld [vmem:[#allocation137_spill] sm:$0xff]  ;;  %v2040_v27 = vsel %vm2020_vm8, %v2007_v59, %v8443_v11  ;;  %v1911_v58 = vsel %vm1888_vm4, %v1878_v9, %v8444_v41  ;;  %v8446_v21 = vld [vmem:[#allocation159_spill] sm:$0xff]  ;;  %v8447_v7 = vld [vmem:[#allocation48_spill] sm:$0xff] }
 0x274   : > { %4801 = vmatprep.mubr.msk.f32.mxu0 %vm2091_vm10, %v2072_v50  ;;  %v1910_v25 = vsel %vm1888_vm4, %v1877_v55, %v8441_v4  ;;  %v2008_v42 = vsel %vm1987_vm7, %v1975_v1, %v8442_v0  ;;  %v4919_v23 = vld [vmem:[#allocation2 + $0x110] sm:$0xff]  ;;  %v8448_v37 = vld [vmem:[#allocation29_spill] sm:$0xff]  ;;  %v8450_v51 = vld [vmem:[#allocation84_spill] sm:$0xff] }
 0x275   : > { %v1772_v30 = vpop.permute.xlu0 %1771  ;;  %v1766_v35 = vpop.permute.xlu1 %1765  ;;  %v1943_v48 = vsel %vm1921_vm5, %v1910_v25, %v8445_v32  ;;  %v2041_v10 = vsel %vm2020_vm8, %v2008_v42, %v8446_v21  ;;  %v1846_v29 = vsel %vm279_vm0, %v4919_v23, %v8447_v7  ;;  %v1944_v24 = vsel %vm1921_vm5, %v1911_v58, %v8448_v37  ;;  %v8449_v6 = vld [vmem:[#allocation119_spill] sm:$0xff]  ;;  %v8452_v12 = vld [vmem:[#allocation116_spill] sm:$0xff]  ;;  %v8453_v62 = vld [vmem:[#allocation142_spill] sm:$0xff] }
 0x276   : > { %v2073_v43 = vsel %vm2053_vm9, %v2040_v27, %v1766_v35  ;;  %v1976_v26 = vsel %vm1954_vm6, %v1943_v48, %v8449_v6  ;;  %v2074_v28 = vsel %vm2053_vm9, %v2041_v10, %v1768_v44  ;;  %v1880_v33 = vsel %vm1855_vm3, %v1847_v15, %v8450_v51  ;;  %v8451_v60 = vld [vmem:[#allocation87_spill] sm:$0xff]  ;;  %v8454_v47 = vld [vmem:[#allocation105_spill] sm:$0xff]  ;;  %v8455_v56 = vld [vmem:[#allocation108_spill] sm:$0xff] }
 0x277   : > { %4802 = vmatmul.mubr.msk.f32.gmra.mxu0 %vm2091_vm10, %v2073_v43  ;;  %v1879_v17 = vsel %vm1855_vm3, %v1846_v29, %v8451_v60  ;;  %v1977_v45 = vsel %vm1954_vm6, %v1944_v24, %v8452_v12  ;;  %v2009_v5 = vsel %vm1987_vm7, %v1976_v26, %v8453_v62  ;;  %v1913_v52 = vsel %vm1888_vm4, %v1880_v33, %v8454_v47  ;;  %v8456_v44 = vld [vmem:[#allocation139_spill] sm:$0xff]  ;;  %v8457_v34 = vld [vmem:[#allocation161_spill] sm:$0xff]  ;;  %v8459_v19 = vld [vmem:[#allocation38_spill] sm:$0xff] }
 0x278   : > { %4804 = vmatprep.mubr.msk.f32.mxu0 %vm2091_vm10, %v2074_v28  ;;  %v1912_v63 = vsel %vm1888_vm4, %v1879_v17, %v8455_v56  ;;  %v2010_v16 = vsel %vm1987_vm7, %v1977_v45, %v8456_v44  ;;  %v2042_v8 = vsel %vm2020_vm8, %v2009_v5, %v8457_v34  ;;  %v8458_v22 = vld [vmem:[#allocation33_spill] sm:$0xff]  ;;  %v8460_v14 = vld [vmem:[#allocation3_spill] sm:$0xff]  ;;  %v8461_v39 = vld [vmem:[#allocation118_spill] sm:$0xff] }
 0x279   : > { %v1648_v53 = vpop.permute.xlu0 %1647  ;;  %v1770_v46 = vpop.permute.xlu1 %1769  ;;  %v1946_v3 = vsel %vm1921_vm5, %v1913_v52, %v8458_v22  ;;  %v1945_v2 = vsel %vm1921_vm5, %v1912_v63, %v8459_v19  ;;  %v2043_v38 = vsel %vm2020_vm8, %v2010_v16, %v8460_v14  ;;  %v8462_v31 = vld [vmem:[#allocation121_spill] sm:$0xff]  ;;  %v8464_v49 = vld [vmem:[#allocation144_spill] sm:$0xff]  ;;  %v8465_v25 = vld [vmem:[#allocation47_spill] sm:$0xff] }
 0x27a   : > { %v2075_v57 = vsel %vm2053_vm9, %v2042_v8, %v1770_v46  ;;  %v1979_v18 = vsel %vm1954_vm6, %v1946_v3, %v8461_v39  ;;  %v1978_v50 = vsel %vm1954_vm6, %v1945_v2, %v8462_v31  ;;  %v2076_v61 = vsel %vm2053_vm9, %v2043_v38, %v1772_v30  ;;  %v8463_v40 = vld [vmem:[#allocation141_spill] sm:$0xff]  ;;  %v4920_v4 = vld [vmem:[#allocation2 + $0x138] sm:$0xff]  ;;  %v4921_v42 = vld [vmem:[#allocation2 + $0x128] sm:$0xff] }
 0x27b   : > { %4805 = vmatmul.mubr.msk.f32.gmra.mxu0 %vm2091_vm10, %v2075_v57  ;;  %v2012_v15 = vsel %vm1987_vm7, %v1979_v18, %v8463_v40  ;;  %v2011_v55 = vsel %vm1987_vm7, %v1978_v50, %v8464_v49  ;;  %v1849_v0 = vsel %vm279_vm0, %v4920_v4, %v8465_v25  ;;  %v8466_v11 = vld [vmem:[#allocation52_spill] sm:$0xff]  ;;  %v8467_v30 = vld [vmem:[#allocation86_spill] sm:$0xff]  ;;  %v8468_v35 = vld [vmem:[#allocation89_spill] sm:$0xff] }
 0x27c   : > { %4807 = vmatprep.mubr.msk.f32.mxu0 %vm2091_vm10, %v2076_v61  ;;  %v2044_v13 = vsel %vm2020_vm8, %v2011_v55, %v6323_v20  ;;  %v2045_v1 = vsel %vm2020_vm8, %v2012_v15, %v1648_v53  ;;  %v1848_v27 = vsel %vm279_vm0, %v4921_v42, %v8466_v11  ;;  %v1882_v20 = vsel %vm1855_vm3, %v1849_v0, %v8467_v30  ;;  %v8469_v58 = vld [vmem:[#allocation107_spill] sm:$0xff]  ;;  %v8470_v48 = vld [vmem:[#allocation110_spill] sm:$0xff]  ;;  %v8471_v23 = vld [vmem:[#allocation37_spill] sm:$0xff] }
 0x27d   : > { %v1776_v36 = vpop.permute.xlu0 %1775  ;;  %v1774_v59 = vpop.permute.xlu1 %1773  ;;  %v1881_v41 = vsel %vm1855_vm3, %v1848_v27, %v8468_v35  ;;  %v1915_v32 = vsel %vm1888_vm4, %v1882_v20, %v8469_v58  ;;  %v8472_v29 = vld [vmem:[#allocation42_spill] sm:$0xff]  ;;  %v8473_v24 = vld [vmem:[#allocation120_spill] sm:$0xff]  ;;  %v8474_v26 = vld [vmem:[#allocation123_spill] sm:$0xff] }
 0x27e   : > { %v2078_v54 = vsel %vm2053_vm9, %v2045_v1, %v1776_v36  ;;  %v2077_v9 = vsel %vm2053_vm9, %v2044_v13, %v1774_v59  ;;  %v1914_v21 = vsel %vm1888_vm4, %v1881_v41, %v8470_v48  ;;  %v1948_v7 = vsel %vm1921_vm5, %v1915_v32, %v8471_v23  ;;  %v8475_v51 = vld [vmem:[#allocation143_spill] sm:$0xff]  ;;  %v8476_v60 = vld [vmem:[#allocation146_spill] sm:$0xff]  ;;  %v4923_v16 = vld [vmem:[#allocation2 + $0x140] sm:$0xff] }
 0x27f   : > { %4808 = vmatmul.mubr.msk.f32.gmra.mxu0 %vm2091_vm10, %v2077_v9  ;;  %v1947_v37 = vsel %vm1921_vm5, %v1914_v21, %v8472_v29  ;;  %v1981_v6 = vsel %vm1954_vm6, %v1948_v7, %v8473_v24  ;;  %v4922_v56 = vld [vmem:[#allocation2 + $0x150] sm:$0xff]  ;;  %v8478_v34 = vld [vmem:[#allocation56_spill] sm:$0xff]  ;;  %v8481_v19 = vld [vmem:[#allocation109_spill] sm:$0xff] }
 0x280   : > { %4810 = vmatprep.mubr.msk.f32.mxu0 %vm2091_vm10, %v2078_v54  ;;  %v1980_v28 = vsel %vm1954_vm6, %v1947_v37, %v8474_v26  ;;  %v2014_v33 = vsel %vm1987_vm7, %v1981_v6, %v8475_v51  ;;  %v8477_v63 = vld [vmem:[#allocation51_spill] sm:$0xff]  ;;  %v1850_v8 = vsel %vm279_vm0, %v4923_v16, %v8478_v34  ;;  %v8479_v53 = vld [vmem:[#allocation88_spill] sm:$0xff]  ;;  %v8483_v18 = vld [vmem:[#allocation41_spill] sm:$0xff] }
 0x281   : > { %v1652_v10 = vpop.permute.xlu0 %1651  ;;  %v1650_v43 = vpop.permute.xlu1 %1649  ;;  %v2013_v17 = vsel %vm1987_vm7, %v1980_v28, %v8476_v60  ;;  %v1851_v44 = vsel %vm279_vm0, %v4922_v56, %v8477_v63  ;;  %v8480_v22 = vld [vmem:[#allocation91_spill] sm:$0xff]  ;;  %v8482_v14 = vld [vmem:[#allocation112_spill] sm:$0xff]  ;;  %v8484_v50 = vld [vmem:[#allocation46_spill] sm:$0xff] }
 0x282   : > { %v2047_v12 = vsel %vm2020_vm8, %v2014_v33, %v1652_v10  ;;  %v2046_v45 = vsel %vm2020_vm8, %v2013_v17, %v1650_v43  ;;  %v1884_v46 = vsel %vm1855_vm3, %v1851_v44, %v8479_v53  ;;  %v1883_v3 = vsel %vm1855_vm3, %v1850_v8, %v8480_v22  ;;  %v8485_v40 = vld [vmem:[#allocation122_spill] sm:$0xff]  ;;  %v8486_v49 = vld [vmem:[#allocation125_spill] sm:$0xff]  ;;  %v8488_v36 = vld [vmem:[#allocation148_spill] sm:$0xff] }
 0x283   : > { %v1917_v2 = vsel %vm1888_vm4, %v1884_v46, %v8481_v19  ;;  %v1916_v38 = vsel %vm1888_vm4, %v1883_v3, %v8482_v14  ;;  %v8487_v13 = vld [vmem:[#allocation145_spill] sm:$0xff]  ;;  %v4924_v11 = vld [vmem:[#allocation2 + $0x168] sm:$0xff]  ;;  %v8489_v27 = vld [vmem:[#allocation55_spill] sm:$0xff] }
 0x284   : > { %v1950_v31 = vsel %vm1921_vm5, %v1917_v2, %v8483_v18  ;;  %v1949_v61 = vsel %vm1921_vm5, %v1916_v38, %v8484_v50  ;;  %v1853_v30 = vsel %vm279_vm0, %v4924_v11, %v8489_v27  ;;  %v4925_v20 = vld [vmem:[#allocation2 + $0x158] sm:$0xff]  ;;  %v8491_v58 = vld [vmem:[#allocation90_spill] sm:$0xff]  ;;  %v8493_v10 = vld [vmem:[#allocation111_spill] sm:$0xff] }
 0x285   : > { %v1780_v62 = vpop.permute.xlu0 %1779  ;;  %v1778_v5 = vpop.permute.xlu1 %1777  ;;  %v1983_v15 = vsel %vm1954_vm6, %v1950_v31, %v8485_v40  ;;  %v1982_v55 = vsel %vm1954_vm6, %v1949_v61, %v8486_v49  ;;  %v8490_v35 = vld [vmem:[#allocation60_spill] sm:$0xff]  ;;  %v1886_v32 = vsel %vm1855_vm3, %v1853_v30, %v8491_v58  ;;  %v8494_v23 = vld [vmem:[#allocation113_spill] sm:$0xff]  ;;  %v8498_v60 = vld [vmem:[#allocation126_spill] sm:$0xff] }
 0x286   : > { %v2080_v47 = vsel %vm2053_vm9, %v2047_v12, %v1780_v62  ;;  %v2079_v52 = vsel %vm2053_vm9, %v2046_v45, %v1778_v5  ;;  %v2016_v1 = vsel %vm1987_vm7, %v1983_v15, %v8487_v13  ;;  %v2015_v59 = vsel %vm1987_vm7, %v1982_v55, %v8488_v36  ;;  %v8492_v48 = vld [vmem:[#allocation92_spill] sm:$0xff]  ;;  %v8495_v24 = vld [vmem:[#allocation45_spill] sm:$0xff]  ;;  %v8499_v12 = vld [vmem:[#allocation147_spill] sm:$0xff] }
 0x287   : > { %4811 = vmatmul.mubr.msk.f32.gmra.mxu0 %vm2091_vm10, %v2079_v52  ;;  %v1852_v41 = vsel %vm279_vm0, %v4925_v20, %v8490_v35  ;;  %v1919_v43 = vsel %vm1888_vm4, %v1886_v32, %v8493_v10  ;;  %v8496_v26 = vld [vmem:[#allocation49_spill] sm:$0xff]  ;;  %v8497_v51 = vld [vmem:[#allocation124_spill] sm:$0xff]  ;;  %v4926_v34 = vld [vmem:[#allocation2 + $0x170] sm:$0xff] }
 0x288   : > { %4813 = vmatprep.mubr.msk.f32.mxu0 %vm2091_vm10, %v2080_v47  ;;  %v1885_v21 = vsel %vm1855_vm3, %v1852_v41, %v8492_v48  ;;  %v1952_v6 = vsel %vm1921_vm5, %v1919_v43, %v8495_v24  ;;  %v8500_v62 = vld [vmem:[#allocation149_spill] sm:$0xff]  ;;  %v8501_v8 = vld [vmem:[#allocation64_spill] sm:$0xff]  ;;  %v8504_v14 = vld [vmem:[#allocation50_spill] sm:$0xff] }
 0x289   : > { %v1656_v57 = vpop.permute.xlu0 %1655  ;;  %v1654_v39 = vpop.permute.xlu1 %1653  ;;  %v1918_v7 = vsel %vm1888_vm4, %v1885_v21, %v8494_v23  ;;  %v1985_v33 = vsel %vm1954_vm6, %v1952_v6, %v8497_v51  ;;  %v1854_v53 = vsel %vm279_vm0, %v4926_v34, %v8501_v8  ;;  %v8502_v46 = vld [vmem:[#allocation93_spill] sm:$0xff]  ;;  %v8506_v18 = vld [vmem:[#allocation150_spill] sm:$0xff] }
 0x28a   : > { %v2049_v54 = vsel %vm2020_vm8, %v2016_v1, %v1656_v57  ;;  %v2048_v9 = vsel %vm2020_vm8, %v2015_v59, %v1654_v39  ;;  %v1951_v28 = vsel %vm1921_vm5, %v1918_v7, %v8496_v26  ;;  %v2018_v45 = vsel %vm1987_vm7, %v1985_v33, %v8499_v12  ;;  %v8503_v3 = vld [vmem:[#allocation5_spill] sm:$0xff]  ;;  %v8505_v57 = vld [vmem:[#allocation127_spill] sm:$0xff] }
 0x28b   : > { %v1984_v17 = vsel %vm1954_vm6, %v1951_v28, %v8498_v60  ;;  %v1887_v22 = vsel %vm1855_vm3, %v1854_v53, %v8502_v46  ;;  %v2592_v40 = vld [vmem:[#allocation2 + $0x9] sm:$0xff]  ;;  %v2591_v49 = vld [vmem:[#allocation2 + $0x1] sm:$0xff]  ;;  %v6808_v55 = vld [vmem:[%s8087_s4] ss:$0 sm:$0xff] }
 0x28c   : > { %v2017_v5 = vsel %vm1987_vm7, %v1984_v17, %v8500_v62  ;;  %v1920_v19 = vsel %vm1888_vm4, %v1887_v22, %v8503_v3  ;;  %2881 = vrot.lane.b32.xlu1 %v2592_v40, %s4953_s12  ;;  %2879 = vrot.lane.b32.xlu0 %v2591_v49, %s4953_s12  ;;  %v6813_v1 = vld [vmem:[%s8088_s5] ss:$0 sm:$0xff] }
 0x28d   : > { %v1784_v4 = vpop.permute.xlu0 %1783  ;;  %v1782_v25 = vpop.permute.xlu1 %1781  ;;  %v1953_v38 = vsel %vm1921_vm5, %v1920_v19, %v8504_v14 }
 0x28e   : > { %v2082_v0 = vsel %vm2053_vm9, %v2049_v54, %v1784_v4  ;;  %v2081_v42 = vsel %vm2053_vm9, %v2048_v9, %v1782_v25  ;;  %v1986_v39 = vsel %vm1954_vm6, %v1953_v38, %v8505_v57 }
 0x28f   : > { %4814 = vmatmul.mubr.msk.f32.gmra.mxu0 %vm2091_vm10, %v2081_v42  ;;  %v2019_v31 = vsel %vm1987_vm7, %v1986_v39, %v8506_v18 }
 0x290   : > { %4816 = vmatprep.mubr.msk.f32.mxu0 %vm2091_vm10, %v2082_v0 }
 0x291   : > { %v1660_v29 = vpop.permute.xlu0 %1659  ;;  %v1658_v37 = vpop.permute.xlu1 %1657 }
 0x292   : > { %v2051_v47 = vsel %vm2020_vm8, %v2018_v45, %v1660_v29  ;;  %v2050_v52 = vsel %vm2020_vm8, %v2017_v5, %v1658_v37 }
 0x295   : > { %v1788_v56 = vpop.permute.xlu0 %1787  ;;  %v1786_v63 = vpop.permute.xlu1 %1785 }
 0x296   : > { %v2084_v44 = vsel %vm2053_vm9, %v2051_v47, %v1788_v56  ;;  %v2083_v16 = vsel %vm2053_vm9, %v2050_v52, %v1786_v63 }
 0x297   : > { %4817 = vmatmul.mubr.msk.f32.gmra.mxu0 %vm2091_vm10, %v2083_v16 }
 0x298   : > { %4819 = vmatprep.mubr.msk.f32.mxu0 %vm2091_vm10, %v2084_v44 }
 0x299   : > { %v1662_v2 = vpop.permute.xlu1 %1661 }
 0x29a   : > { %v2052_v50 = vsel %vm2020_vm8, %v2019_v31, %v1662_v2 }
 0x29d   : > { %v1790_v61 = vpop.permute.xlu1 %1789 }
 0x29e   : > { %v2085_v15 = vsel %vm2053_vm9, %v2052_v50, %v1790_v61 }
 0x29f   : > { %4820 = vmatmul.mubr.msk.f32.gmra.mxu0 %vm2091_vm10, %v2085_v15 }
 0x313   : > { %v4776_v13 = vpop.f32.mrf.mxu0 }
 0x314   : > { %v2425_v36 = vmul.f32 %v4776_v13, %v6808_v55 }
 0x315   : > { %v2258_v59 = vpop.f32.mrf.mxu0 }
 0x316   : > { %v2464_v54 = vadd.f32 %v6813_v1, %v2425_v36  ;;  %v2424_v9 = vmul.f32 %v6808_v55, %v2258_v59 }
 0x317   : > { %v4779_v4 = vpop.f32.mrf.mxu0 }
 0x318   : > { %v2496_v25 = vmax.f32 %v2464_v54, 0.0  ;;  %v2463_v0 = vadd.f32 %v6813_v1, %v2424_v9  ;;  %v2427_v42 = vmul.f32 %v4779_v4, %v6808_v55 }
 0x319   : > { %v2268_v11 = vpop.f32.mrf.mxu0 }
 0x31a   : > { %2528 = vst.msk [vmem:[#allocation2 + $0x21] sm:$0xff] %vm279_vm0, %v2496_v25  ;;  %v2495_v27 = vmax.f32 %v2463_v0, 0.0  ;;  %v2466_v30 = vadd.f32 %v6813_v1, %v2427_v42  ;;  %v2426_v20 = vmul.f32 %v6808_v55, %v2268_v11 }
 0x31b   : > { %v4782_v35 = vpop.f32.mrf.mxu0 }
 0x31c   : > { %2527 = vst.msk [vmem:[#allocation2 + $0x19] sm:$0xff] %vm279_vm0, %v2495_v27  ;;  %v2498_v41 = vmax.f32 %v2466_v30, 0.0  ;;  %v2465_v58 = vadd.f32 %v6813_v1, %v2426_v20  ;;  %v2429_v32 = vmul.f32 %v4782_v35, %v6808_v55 }
 0x31d   : > { %v2278_v48 = vpop.f32.mrf.mxu0 }
 0x31e   : > { %2530 = vst.msk [vmem:[#allocation2 + $0x39] sm:$0xff] %vm279_vm0, %v2498_v41  ;;  %v2497_v21 = vmax.f32 %v2465_v58, 0.0  ;;  %v2468_v10 = vadd.f32 %v6813_v1, %v2429_v32  ;;  %v2428_v43 = vmul.f32 %v6808_v55, %v2278_v48 }
 0x31f   : > { %v4785_v23 = vpop.f32.mrf.mxu0 }
 0x320   : > { %2529 = vst.msk [vmem:[#allocation2 + $0x31] sm:$0xff] %vm279_vm0, %v2497_v21  ;;  %v2500_v7 = vmax.f32 %v2468_v10, 0.0  ;;  %v2467_v29 = vadd.f32 %v6813_v1, %v2428_v43  ;;  %v2431_v37 = vmul.f32 %v4785_v23, %v6808_v55 }
 0x321   : > { %v2288_v24 = vpop.f32.mrf.mxu0  ;;  %v6832_v6 = vld [vmem:[#allocation2 + $0x21] sm:$0xff] }
 0x322   : > { %2532 = vst.msk [vmem:[#allocation2 + $0x51] sm:$0xff] %vm279_vm0, %v2500_v7  ;;  %v2499_v26 = vmax.f32 %v2467_v29, 0.0  ;;  %v2470_v28 = vadd.f32 %v6813_v1, %v2431_v37  ;;  %v2430_v51 = vmul.f32 %v6808_v55, %v2288_v24  ;;  %2885 = vrot.lane.b32.xlu1 %v6832_v6, %s4953_s12 }
 0x323   : > { %v4788_v33 = vpop.f32.mrf.mxu0  ;;  %v6839_v60 = vld [vmem:[#allocation2 + $0x19] sm:$0xff] }
 0x324   : > { %2531 = vst.msk [vmem:[#allocation2 + $0x49] sm:$0xff] %vm279_vm0, %v2499_v26  ;;  %v2502_v17 = vmax.f32 %v2470_v28, 0.0  ;;  %v2469_v12 = vadd.f32 %v6813_v1, %v2430_v51  ;;  %v2433_v45 = vmul.f32 %v4788_v33, %v6808_v55  ;;  %2883 = vrot.lane.b32.xlu0 %v6839_v60, %s4953_s12 }
 0x325   : > { %v2298_v62 = vpop.f32.mrf.mxu0  ;;  %v6846_v5 = vld [vmem:[#allocation2 + $0x39] sm:$0xff] }
 0x326   : > { %2534 = vst.msk [vmem:[#allocation2 + $0x69] sm:$0xff] %vm279_vm0, %v2502_v17  ;;  %v2501_v47 = vmax.f32 %v2469_v12, 0.0  ;;  %v2472_v52 = vadd.f32 %v6813_v1, %v2433_v45  ;;  %v2432_v56 = vmul.f32 %v6808_v55, %v2298_v62  ;;  %2889 = vrot.lane.b32.xlu1 %v6846_v5, %s4953_s12 }
 0x327   : > { %v4791_v63 = vpop.f32.mrf.mxu0  ;;  %v6853_v44 = vld [vmem:[#allocation2 + $0x31] sm:$0xff] }
 0x328   : > { %2533 = vst.msk [vmem:[#allocation2 + $0x61] sm:$0xff] %vm279_vm0, %v2501_v47  ;;  %v2504_v16 = vmax.f32 %v2472_v52, 0.0  ;;  %v2471_v34 = vadd.f32 %v6813_v1, %v2432_v56  ;;  %v2435_v8 = vmul.f32 %v4791_v63, %v6808_v55  ;;  %2887 = vrot.lane.b32.xlu0 %v6853_v44, %s4953_s12 }
 0x329   : > { %v2308_v53 = vpop.f32.mrf.mxu0  ;;  %v6860_v46 = vld [vmem:[#allocation2 + $0x51] sm:$0xff] }
 0x32a   : > { %2536 = vst.msk [vmem:[#allocation2 + $0x81] sm:$0xff] %vm279_vm0, %v2504_v16  ;;  %v2503_v22 = vmax.f32 %v2471_v34, 0.0  ;;  %v2474_v3 = vadd.f32 %v6813_v1, %v2435_v8  ;;  %v2434_v19 = vmul.f32 %v6808_v55, %v2308_v53  ;;  %2893 = vrot.lane.b32.xlu1 %v6860_v46, %s4953_s12 }
 0x32b   : > { %v4794_v2 = vpop.f32.mrf.mxu0  ;;  %v6867_v14 = vld [vmem:[#allocation2 + $0x49] sm:$0xff] }
 0x32c   : > { %2535 = vst.msk [vmem:[#allocation2 + $0x79] sm:$0xff] %vm279_vm0, %v2503_v22  ;;  %v2506_v38 = vmax.f32 %v2474_v3, 0.0  ;;  %v2473_v57 = vadd.f32 %v6813_v1, %v2434_v19  ;;  %v2437_v39 = vmul.f32 %v4794_v2, %v6808_v55  ;;  %2891 = vrot.lane.b32.xlu0 %v6867_v14, %s4953_s12 }
 0x32d   : > { %v2318_v18 = vpop.f32.mrf.mxu0  ;;  %v6874_v31 = vld [vmem:[#allocation2 + $0x69] sm:$0xff] }
 0x32e   : > { %2538 = vst.msk [vmem:[#allocation2 + $0x99] sm:$0xff] %vm279_vm0, %v2506_v38  ;;  %v2505_v50 = vmax.f32 %v2473_v57, 0.0  ;;  %v2476_v61 = vadd.f32 %v6813_v1, %v2437_v39  ;;  %v2436_v40 = vmul.f32 %v6808_v55, %v2318_v18  ;;  %2897 = vrot.lane.b32.xlu1 %v6874_v31, %s4953_s12 }
 0x32f   : > { %v4797_v15 = vpop.f32.mrf.mxu0  ;;  %v6881_v49 = vld [vmem:[#allocation2 + $0x61] sm:$0xff] }
 0x330   : > { %2537 = vst.msk [vmem:[#allocation2 + $0x91] sm:$0xff] %vm279_vm0, %v2505_v50  ;;  %v2508_v13 = vmax.f32 %v2476_v61, 0.0  ;;  %v2475_v36 = vadd.f32 %v6813_v1, %v2436_v40  ;;  %v2439_v59 = vmul.f32 %v4797_v15, %v6808_v55  ;;  %2895 = vrot.lane.b32.xlu0 %v6881_v49, %s4953_s12 }
 0x331   : > { %v2328_v54 = vpop.f32.mrf.mxu0  ;;  %v2602_v9 = vld [vmem:[#allocation2 + $0x81] sm:$0xff] }
 0x332   : > { %2540 = vst.msk [vmem:[#allocation2 + $0xb1] sm:$0xff] %vm279_vm0, %v2508_v13  ;;  %v2507_v4 = vmax.f32 %v2475_v36, 0.0  ;;  %v2478_v25 = vadd.f32 %v6813_v1, %v2439_v59  ;;  %v2438_v0 = vmul.f32 %v6808_v55, %v2328_v54  ;;  %2901 = vrot.lane.b32.xlu1 %v2602_v9, %s4953_s12 }
 0x333   : > { %v4800_v42 = vpop.f32.mrf.mxu0  ;;  %v6892_v11 = vld [vmem:[#allocation2 + $0x79] sm:$0xff] }
 0x334   : > { %2539 = vst.msk [vmem:[#allocation2 + $0xa9] sm:$0xff] %vm279_vm0, %v2507_v4  ;;  %v2510_v27 = vmax.f32 %v2478_v25, 0.0  ;;  %v2477_v30 = vadd.f32 %v6813_v1, %v2438_v0  ;;  %v2441_v20 = vmul.f32 %v4800_v42, %v6808_v55  ;;  %2899 = vrot.lane.b32.xlu0 %v6892_v11, %s4953_s12 }
 0x335   : > { %v2338_v35 = vpop.f32.mrf.mxu0  ;;  %v2604_v41 = vld [vmem:[#allocation2 + $0x99] sm:$0xff] }
 0x336   : > { %2542 = vst.msk [vmem:[#allocation2 + $0xc9] sm:$0xff] %vm279_vm0, %v2510_v27  ;;  %v2509_v58 = vmax.f32 %v2477_v30, 0.0  ;;  %v2480_v32 = vadd.f32 %v6813_v1, %v2441_v20  ;;  %v2440_v48 = vmul.f32 %v6808_v55, %v2338_v35  ;;  %2905 = vrot.lane.b32.xlu1 %v2604_v41, %s4953_s12 }
 0x337   : > { %v4803_v21 = vpop.f32.mrf.mxu0  ;;  %v2603_v10 = vld [vmem:[#allocation2 + $0x91] sm:$0xff] }
 0x338   : > { %2541 = vst.msk [vmem:[#allocation2 + $0xc1] sm:$0xff] %vm279_vm0, %v2509_v58  ;;  %v2512_v43 = vmax.f32 %v2480_v32, 0.0  ;;  %v2479_v23 = vadd.f32 %v6813_v1, %v2440_v48  ;;  %v2443_v7 = vmul.f32 %v4803_v21, %v6808_v55  ;;  %2903 = vrot.lane.b32.xlu0 %v2603_v10, %s4953_s12 }
 0x339   : > { %v2348_v29 = vpop.f32.mrf.mxu0  ;;  %v2606_v37 = vld [vmem:[#allocation2 + $0xb1] sm:$0xff] }
 0x33a   : > { %2544 = vst.msk [vmem:[#allocation2 + $0xe1] sm:$0xff] %vm279_vm0, %v2512_v43  ;;  %v2511_v24 = vmax.f32 %v2479_v23, 0.0  ;;  %v2482_v26 = vadd.f32 %v6813_v1, %v2443_v7  ;;  %v2442_v28 = vmul.f32 %v6808_v55, %v2348_v29  ;;  %2909 = vrot.lane.b32.xlu1 %v2606_v37, %s4953_s12 }
 0x33b   : > { %v4806_v51 = vpop.f32.mrf.mxu0  ;;  %v2605_v33 = vld [vmem:[#allocation2 + $0xa9] sm:$0xff] }
 0x33c   : > { %2543 = vst.msk [vmem:[#allocation2 + $0xd9] sm:$0xff] %vm279_vm0, %v2511_v24  ;;  %v2514_v17 = vmax.f32 %v2482_v26, 0.0  ;;  %v2481_v12 = vadd.f32 %v6813_v1, %v2442_v28  ;;  %v2445_v45 = vmul.f32 %v4806_v51, %v6808_v55  ;;  %2907 = vrot.lane.b32.xlu0 %v2605_v33, %s4953_s12 }
 0x33d   : > { %v2358_v62 = vpop.f32.mrf.mxu0  ;;  %v2608_v47 = vld [vmem:[#allocation2 + $0xc9] sm:$0xff] }
 0x33e   : > { %2546 = vst.msk [vmem:[#allocation2 + $0xf9] sm:$0xff] %vm279_vm0, %v2514_v17  ;;  %v2513_v52 = vmax.f32 %v2481_v12, 0.0  ;;  %v2484_v56 = vadd.f32 %v6813_v1, %v2445_v45  ;;  %v2444_v63 = vmul.f32 %v6808_v55, %v2358_v62  ;;  %2913 = vrot.lane.b32.xlu1 %v2608_v47, %s4953_s12 }
 0x33f   : > { %v4809_v16 = vpop.f32.mrf.mxu0  ;;  %v2607_v34 = vld [vmem:[#allocation2 + $0xc1] sm:$0xff] }
 0x340   : > { %2545 = vst.msk [vmem:[#allocation2 + $0xf1] sm:$0xff] %vm279_vm0, %v2513_v52  ;;  %v2516_v8 = vmax.f32 %v2484_v56, 0.0  ;;  %v2483_v53 = vadd.f32 %v6813_v1, %v2444_v63  ;;  %v2447_v22 = vmul.f32 %v4809_v16, %v6808_v55  ;;  %2911 = vrot.lane.b32.xlu0 %v2607_v34, %s4953_s12 }
 0x341   : > { %v2368_v3 = vpop.f32.mrf.mxu0  ;;  %v2610_v19 = vld [vmem:[#allocation2 + $0xe1] sm:$0xff] }
 0x342   : > { %2548 = vst.msk [vmem:[#allocation2 + $0x111] sm:$0xff] %vm279_vm0, %v2516_v8  ;;  %v2515_v2 = vmax.f32 %v2483_v53, 0.0  ;;  %v2486_v38 = vadd.f32 %v6813_v1, %v2447_v22  ;;  %v2446_v57 = vmul.f32 %v6808_v55, %v2368_v3  ;;  %2917 = vrot.lane.b32.xlu1 %v2610_v19, %s4953_s12  ;;  %v2624_v3 = vld [vmem:[#allocation2 + $0xa] sm:$0xff]  ;;  %v2623_v19 = vld [vmem:[#allocation2 + $0x2] sm:$0xff] }
 0x343   : > { %v2609_v39 = vld [vmem:[#allocation2 + $0xd9] sm:$0xff] }
 0x344   : > { %2547 = vst.msk [vmem:[#allocation2 + $0x109] sm:$0xff] %vm279_vm0, %v2515_v2  ;;  %v2518_v18 = vmax.f32 %v2486_v38, 0.0  ;;  %v2485_v50 = vadd.f32 %v6813_v1, %v2446_v57  ;;  %2915 = vrot.lane.b32.xlu0 %v2609_v39, %s4953_s12  ;;  %v6978_v2 = vld [vmem:[#allocation2 + $0x3a] sm:$0xff]  ;;  %v6982_v38 = vld [vmem:[#allocation2 + $0x32] sm:$0xff]  ;;  %v6990_v39 = vld [vmem:[#allocation2 + $0x4a] sm:$0xff] }
 0x345   : > { %v2612_v61 = vld [vmem:[#allocation2 + $0xf9] sm:$0xff] }
 0x346   : > { %2550 = vst.msk [vmem:[#allocation2 + $0x129] sm:$0xff] %vm279_vm0, %v2518_v18  ;;  %v2517_v40 = vmax.f32 %v2485_v50, 0.0  ;;  %2921 = vrot.lane.b32.xlu1 %v2612_v61, %s4953_s12  ;;  %v6986_v57 = vld [vmem:[#allocation2 + $0x52] sm:$0xff]  ;;  %v6994_v18 = vld [vmem:[#allocation2 + $0x6a] sm:$0xff]  ;;  %v6998_v50 = vld [vmem:[#allocation2 + $0x62] sm:$0xff] }
 0x347   : > { %v4812_v15 = vpop.f32.mrf.mxu0  ;;  %v2611_v13 = vld [vmem:[#allocation2 + $0xf1] sm:$0xff]  ;;  %v7002_v61 = vld [vmem:[#allocation2 + $0x82] sm:$0xff] }
 0x348   : > { %2549 = vst.msk [vmem:[#allocation2 + $0x121] sm:$0xff] %vm279_vm0, %v2517_v40  ;;  %v2449_v36 = vmul.f32 %v4812_v15, %v6808_v55  ;;  %2919 = vrot.lane.b32.xlu0 %v2611_v13, %s4953_s12  ;;  %v7006_v40 = vld [vmem:[#allocation2 + $0x7a] sm:$0xff]  ;;  %v7014_v13 = vld [vmem:[#allocation2 + $0x92] sm:$0xff] }
 0x349   : > { %v2378_v59 = vpop.f32.mrf.mxu0  ;;  %v2614_v54 = vld [vmem:[#allocation2 + $0x111] sm:$0xff]  ;;  %v7010_v15 = vld [vmem:[#allocation2 + $0x9a] sm:$0xff] }
 0x34a   : > { %v2488_v9 = vadd.f32 %v6813_v1, %v2449_v36  ;;  %v2448_v4 = vmul.f32 %v6808_v55, %v2378_v59  ;;  %2925 = vrot.lane.b32.xlu1 %v2614_v54, %s4953_s12  ;;  %v7018_v36 = vld [vmem:[#allocation2 + $0xb2] sm:$0xff]  ;;  %v7022_v59 = vld [vmem:[#allocation2 + $0xaa] sm:$0xff] }
 0x34b   : > { %v2613_v25 = vld [vmem:[#allocation2 + $0x109] sm:$0xff] }
 0x34c   : > { %v2520_v0 = vmax.f32 %v2488_v9, 0.0  ;;  %v2487_v42 = vadd.f32 %v6813_v1, %v2448_v4  ;;  %2923 = vrot.lane.b32.xlu0 %v2613_v25, %s4953_s12  ;;  %v7026_v54 = vld [vmem:[#allocation2 + $0xca] sm:$0xff]  ;;  %v7030_v9 = vld [vmem:[#allocation2 + $0xc2] sm:$0xff]  ;;  %v7035_v25 = vpop.permute.xlu1 %2881 }
 0x34d   : > { %v2616_v27 = vld [vmem:[#allocation2 + $0x129] sm:$0xff] }
 0x34e   : > { %2552 = vst.msk [vmem:[#allocation2 + $0x141] sm:$0xff] %vm279_vm0, %v2520_v0  ;;  %v2519_v30 = vmax.f32 %v2487_v42, 0.0  ;;  %2929 = vrot.lane.b32.xlu1 %v2616_v27, %s4953_s12  ;;  %v2642_v4 = vld [vmem:[#allocation2 + $0xe2] sm:$0xff]  ;;  %v2641_v0 = vld [vmem:[#allocation2 + $0xda] sm:$0xff]  ;;  %v7038_v42 = vpop.permute.xlu0 %2879 }
 0x34f   : > { %v4815_v20 = vpop.f32.mrf.mxu0  ;;  %v2615_v35 = vld [vmem:[#allocation2 + $0x121] sm:$0xff] }
 0x350   : > { %2551 = vst.msk [vmem:[#allocation2 + $0x139] sm:$0xff] %vm279_vm0, %v2519_v30  ;;  %v2451_v41 = vmul.f32 %v4815_v20, %v6808_v55  ;;  %2927 = vrot.lane.b32.xlu0 %v2615_v35, %s4953_s12  ;;  %v2644_v27 = vld [vmem:[#allocation2 + $0xfa] sm:$0xff]  ;;  %v2643_v30 = vld [vmem:[#allocation2 + $0xf2] sm:$0xff] }
 0x351   : > { %v2388_v58 = vpop.f32.mrf.mxu0  ;;  %v2646_v35 = vld [vmem:[#allocation2 + $0x112] sm:$0xff] }
 0x352   : > { %v2490_v32 = vadd.f32 %v6813_v1, %v2451_v41  ;;  %v2450_v48 = vmul.f32 %v6808_v55, %v2388_v58  ;;  %v2645_v58 = vld [vmem:[#allocation2 + $0x10a] sm:$0xff] }
 0x354   : > { %v2522_v21 = vmax.f32 %v2490_v32, 0.0  ;;  %v2489_v10 = vadd.f32 %v6813_v1, %v2450_v48  ;;  %v2648_v48 = vld [vmem:[#allocation2 + $0x12a] sm:$0xff] }
 0x355   : > { %v2618_v43 = vld [vmem:[#allocation2 + $0x141] sm:$0xff] }
 0x356   : > { %2554 = vst.msk [vmem:[#allocation2 + $0x159] sm:$0xff] %vm279_vm0, %v2522_v21  ;;  %v2521_v23 = vmax.f32 %v2489_v10, 0.0  ;;  %2933 = vrot.lane.b32.xlu1 %v2618_v43, %s4953_s12  ;;  %v2647_v10 = vld [vmem:[#allocation2 + $0x122] sm:$0xff] }
 0x357   : > { %v4818_v7 = vpop.f32.mrf.mxu0  ;;  %v2617_v29 = vld [vmem:[#allocation2 + $0x139] sm:$0xff] }
 0x358   : > { %2553 = vst.msk [vmem:[#allocation2 + $0x151] sm:$0xff] %vm279_vm0, %v2521_v23  ;;  %v2453_v37 = vmul.f32 %v4818_v7, %v6808_v55  ;;  %2931 = vrot.lane.b32.xlu0 %v2617_v29, %s4953_s12  ;;  %v2650_v23 = vld [vmem:[#allocation2 + $0x142] sm:$0xff]  ;;  %v2649_v29 = vld [vmem:[#allocation2 + $0x13a] sm:$0xff] }
 0x359   : > { %v2398_v24 = vpop.f32.mrf.mxu0 }
 0x35a   : > { %v2492_v26 = vadd.f32 %v6813_v1, %v2453_v37  ;;  %v2452_v28 = vmul.f32 %v6808_v55, %v2398_v24 }
 0x35c   : > { %v2524_v51 = vmax.f32 %v2492_v26, 0.0  ;;  %v2491_v33 = vadd.f32 %v6813_v1, %v2452_v28 }
 0x35d   : > { %v2620_v17 = vld [vmem:[#allocation2 + $0x159] sm:$0xff] }
 0x35e   : > { %2556 = vst.msk [vmem:[#allocation2 + $0x171] sm:$0xff] %vm279_vm0, %v2524_v51  ;;  %v2523_v12 = vmax.f32 %v2491_v33, 0.0  ;;  %2937 = vrot.lane.b32.xlu1 %v2620_v17, %s4953_s12  ;;  %v2652_v24 = vld [vmem:[#allocation2 + $0x15a] sm:$0xff] }
 0x35f   : > { %v4821_v45 = vpop.f32.mrf.mxu0  ;;  %v2619_v62 = vld [vmem:[#allocation2 + $0x151] sm:$0xff] }
 0x360   : > { %2555 = vst.msk [vmem:[#allocation2 + $0x169] sm:$0xff] %vm279_vm0, %v2523_v12  ;;  %v2455_v47 = vmul.f32 %v4821_v45, %v6808_v55  ;;  %2935 = vrot.lane.b32.xlu0 %v2619_v62, %s4953_s12  ;;  %v2651_v28 = vld [vmem:[#allocation2 + $0x152] sm:$0xff]  ;;  %v7074_v62 = vld [vmem:[#allocation2 + $0x20] sm:$0xff] }
 0x361   : > { %v2408_v52 = vpop.f32.mrf.mxu0 }
 0x362   : > { %v2494_v56 = vadd.f32 %v6813_v1, %v2455_v47  ;;  %v2454_v63 = vmul.f32 %v6808_v55, %v2408_v52  ;;  %v6970_v55 = vld [vmem:[#allocation2 + $0x22] sm:$0xff]  ;;  %v7080_v52 = vld [vmem:[#allocation2 + $0x18] sm:$0xff] }
 0x364   : > { %v2526_v16 = vmax.f32 %v2494_v56, 0.0  ;;  %v2493_v34 = vadd.f32 %v6813_v1, %v2454_v63  ;;  %v6974_v1 = vld [vmem:[#allocation2 + $0x1a] sm:$0xff] }
 0x365   : > { %v2622_v8 = vld [vmem:[#allocation2 + $0x171] sm:$0xff] }
 0x366   : > { %2558 = vst.msk [vmem:[#allocation2 + $0x189] sm:$0xff] %vm279_vm0, %v2526_v16  ;;  %v2525_v53 = vmax.f32 %v2493_v34, 0.0  ;;  %2941 = vrot.lane.b32.xlu1 %v2622_v8, %s4953_s12  ;;  %v2654_v33 = vld [vmem:[#allocation2 + $0x172] sm:$0xff] }
 0x367   : > { %v2621_v22 = vld [vmem:[#allocation2 + $0x169] sm:$0xff]  ;;  %v7084_v56 = vld [vmem:[#allocation2 + $0x38] sm:$0xff] }
 0x368   : > { %2557 = vst.msk [vmem:[#allocation2 + $0x181] sm:$0xff] %vm279_vm0, %v2525_v53  ;;  %2939 = vrot.lane.b32.xlu0 %v2621_v22, %s4953_s12  ;;  %v2653_v12 = vld [vmem:[#allocation2 + $0x16a] sm:$0xff] }
 0x369   : > { %v7090_v16 = vld [vmem:[#allocation2 + $0x30] sm:$0xff]  ;;  %v7100_v53 = vld [vmem:[#allocation2 + $0x48] sm:$0xff] }
 0x36a   : > { %3009 = vrot.lane.b32.xlu1 %v2624_v3, %s4954_s13  ;;  %v7096_v8 = vld [vmem:[#allocation2 + $0x50] sm:$0xff]  ;;  %v7106_v3 = vld [vmem:[#allocation2 + $0x68] sm:$0xff] }
 0x36c   : > { %3007 = vrot.lane.b32.xlu0 %v2623_v19, %s4954_s13 }
 0x36e   : > { %3013 = vrot.lane.b32.xlu1 %v6970_v55, %s4954_s13 }
 0x370   : > { %3011 = vrot.lane.b32.xlu0 %v6974_v1, %s4954_s13 }
 0x372   : > { %3017 = vrot.lane.b32.xlu1 %v6978_v2, %s4954_s13 }
 0x374   : > { %3015 = vrot.lane.b32.xlu0 %v6982_v38, %s4954_s13 }
 0x376   : > { %3021 = vrot.lane.b32.xlu1 %v6986_v57, %s4954_s13 }
 0x378   : > { %3019 = vrot.lane.b32.xlu0 %v6990_v39, %s4954_s13 }
 0x37a   : > { %3025 = vrot.lane.b32.xlu1 %v6994_v18, %s4954_s13 }
 0x37c   : > { %3023 = vrot.lane.b32.xlu0 %v6998_v50, %s4954_s13 }
 0x37e   : > { %3029 = vrot.lane.b32.xlu1 %v7002_v61, %s4954_s13 }
 0x380   : > { %3027 = vrot.lane.b32.xlu0 %v7006_v40, %s4954_s13 }
 0x382   : > { %3033 = vrot.lane.b32.xlu1 %v7010_v15, %s4954_s13 }
 0x384   : > { %3031 = vrot.lane.b32.xlu0 %v7014_v13, %s4954_s13 }
 0x386   : > { %3037 = vrot.lane.b32.xlu1 %v7018_v36, %s4954_s13 }
 0x388   : > { %3035 = vrot.lane.b32.xlu0 %v7022_v59, %s4954_s13 }
 0x38a   : > { %3041 = vrot.lane.b32.xlu1 %v7026_v54, %s4954_s13 }
 0x38c   : > { %3039 = vrot.lane.b32.xlu0 %v7030_v9, %s4954_s13 }
 0x38e   : > { %3045 = vrot.lane.b32.xlu1 %v2642_v4, %s4954_s13  ;;  %v7112_v4 = vld [vmem:[#allocation2 + $0x60] sm:$0xff] }
 0x390   : > { %3043 = vrot.lane.b32.xlu0 %v2641_v0, %s4954_s13  ;;  %v7116_v0 = vld [vmem:[#allocation2 + $0x80] sm:$0xff] }
 0x392   : > { %3049 = vrot.lane.b32.xlu1 %v2644_v27, %s4954_s13 }
 0x394   : > { %v7041_v20 = vpop.permute.xlu1 %2885  ;;  %3047 = vrot.lane.b32.xlu0 %v2643_v30, %s4954_s13  ;;  %v7122_v30 = vld [vmem:[#allocation2 + $0x78] sm:$0xff] }
 0x396   : > { %v7044_v41 = vpop.permute.xlu0 %2883  ;;  %3053 = vrot.lane.b32.xlu1 %v2646_v35, %s4954_s13 }
 0x398   : > { %v7047_v32 = vpop.permute.xlu1 %2889  ;;  %3051 = vrot.lane.b32.xlu0 %v2645_v58, %s4954_s13  ;;  %v7128_v58 = vld [vmem:[#allocation2 + $0x98] sm:$0xff] }
 0x39a   : > { %v7050_v21 = vpop.permute.xlu0 %2887  ;;  %3057 = vrot.lane.b32.xlu1 %v2648_v48, %s4954_s13  ;;  %v7132_v48 = vld [vmem:[#allocation2 + $0x90] sm:$0xff] }
 0x39c   : > { %v7053_v43 = vpop.permute.xlu1 %2893  ;;  %3055 = vrot.lane.b32.xlu0 %v2647_v10, %s4954_s13 }
 0x39d   : > { %8507 = vst [vmem:[#allocation4_spill] sm:$0xff] %v7053_v43 }
 0x39e   : > { %v7056_v7 = vpop.permute.xlu0 %2891  ;;  %3061 = vrot.lane.b32.xlu1 %v2650_v23, %s4954_s13  ;;  %v7138_v23 = vld [vmem:[#allocation2 + $0xb0] sm:$0xff] }
 0x3a0   : > { %v7059_v37 = vpop.permute.xlu1 %2897  ;;  %3059 = vrot.lane.b32.xlu0 %v2649_v29, %s4954_s13 }
 0x3a1   : > { %8508 = vst [vmem:[#allocation9_spill] sm:$0xff] %v7059_v37  ;;  %v2585_v37 = vld [vmem:[#allocation2 + $0x138] sm:$0xff] }
 0x3a2   : > { %v7062_v26 = vpop.permute.xlu0 %2895  ;;  %3065 = vrot.lane.b32.xlu1 %v2652_v24, %s4954_s13  ;;  %v7144_v24 = vld [vmem:[#allocation2 + $0xa8] sm:$0xff] }
 0x3a3   : > { %8509 = vst [vmem:[#allocation68_spill] sm:$0xff] %v7062_v26  ;;  %8522 = vst [vmem:[#allocation20_spill] sm:$0xff] %v7144_v24  ;;  %v2588_v26 = vld [vmem:[#allocation2 + $0x158] sm:$0xff] }
 0x3a4   : > { %v7065_v51 = vpop.permute.xlu1 %2901  ;;  %3063 = vrot.lane.b32.xlu0 %v2651_v28, %s4954_s13  ;;  %v7148_v28 = vld [vmem:[#allocation2 + $0xc8] sm:$0xff] }
 0x3a5   : > { %8510 = vst [vmem:[#allocation63_spill] sm:$0xff] %v7065_v51 }
 0x3a6   : > { %v7068_v17 = vpop.permute.xlu0 %2899  ;;  %3069 = vrot.lane.b32.xlu1 %v2654_v33, %s4954_s13 }
 0x3a7   : > { %8511 = vst [vmem:[#allocation8_spill] sm:$0xff] %v7068_v17 }
 0x3a8   : > { %v7071_v45 = vpop.permute.xlu1 %2905  ;;  %3067 = vrot.lane.b32.xlu0 %v2653_v12, %s4954_s13  ;;  %v7154_v12 = vld [vmem:[#allocation2 + $0xc0] sm:$0xff] }
 0x3a9   : > { %8512 = vst [vmem:[#allocation12_spill] sm:$0xff] %v7071_v45  ;;  %v2584_v45 = vld [vmem:[#allocation2 + $0x128] sm:$0xff] }
 0x3aa   : > { %v7076_v47 = vpop.permute.xlu0 %2903  ;;  %3137 = vrot.lane.b32.xlu1 %v7074_v62, %s4955_s14 }
 0x3ab   : > { %8513 = vst [vmem:[#allocation11_spill] sm:$0xff] %v7076_v47 }
 0x3ac   : > { %3135 = vrot.lane.b32.xlu0 %v7080_v52, %s4955_s14  ;;  %v7086_v63 = vpop.permute.xlu1 %2909 }
 0x3ad   : > { %8514 = vst [vmem:[#allocation70_spill] sm:$0xff] %v7086_v63  ;;  %v7182_v63 = vld [vmem:[#allocation2 + $0x110] sm:$0xff] }
 0x3ae   : > { %3141 = vrot.lane.b32.xlu1 %v7084_v56, %s4955_s14  ;;  %v7092_v34 = vpop.permute.xlu0 %2907  ;;  %8528 = vst [vmem:[#allocation53_spill] sm:$0xff] %v7182_v63 }
 0x3af   : > { %8515 = vst [vmem:[#allocation67_spill] sm:$0xff] %v7092_v34  ;;  %v7188_v34 = vld [vmem:[#allocation2 + $0x108] sm:$0xff] }
 0x3b0   : > { %3139 = vrot.lane.b32.xlu0 %v7090_v16, %s4955_s14  ;;  %v7102_v22 = vpop.permute.xlu1 %2913  ;;  %8530 = vst [vmem:[#allocation73_spill] sm:$0xff] %v7188_v34 }
 0x3b1   : > { %8516 = vst [vmem:[#allocation14_spill] sm:$0xff] %v7102_v22 }
 0x3b2   : > { %3145 = vrot.lane.b32.xlu1 %v7096_v8, %s4955_s14  ;;  %v7108_v19 = vpop.permute.xlu0 %2911 }
 0x3b3   : > { %8517 = vst [vmem:[#allocation13_spill] sm:$0xff] %v7108_v19 }
 0x3b4   : > { %3143 = vrot.lane.b32.xlu0 %v7100_v53, %s4955_s14  ;;  %v7118_v27 = vpop.permute.xlu1 %2917 }
 0x3b5   : > { %8518 = vst [vmem:[#allocation69_spill] sm:$0xff] %v7118_v27  ;;  %v7164_v27 = vld [vmem:[#allocation2 + $0xd8] sm:$0xff] }
 0x3b6   : > { %3149 = vrot.lane.b32.xlu1 %v7106_v3, %s4955_s14  ;;  %v7124_v35 = vpop.permute.xlu0 %2915 }
 0x3b7   : > { %8519 = vst [vmem:[#allocation17_spill] sm:$0xff] %v7124_v35 }
 0x3b8   : > { %3147 = vrot.lane.b32.xlu0 %v7112_v4, %s4955_s14  ;;  %v7134_v10 = vpop.permute.xlu1 %2921 }
 0x3b9   : > { %8520 = vst [vmem:[#allocation16_spill] sm:$0xff] %v7134_v10 }
 0x3ba   : > { %3153 = vrot.lane.b32.xlu1 %v7116_v0, %s4955_s14  ;;  %v7140_v29 = vpop.permute.xlu0 %2919 }
 0x3bb   : > { %8521 = vst [vmem:[#allocation71_spill] sm:$0xff] %v7140_v29  ;;  %v7160_v29 = vld [vmem:[#allocation2 + $0xe0] sm:$0xff] }
 0x3bc   : > { %3151 = vrot.lane.b32.xlu0 %v7122_v30, %s4955_s14  ;;  %v7150_v33 = vpop.permute.xlu1 %2925 }
 0x3bd   : > { %8523 = vst [vmem:[#allocation19_spill] sm:$0xff] %v7150_v33  ;;  %v7170_v33 = vld [vmem:[#allocation2 + $0xf8] sm:$0xff] }
 0x3be   : > { %3157 = vrot.lane.b32.xlu1 %v7128_v58, %s4955_s14  ;;  %v7156_v10 = vpop.permute.xlu0 %2923 }
 0x3bf   : > { %8524 = vst [vmem:[#allocation72_spill] sm:$0xff] %v7156_v10  ;;  %v7176_v10 = vld [vmem:[#allocation2 + $0xf0] sm:$0xff] }
 0x3c0   : > { %3155 = vrot.lane.b32.xlu0 %v7132_v48, %s4955_s14  ;;  %v7166_v35 = vpop.permute.xlu1 %2929 }
 0x3c1   : > { %8525 = vst [vmem:[#allocation24_spill] sm:$0xff] %v7166_v35 }
 0x3c2   : > { %3161 = vrot.lane.b32.xlu1 %v7138_v23, %s4955_s14  ;;  %v7172_v22 = vpop.permute.xlu0 %2927 }
 0x3c3   : > { %8526 = vst [vmem:[#allocation23_spill] sm:$0xff] %v7172_v22 }
 0x3c4   : > { %3159 = vrot.lane.b32.xlu0 %v7144_v24, %s4955_s14 }
 0x3c6   : > { %3165 = vrot.lane.b32.xlu1 %v7148_v28, %s4955_s14 }
 0x3c8   : > { %3163 = vrot.lane.b32.xlu0 %v7154_v12, %s4955_s14  ;;  %v7178_v19 = vpop.permute.xlu1 %2933 }
 0x3c9   : > { %8527 = vst [vmem:[#allocation75_spill] sm:$0xff] %v7178_v19  ;;  %v2583_v19 = vld [vmem:[#allocation2 + $0x120] sm:$0xff] }
 0x3ca   : > { %3169 = vrot.lane.b32.xlu1 %v7160_v29, %s4955_s14  ;;  %v7184_v35 = vpop.permute.xlu0 %2931 }
 0x3cb   : > { %8529 = vst [vmem:[#allocation130_spill] sm:$0xff] %v7184_v35  ;;  %v2586_v35 = vld [vmem:[#allocation2 + $0x140] sm:$0xff] }
 0x3cc   : > { %3167 = vrot.lane.b32.xlu0 %v7164_v27, %s4955_s14 }
 0x3ce   : > { %3173 = vrot.lane.b32.xlu1 %v7170_v33, %s4955_s14 }
 0x3d0   : > { %3171 = vrot.lane.b32.xlu0 %v7176_v10, %s4955_s14  ;;  %v7190_v22 = vpop.permute.xlu1 %2937 }
 0x3d1   : > { %8531 = vst [vmem:[#allocation96_spill] sm:$0xff] %v7190_v22 }
 0x3d2   : > { %3177 = vrot.lane.b32.xlu1 %v7182_v63, %s4955_s14  ;;  %v7194_v47 = vpop.permute.xlu0 %2935 }
 0x3d3   : > { %8532 = vst [vmem:[#allocation128_spill] sm:$0xff] %v7194_v47 }
 0x3d4   : > { %3175 = vrot.lane.b32.xlu0 %v7188_v34, %s4955_s14 }
 0x3d6   : > { %3181 = vrot.lane.b32.xlu1 %v2584_v45, %s4955_s14  ;;  %v2587_v45 = vld [vmem:[#allocation2 + $0x150] sm:$0xff] }
 0x3d8   : > { %v7197_v51 = vpop.permute.xlu1 %2941  ;;  %3179 = vrot.lane.b32.xlu0 %v2583_v19, %s4955_s14  ;;  %v2590_v19 = vld [vmem:[#allocation2 + $0x170] sm:$0xff] }
 0x3d9   : > { %8533 = vst [vmem:[#allocation94_spill] sm:$0xff] %v7197_v51 }
 0x3da   : > { %3185 = vrot.lane.b32.xlu1 %v2586_v35, %s4955_s14  ;;  %v7201_v17 = vpop.permute.xlu0 %2939 }
 0x3db   : > { %8534 = vst [vmem:[#allocation10_spill] sm:$0xff] %v7201_v17  ;;  %v2589_v17 = vld [vmem:[#allocation2 + $0x168] sm:$0xff] }
 0x3dc   : > { %v7203_v22 = vpop.permute.xlu1 %3009  ;;  %3183 = vrot.lane.b32.xlu0 %v2585_v37, %s4955_s14  ;;  %v2686_v37 = vld [vmem:[#allocation2 + $0x188] sm:$0xff] }
 0x3de   : > { %3189 = vrot.lane.b32.xlu1 %v2588_v26, %s4955_s14  ;;  %v7207_v47 = vpop.permute.xlu0 %3007  ;;  %v2685_v26 = vld [vmem:[#allocation2 + $0x180] sm:$0xff] }
 0x3e0   : > { %v7209_v43 = vpop.permute.xlu1 %3013  ;;  %3187 = vrot.lane.b32.xlu0 %v2587_v45, %s4955_s14 }
 0x3e2   : > { %3193 = vrot.lane.b32.xlu1 %v2590_v19, %s4955_s14  ;;  %v7213_v35 = vpop.permute.xlu0 %3011 }
 0x3e4   : > { %v7215_v51 = vpop.permute.xlu1 %3017  ;;  %3191 = vrot.lane.b32.xlu0 %v2589_v17, %s4955_s14  ;;  %v4131_v17 = vld [vmem:[%s8089_s6 + $0x20] sm:$0xf] }
 0x3e5   : > { %4822 = vmatprep.subr.msk.mxu1 %vm2188_vm2, %v4131_v17 }
 0x3e6   : > { %v7218_v34 = vpop.permute.xlu0 %3015  ;;  %3197 = vrot.lane.b32.xlu1 %v2686_v37, %s4955_s14  ;;  %4823 = vmatpush3.msk.msra.mxu1 %vm2188_vm2, %v4131_v17 }
 0x3e8   : > { %v7221_v63 = vpop.permute.xlu1 %3021  ;;  %3195 = vrot.lane.b32.xlu0 %v2685_v26, %s4955_s14 }
 0x3ea   : > { %v7224_v45 = vpop.permute.xlu0 %3019  ;;  %3265 = vrot.lane.b32.xlu1 %v6832_v6, %s4956_s15  ;;  %v4130_v6 = vld [vmem:[%s8089_s6 + $0x18] sm:$0xff] }
 0x3eb   : > { %4824 = vmatprep.subr.mxu1 %v4130_v6 }
 0x3ec   : > { %v7228_v19 = vpop.permute.xlu1 %3025  ;;  %3263 = vrot.lane.b32.xlu0 %v6839_v60, %s4956_s15  ;;  %4825 = vmatpush3.msra.mxu1 %v4130_v6  ;;  %v4129_v60 = vld [vmem:[%s8089_s6 + $0x10] sm:$0xff] }
 0x3ed   : > { %8535 = vst [vmem:[#allocation151_spill] sm:$0xff] %v7228_v19  ;;  %4826 = vmatprep.subr.mxu1 %v4129_v60 }
 0x3ee   : > { %v7236_v37 = vpop.permute.xlu0 %3023  ;;  %3393 = vrot.lane.b32.xlu1 %v6970_v55, %s4957_s16  ;;  %4827 = vmatpush3.msra.mxu1 %v4129_v60  ;;  %v4128_v55 = vld [vmem:[%s8089_s6 + $0x8] sm:$0xff] }
 0x3ef   : > { %4828 = vmatprep.subr.mxu1 %v4128_v55 }
 0x3f0   : > { %v7244_v26 = vpop.permute.xlu1 %3029  ;;  %3391 = vrot.lane.b32.xlu0 %v6974_v1, %s4957_s16  ;;  %4829 = vmatpush3.msra.mxu1 %v4128_v55  ;;  %v4127_v1 = vld [vmem:[%s8089_s6] sm:$0xff] }
 0x3f1   : > { %4830 = vmatprep.subr.mxu1 %v4127_v1 }
 0x3f2   : > { %v7251_v19 = vpop.permute.xlu0 %3027  ;;  %3521 = vrot.lane.b32.xlu1 %v7084_v56, %s4958_s17  ;;  %4831 = vmatpush3.msra.mxu1 %v4127_v1 }
 0x3f4   : > { %v7258_v17 = vpop.permute.xlu1 %3033  ;;  %3519 = vrot.lane.b32.xlu0 %v7090_v16, %s4958_s17 }
 0x3f5   : > { %8536 = vst [vmem:[#allocation28_spill] sm:$0xff] %v7258_v17 }
 0x3f6   : > { %v7265_v6 = vpop.permute.xlu0 %3031  ;;  %3267 = vrot.lane.b32.xlu1 %v6853_v44, %s4956_s15 }
 0x3f7   : > { %8537 = vst [vmem:[#allocation6_spill] sm:$0xff] %v7265_v6 }
 0x3f8   : > { %v7269_v60 = vpop.permute.xlu1 %3037  ;;  %3647 = vrot.lane.b32.xlu0 %v6853_v44, %s4959_s18 }
 0x3f9   : > { %8538 = vst [vmem:[#allocation58_spill] sm:$0xff] %v7269_v60 }
 0x3fa   : > { %v7273_v17 = vpop.permute.xlu0 %3035  ;;  %3775 = vrot.lane.b32.xlu1 %v6982_v38, %s4960_s10 }
 0x3fb   : > { %8539 = vst [vmem:[#allocation27_spill] sm:$0xff] %v7273_v17 }
 0x3fc   : > { %v7277_v55 = vpop.permute.xlu1 %3041  ;;  %3649 = vrot.lane.b32.xlu0 %v6846_v5, %s4959_s18 }
 0x3fd   : > { %8540 = vst [vmem:[#allocation77_spill] sm:$0xff] %v7277_v55 }
 0x3fe   : > { %v7281_v6 = vpop.permute.xlu0 %3039  ;;  %3395 = vrot.lane.b32.xlu1 %v6982_v38, %s4957_s16 }
 0x3ff   : > { %8541 = vst [vmem:[#allocation54_spill] sm:$0xff] %v7281_v6 }
 0x400   : > { %v7285_v1 = vpop.permute.xlu1 %3045  ;;  %3269 = vrot.lane.b32.xlu0 %v6846_v5, %s4956_s15 }
 0x401   : > { %8542 = vst [vmem:[#allocation132_spill] sm:$0xff] %v7285_v1 }
 0x402   : > { %v7289_v44 = vpop.permute.xlu0 %3043  ;;  %3397 = vrot.lane.b32.xlu1 %v6978_v2, %s4957_s16 }
 0x403   : > { %8543 = vst [vmem:[#allocation74_spill] sm:$0xff] %v7289_v44  ;;  %v2790_v44 = vld [vmem:[#allocation2 + $0x81] sm:$0xff] }
 0x404   : > { %v7293_v60 = vpop.permute.xlu1 %3049  ;;  %3777 = vrot.lane.b32.xlu0 %v6978_v2, %s4960_s10 }
 0x405   : > { %8544 = vst [vmem:[#allocation98_spill] sm:$0xff] %v7293_v60 }
 0x406   : > { %v7297_v55 = vpop.permute.xlu0 %3047  ;;  %3525 = vrot.lane.b32.xlu1 %v7096_v8, %s4958_s17 }
 0x407   : > { %8545 = vst [vmem:[#allocation129_spill] sm:$0xff] %v7297_v55 }
 0x408   : > { %v7301_v38 = vpop.permute.xlu1 %3053  ;;  %3523 = vrot.lane.b32.xlu0 %v7100_v53, %s4958_s17 }
 0x409   : > { %8546 = vst [vmem:[#allocation154_spill] sm:$0xff] %v7301_v38 }
 0x40a   : > { %v7305_v5 = vpop.permute.xlu0 %3051  ;;  %3271 = vrot.lane.b32.xlu1 %v6867_v14, %s4956_s15 }
 0x40b   : > { %8547 = vst [vmem:[#allocation95_spill] sm:$0xff] %v7305_v5 }
 0x40c   : > { %v7309_v1 = vpop.permute.xlu1 %3057  ;;  %3651 = vrot.lane.b32.xlu0 %v6867_v14, %s4959_s18 }
 0x40d   : > { %8548 = vst [vmem:[#allocation18_spill] sm:$0xff] %v7309_v1 }
 0x40e   : > { %v7313_v2 = vpop.permute.xlu0 %3055  ;;  %3779 = vrot.lane.b32.xlu1 %v6990_v39, %s4960_s10 }
 0x40f   : > { %8549 = vst [vmem:[#allocation152_spill] sm:$0xff] %v7313_v2 }
 0x410   : > { %v7317_v60 = vpop.permute.xlu1 %3061  ;;  %3653 = vrot.lane.b32.xlu0 %v6860_v46, %s4959_s18 }
 0x411   : > { %8550 = vst [vmem:[#allocation32_spill] sm:$0xff] %v7317_v60 }
 0x412   : > { %v7321_v38 = vpop.permute.xlu0 %3059  ;;  %3399 = vrot.lane.b32.xlu1 %v6990_v39, %s4957_s16 }
 0x413   : > { %8551 = vst [vmem:[#allocation7_spill] sm:$0xff] %v7321_v38 }
 0x414   : > { %v7325_v5 = vpop.permute.xlu1 %3065  ;;  %3273 = vrot.lane.b32.xlu0 %v6860_v46, %s4956_s15 }
 0x415   : > { %8552 = vst [vmem:[#allocation62_spill] sm:$0xff] %v7325_v5 }
 0x416   : > { %v7329_v14 = vpop.permute.xlu0 %3063  ;;  %3401 = vrot.lane.b32.xlu1 %v6986_v57, %s4957_s16 }
 0x417   : > { %8553 = vst [vmem:[#allocation31_spill] sm:$0xff] %v7329_v14 }
 0x418   : > { %v7333_v1 = vpop.permute.xlu1 %3069  ;;  %3781 = vrot.lane.b32.xlu0 %v6986_v57, %s4960_s10 }
 0x419   : > { %8554 = vst [vmem:[#allocation79_spill] sm:$0xff] %v7333_v1 }
 0x41a   : > { %v7337_v60 = vpop.permute.xlu0 %3067  ;;  %3529 = vrot.lane.b32.xlu1 %v7106_v3, %s4958_s17 }
 0x41b   : > { %8555 = vst [vmem:[#allocation57_spill] sm:$0xff] %v7337_v60 }
 0x41c   : > { %v7341_v39 = vpop.permute.xlu1 %3137  ;;  %3527 = vrot.lane.b32.xlu0 %v7112_v4, %s4958_s17 }
 0x41e   : > { %v7345_v46 = vpop.permute.xlu0 %3135  ;;  %3275 = vrot.lane.b32.xlu1 %v6881_v49, %s4956_s15 }
 0x420   : > { %v7349_v5 = vpop.permute.xlu1 %3141  ;;  %3655 = vrot.lane.b32.xlu0 %v6881_v49, %s4959_s18 }
 0x422   : > { %v7353_v57 = vpop.permute.xlu0 %3139  ;;  %3783 = vrot.lane.b32.xlu1 %v6998_v50, %s4960_s10 }
 0x424   : > { %v7357_v60 = vpop.permute.xlu1 %3145  ;;  %3657 = vrot.lane.b32.xlu0 %v6874_v31, %s4959_s18 }
 0x426   : > { %v7361_v1 = vpop.permute.xlu0 %3143  ;;  %3403 = vrot.lane.b32.xlu1 %v6998_v50, %s4957_s16 }
 0x428   : > { %v7365_v14 = vpop.permute.xlu1 %3149  ;;  %3277 = vrot.lane.b32.xlu0 %v6874_v31, %s4956_s15 }
 0x42a   : > { %v7369_v49 = vpop.permute.xlu0 %3147  ;;  %3405 = vrot.lane.b32.xlu1 %v6994_v18, %s4957_s16 }
 0x42c   : > { %v7373_v38 = vpop.permute.xlu1 %3153  ;;  %3785 = vrot.lane.b32.xlu0 %v6994_v18, %s4960_s10 }
 0x42e   : > { %v7377_v2 = vpop.permute.xlu0 %3151  ;;  %3533 = vrot.lane.b32.xlu1 %v7116_v0, %s4958_s17 }
 0x430   : > { %v7381_v50 = vpop.permute.xlu1 %3157  ;;  %3531 = vrot.lane.b32.xlu0 %v7122_v30, %s4958_s17 }
 0x431   : > { %8556 = vst [vmem:[#allocation134_spill] sm:$0xff] %v7381_v50 }
 0x432   : > { %v7385_v31 = vpop.permute.xlu0 %3155  ;;  %3279 = vrot.lane.b32.xlu1 %v6892_v11, %s4956_s15 }
 0x434   : > { %v7389_v55 = vpop.permute.xlu1 %3161  ;;  %3659 = vrot.lane.b32.xlu0 %v6892_v11, %s4959_s18 }
 0x435   : > { %8557 = vst [vmem:[#allocation76_spill] sm:$0xff] %v7389_v55 }
 0x436   : > { %v7393_v18 = vpop.permute.xlu0 %3159  ;;  %3787 = vrot.lane.b32.xlu1 %v7006_v40, %s4960_s10 }
 0x438   : > { %v7397_v6 = vpop.permute.xlu1 %3165  ;;  %3661 = vrot.lane.b32.xlu0 %v2790_v44, %s4959_s18 }
 0x439   : > { %8558 = vst [vmem:[#allocation100_spill] sm:$0xff] %v7397_v6 }
 0x43a   : > { %v7400_v17 = vpop.permute.xlu0 %3163  ;;  %3407 = vrot.lane.b32.xlu1 %v7006_v40, %s4957_s16 }
 0x43b   : > { %8559 = vst [vmem:[#allocation131_spill] sm:$0xff] %v7400_v17 }
 0x43c   : > { %v7404_v50 = vpop.permute.xlu1 %3169  ;;  %3281 = vrot.lane.b32.xlu0 %v2790_v44, %s4956_s15  ;;  %v2697_v44 = vld [vmem:[#allocation2 + $0x91] sm:$0xff] }
 0x43d   : > { %8560 = vst [vmem:[#allocation156_spill] sm:$0xff] %v7404_v50 }
 0x43e   : > { %v7407_v11 = vpop.permute.xlu0 %3167  ;;  %3409 = vrot.lane.b32.xlu1 %v7002_v61, %s4957_s16 }
 0x43f   : > { %8561 = vst [vmem:[#allocation97_spill] sm:$0xff] %v7407_v11 }
 0x440   : > { %v7411_v55 = vpop.permute.xlu1 %3173  ;;  %3789 = vrot.lane.b32.xlu0 %v7002_v61, %s4960_s10 }
 0x441   : > { %8562 = vst [vmem:[#allocation22_spill] sm:$0xff] %v7411_v55  ;;  %v2792_v55 = vld [vmem:[#allocation2 + $0x99] sm:$0xff] }
 0x442   : > { %v7415_v6 = vpop.permute.xlu0 %3171  ;;  %3537 = vrot.lane.b32.xlu1 %v7128_v58, %s4958_s17 }
 0x443   : > { %8563 = vst [vmem:[#allocation153_spill] sm:$0xff] %v7415_v6 }
 0x444   : > { %v7419_v40 = vpop.permute.xlu1 %3177  ;;  %3535 = vrot.lane.b32.xlu0 %v7132_v48, %s4958_s17 }
 0x445   : > { %8564 = vst [vmem:[#allocation36_spill] sm:$0xff] %v7419_v40 }
 0x446   : > { %v7423_v50 = vpop.permute.xlu0 %3175  ;;  %3283 = vrot.lane.b32.xlu1 %v2697_v44, %s4956_s15 }
 0x447   : > { %8565 = vst [vmem:[#allocation15_spill] sm:$0xff] %v7423_v50 }
 0x448   : > { %v7426_v11 = vpop.permute.xlu1 %3181  ;;  %3663 = vrot.lane.b32.xlu0 %v2697_v44, %s4959_s18 }
 0x449   : > { %8566 = vst [vmem:[#allocation66_spill] sm:$0xff] %v7426_v11 }
 0x44a   : > { %v7429_v61 = vpop.permute.xlu0 %3179  ;;  %3791 = vrot.lane.b32.xlu1 %v7014_v13, %s4960_s10 }
 0x44b   : > { %8567 = vst [vmem:[#allocation35_spill] sm:$0xff] %v7429_v61 }
 0x44c   : > { %v7433_v6 = vpop.permute.xlu1 %3185  ;;  %3665 = vrot.lane.b32.xlu0 %v2792_v55, %s4959_s18 }
 0x44d   : > { %8568 = vst [vmem:[#allocation81_spill] sm:$0xff] %v7433_v6 }
 0x44e   : > { %v7436_v40 = vpop.permute.xlu0 %3183  ;;  %3411 = vrot.lane.b32.xlu1 %v7014_v13, %s4957_s16 }
 0x44f   : > { %8569 = vst [vmem:[#allocation61_spill] sm:$0xff] %v7436_v40 }
 0x450   : > { %v7440_v50 = vpop.permute.xlu1 %3189  ;;  %3285 = vrot.lane.b32.xlu0 %v2792_v55, %s4956_s15  ;;  %v2699_v55 = vld [vmem:[#allocation2 + $0xa9] sm:$0xff] }
 0x451   : > { %8570 = vst [vmem:[#allocation136_spill] sm:$0xff] %v7440_v50 }
 0x452   : > { %v7443_v44 = vpop.permute.xlu0 %3187  ;;  %3413 = vrot.lane.b32.xlu1 %v7010_v15, %s4957_s16 }
 0x453   : > { %8571 = vst [vmem:[#allocation78_spill] sm:$0xff] %v7443_v44 }
 0x454   : > { %v7447_v11 = vpop.permute.xlu1 %3193  ;;  %3793 = vrot.lane.b32.xlu0 %v7010_v15, %s4960_s10 }
 0x455   : > { %8572 = vst [vmem:[#allocation102_spill] sm:$0xff] %v7447_v11  ;;  %v2794_v11 = vld [vmem:[#allocation2 + $0xb1] sm:$0xff] }
 0x456   : > { %v7451_v6 = vpop.permute.xlu0 %3191  ;;  %3541 = vrot.lane.b32.xlu1 %v7138_v23, %s4958_s17  ;;  %v2559_v23 = vld [vmem:[#allocation2] sm:$0xff] }
 0x457   : > { %8573 = vst [vmem:[#allocation133_spill] sm:$0xff] %v7451_v6 }
 0x458   : > { %v7455_v13 = vpop.permute.xlu1 %3197  ;;  %3539 = vrot.lane.b32.xlu0 %v7144_v24, %s4958_s17 }
 0x459   : > { %8574 = vst [vmem:[#allocation158_spill] sm:$0xff] %v7455_v13 }
 0x45a   : > { %3287 = vrot.lane.b32.xlu1 %v2699_v55, %s4956_s15  ;;  %v7460_v50 = vpop.permute.xlu0 %3195 }
 0x45b   : > { %8575 = vst [vmem:[#allocation99_spill] sm:$0xff] %v7460_v50  ;;  %v3871_v50 = vsel %vm279_vm0, %v2559_v23, %v7038_v42 }
 0x45c   : > { %v3266_v44 = vpop.permute.xlu1 %3265  ;;  %3667 = vrot.lane.b32.xlu0 %v2699_v55, %s4959_s18  ;;  %v3903_v55 = vsel %vm1855_vm3, %v3871_v50, %v7207_v47 }
 0x45d   : > { %v3935_v17 = vsel %vm1888_vm4, %v3903_v55, %v7345_v46  ;;  %v2560_v46 = vld [vmem:[#allocation2 + $0x8] sm:$0xff] }
 0x45e   : > { %3795 = vrot.lane.b32.xlu1 %v7022_v59, %s4960_s10  ;;  %v3264_v15 = vpop.permute.xlu0 %3263 }
 0x45f   : > { %v3967_v24 = vsel %vm1921_vm5, %v3935_v17, %v3264_v15  ;;  %v2701_v17 = vld [vmem:[#allocation2 + $0xc1] sm:$0xff] }
 0x460   : > { %v3394_v6 = vpop.permute.xlu1 %3393  ;;  %3669 = vrot.lane.b32.xlu0 %v2794_v11, %s4959_s18 }
 0x462   : > { %3415 = vrot.lane.b32.xlu1 %v7022_v59, %s4957_s16  ;;  %v3392_v13 = vpop.permute.xlu0 %3391 }
 0x464   : > { %v3522_v40 = vpop.permute.xlu1 %3521  ;;  %3289 = vrot.lane.b32.xlu0 %v2794_v11, %s4956_s15  ;;  %v3999_v11 = vsel %vm1954_vm6, %v3967_v24, %v3392_v13  ;;  %v3872_v24 = vsel %vm279_vm0, %v2560_v46, %v7035_v25  ;;  %v2828_v46 = vld [vmem:[#allocation2 + $0xca] sm:$0xff] }
 0x466   : > { %3417 = vrot.lane.b32.xlu1 %v7018_v36, %s4957_s16  ;;  %v3520_v61 = vpop.permute.xlu0 %3519 }
 0x467   : > { %v4031_v42 = vsel %vm1987_vm7, %v3999_v11, %v3520_v61  ;;  %v3904_v61 = vsel %vm1855_vm3, %v3872_v24, %v7203_v22  ;;  %v2796_v11 = vld [vmem:[#allocation2 + $0xc9] sm:$0xff]  ;;  %v3874_v24 = vsel %vm279_vm0, %v7074_v62, %v7041_v20  ;;  %v2798_v62 = vld [vmem:[#allocation2 + $0xe1] sm:$0xff] }
 0x468   : > { %v3268_v59 = vpop.permute.xlu1 %3267  ;;  %3797 = vrot.lane.b32.xlu0 %v7018_v36, %s4960_s10 }
 0x46a   : > { %3545 = vrot.lane.b32.xlu1 %v7148_v28, %s4958_s17  ;;  %v3648_v47 = vpop.permute.xlu0 %3647 }
 0x46b   : > { %v4063_v50 = vsel %vm2020_vm8, %v4031_v42, %v3648_v47 }
 0x46c   : > { %v3776_v23 = vpop.permute.xlu1 %3775  ;;  %3543 = vrot.lane.b32.xlu0 %v7154_v12, %s4958_s17  ;;  %v3936_v12 = vsel %vm1888_vm4, %v3904_v61, %v7341_v39 }
 0x46d   : > { %v4095_v15 = vsel %vm2053_vm9, %v4063_v50, %v3776_v23  ;;  %v3968_v55 = vsel %vm1921_vm5, %v3936_v12, %v3266_v44 }
 0x46e   : > { %3291 = vrot.lane.b32.xlu1 %v2701_v17, %s4956_s15  ;;  %4832 = vmatprep.mubr.msk.f32.mxu1 %vm2091_vm10, %v4095_v15  ;;  %v3650_v36 = vpop.permute.xlu0 %3649  ;;  %v4000_v42 = vsel %vm1954_vm6, %v3968_v55, %v3394_v6  ;;  %v3873_v6 = vsel %vm279_vm0, %v7080_v52, %v7044_v41  ;;  %v2829_v55 = vld [vmem:[#allocation2 + $0xda] sm:$0xff] }
 0x46f   : > { %v4032_v25 = vsel %vm1987_vm7, %v4000_v42, %v3522_v40  ;;  %v3905_v40 = vsel %vm1855_vm3, %v3873_v6, %v7213_v35 }
 0x470   : > { %v3396_v28 = vpop.permute.xlu1 %3395  ;;  %3671 = vrot.lane.b32.xlu0 %v2701_v17, %s4959_s18  ;;  %v4064_v50 = vsel %vm2020_vm8, %v4032_v25, %v3650_v36 }
 0x472   : > { %3799 = vrot.lane.b32.xlu1 %v7030_v9, %s4960_s10  ;;  %v3270_v13 = vpop.permute.xlu0 %3269 }
 0x474   : > { %v3398_v47 = vpop.permute.xlu1 %3397  ;;  %3673 = vrot.lane.b32.xlu0 %v2796_v11, %s4959_s18 }
 0x476   : > { %3419 = vrot.lane.b32.xlu1 %v7030_v9, %s4957_s16  ;;  %v3778_v22 = vpop.permute.xlu0 %3777  ;;  %v3937_v9 = vsel %vm1888_vm4, %v3905_v40, %v7353_v57 }
 0x477   : > { %v4096_v39 = vsel %vm2053_vm9, %v4064_v50, %v3778_v22  ;;  %v3969_v17 = vsel %vm1921_vm5, %v3937_v9, %v3268_v59  ;;  %v2703_v59 = vld [vmem:[#allocation2 + $0xd9] sm:$0xff]  ;;  %v2736_v22 = vld [vmem:[#allocation2 + $0xe2] sm:$0xff] }
 0x478   : > { %v3526_v23 = vpop.permute.xlu1 %3525  ;;  %3293 = vrot.lane.b32.xlu0 %v2796_v11, %s4956_s15  ;;  %4833 = vmatmul.mubr.msk.f32.vlgmr.msra.gmra.mxu1 %vm2091_vm10, %v4096_v39  ;;  %v4001_v36 = vsel %vm1954_vm6, %v3969_v17, %v3396_v28  ;;  %v2705_v17 = vld [vmem:[#allocation2 + $0xf1] sm:$0xff] }
 0x47a   : > { %3421 = vrot.lane.b32.xlu1 %v7026_v54, %s4957_s16  ;;  %v3524_v44 = vpop.permute.xlu0 %3523 }
 0x47b   : > { %v4033_v41 = vsel %vm1987_vm7, %v4001_v36, %v3524_v44 }
 0x47c   : > { %v3272_v15 = vpop.permute.xlu1 %3271  ;;  %3801 = vrot.lane.b32.xlu0 %v2828_v46, %s4960_s10 }
 0x47e   : > { %3549 = vrot.lane.b32.xlu1 %v7160_v29, %s4958_s17  ;;  %v3652_v52 = vpop.permute.xlu0 %3651  ;;  %v3906_v29 = vsel %vm1855_vm3, %v3874_v24, %v7209_v43 }
 0x47f   : > { %v4065_v54 = vsel %vm2020_vm8, %v4033_v41, %v3652_v52  ;;  %v3938_v61 = vsel %vm1888_vm4, %v3906_v29, %v7349_v5  ;;  %v3877_v29 = vsel %vm279_vm0, %v7100_v53, %v7056_v7  ;;  %v8576_v7 = vld [vmem:[#allocation53_spill] sm:$0xff] }
 0x480   : > { %v3780_v35 = vpop.permute.xlu1 %3779  ;;  %3547 = vrot.lane.b32.xlu0 %v7164_v27, %s4958_s17  ;;  %v3970_v27 = vsel %vm1921_vm5, %v3938_v61, %v3270_v13  ;;  %v2738_v61 = vld [vmem:[#allocation2 + $0xfa] sm:$0xff] }
 0x481   : > { %v4097_v57 = vsel %vm2053_vm9, %v4065_v54, %v3780_v35  ;;  %v4002_v11 = vsel %vm1954_vm6, %v3970_v27, %v3398_v47  ;;  %v3875_v47 = vsel %vm279_vm0, %v7090_v16, %v7050_v21  ;;  %v2831_v54 = vld [vmem:[#allocation2 + $0xf2] sm:$0xff] }
 0x482   : > { %3295 = vrot.lane.b32.xlu1 %v2703_v59, %s4956_s15  ;;  %4835 = vmatprep.mubr.msk.f32.mxu1 %vm2091_vm10, %v4097_v57  ;;  %v3654_v28 = vpop.permute.xlu0 %3653  ;;  %v4034_v43 = vsel %vm1987_vm7, %v4002_v11, %v3526_v23  ;;  %v3907_v39 = vsel %vm1855_vm3, %v3875_v47, %v7218_v34 }
 0x483   : > { %v4066_v25 = vsel %vm2020_vm8, %v4034_v43, %v3654_v28  ;;  %v3939_v6 = vsel %vm1888_vm4, %v3907_v39, %v7361_v1 }
 0x484   : > { %v3400_v12 = vpop.permute.xlu1 %3399  ;;  %3675 = vrot.lane.b32.xlu0 %v2703_v59, %s4959_s18  ;;  %v3971_v40 = vsel %vm1921_vm5, %v3939_v6, %v3272_v15  ;;  %v3876_v15 = vsel %vm279_vm0, %v7084_v56, %v7047_v32  ;;  %v2800_v56 = vld [vmem:[#allocation2 + $0xf9] sm:$0xff] }
 0x485   : > { %v4003_v9 = vsel %vm1954_vm6, %v3971_v40, %v3400_v12  ;;  %v3909_v12 = vsel %vm1855_vm3, %v3877_v29, %v7224_v45  ;;  %v2833_v40 = vld [vmem:[#allocation2 + $0x10a] sm:$0xff] }
 0x486   : > { %3803 = vrot.lane.b32.xlu1 %v2829_v55, %s4960_s10  ;;  %v3274_v20 = vpop.permute.xlu0 %3273 }
 0x488   : > { %v3402_v42 = vpop.permute.xlu1 %3401  ;;  %3677 = vrot.lane.b32.xlu0 %v2798_v62, %s4959_s18 }
 0x48a   : > { %3423 = vrot.lane.b32.xlu1 %v2829_v55, %s4957_s16  ;;  %v3782_v5 = vpop.permute.xlu0 %3781  ;;  %v3941_v55 = vsel %vm1888_vm4, %v3909_v12, %v7369_v49 }
 0x48b   : > { %v4098_v50 = vsel %vm2053_vm9, %v4066_v25, %v3782_v5  ;;  %v8577_v25 = vld [vmem:[#allocation73_spill] sm:$0xff]  ;;  %v2707_v5 = vld [vmem:[#allocation2 + $0x109] sm:$0xff] }
 0x48c   : > { %v3530_v13 = vpop.permute.xlu1 %3529  ;;  %3297 = vrot.lane.b32.xlu0 %v2798_v62, %s4956_s15  ;;  %4836 = vmatmul.mubr.msk.f32.gmra.mxu1 %vm2091_vm10, %v4098_v50  ;;  %v8578_v50 = vld [vmem:[#allocation4_spill] sm:$0xff] }
 0x48e   : > { %3425 = vrot.lane.b32.xlu1 %v2736_v22, %s4957_s16  ;;  %v3528_v23 = vpop.permute.xlu0 %3527 }
 0x48f   : > { %v4035_v46 = vsel %vm1987_vm7, %v4003_v9, %v3528_v23 }
 0x490   : > { %v3276_v44 = vpop.permute.xlu1 %3275  ;;  %3805 = vrot.lane.b32.xlu0 %v2736_v22, %s4960_s10 }
 0x492   : > { %3553 = vrot.lane.b32.xlu1 %v7170_v33, %s4958_s17  ;;  %v3656_v21 = vpop.permute.xlu0 %3655  ;;  %v3908_v33 = vsel %vm1855_vm3, %v3876_v15, %v7215_v51  ;;  %v2740_v15 = vld [vmem:[#allocation2 + $0x112] sm:$0xff] }
 0x493   : > { %v4067_v16 = vsel %vm2020_vm8, %v4035_v46, %v3656_v21  ;;  %v3940_v41 = vsel %vm1888_vm4, %v3908_v33, %v7357_v60 }
 0x494   : > { %v3784_v34 = vpop.permute.xlu1 %3783  ;;  %3551 = vrot.lane.b32.xlu0 %v7176_v10, %s4958_s17  ;;  %v3972_v10 = vsel %vm1921_vm5, %v3940_v41, %v3274_v20  ;;  %v3973_v20 = vsel %vm1921_vm5, %v3941_v55, %v3276_v44  ;;  %v2802_v44 = vld [vmem:[#allocation2 + $0x111] sm:$0xff]  ;;  %v2835_v55 = vld [vmem:[#allocation2 + $0x122] sm:$0xff] }
 0x495   : > { %v4099_v1 = vsel %vm2053_vm9, %v4067_v16, %v3784_v34  ;;  %v4004_v35 = vsel %vm1954_vm6, %v3972_v10, %v3402_v42 }
 0x496   : > { %3299 = vrot.lane.b32.xlu1 %v2705_v17, %s4956_s15  ;;  %4838 = vmatprep.mubr.msk.f32.mxu1 %vm2091_vm10, %v4099_v1  ;;  %v3658_v36 = vpop.permute.xlu0 %3657  ;;  %v4036_v51 = vsel %vm1987_vm7, %v4004_v35, %v3530_v13  ;;  %v3878_v13 = vsel %vm279_vm0, %v7096_v8, %v8578_v50  ;;  %v8579_v1 = vld [vmem:[#allocation68_spill] sm:$0xff]  ;;  %v2771_v35 = vld [vmem:[#allocation2 + $0x120] sm:$0xff] }
 0x497   : > { %v4068_v59 = vsel %vm2020_vm8, %v4036_v51, %v3658_v36  ;;  %v3910_v22 = vsel %vm1855_vm3, %v3878_v13, %v7221_v63  ;;  %v2709_v51 = vld [vmem:[#allocation2 + $0x121] sm:$0xff] }
 0x498   : > { %v3404_v52 = vpop.permute.xlu1 %3403  ;;  %3679 = vrot.lane.b32.xlu0 %v2705_v17, %s4959_s18  ;;  %v3942_v39 = vsel %vm1888_vm4, %v3910_v22, %v7365_v14  ;;  %v3879_v17 = vsel %vm279_vm0, %v7112_v4, %v8579_v1 }
 0x499   : > { %v4005_v11 = vsel %vm1954_vm6, %v3973_v20, %v3404_v52  ;;  %v3911_v36 = vsel %vm1855_vm3, %v3879_v17, %v7236_v37  ;;  %v2804_v20 = vld [vmem:[#allocation2 + $0x129] sm:$0xff]  ;;  %v2837_v17 = vld [vmem:[#allocation2 + $0x13a] sm:$0xff] }
 0x49a   : > { %3807 = vrot.lane.b32.xlu1 %v2831_v54, %s4960_s10  ;;  %v3278_v32 = vpop.permute.xlu0 %3277  ;;  %v3943_v41 = vsel %vm1888_vm4, %v3911_v36, %v7377_v2 }
 0x49b   : > { %v3974_v6 = vsel %vm1921_vm5, %v3942_v39, %v3278_v32  ;;  %v2772_v32 = vld [vmem:[#allocation2 + $0x128] sm:$0xff] }
 0x49c   : > { %v3406_v57 = vpop.permute.xlu1 %3405  ;;  %3681 = vrot.lane.b32.xlu0 %v2800_v56, %s4959_s18 }
 0x49d   : > { %v4006_v9 = vsel %vm1954_vm6, %v3974_v6, %v3406_v57 }
 0x49e   : > { %3427 = vrot.lane.b32.xlu1 %v2831_v54, %s4957_s16  ;;  %v3786_v60 = vpop.permute.xlu0 %3785 }
 0x49f   : > { %v4100_v24 = vsel %vm2053_vm9, %v4068_v59, %v3786_v60  ;;  %v8580_v59 = vld [vmem:[#allocation9_spill] sm:$0xff] }
 0x4a0   : > { %v3534_v28 = vpop.permute.xlu1 %3533  ;;  %3301 = vrot.lane.b32.xlu0 %v2800_v56, %s4956_s15  ;;  %4839 = vmatmul.mubr.msk.f32.gmra.mxu1 %vm2091_vm10, %v4100_v24  ;;  %v3880_v60 = vsel %vm279_vm0, %v7106_v3, %v8580_v59 }
 0x4a1   : > { %v4038_v63 = vsel %vm1987_vm7, %v4006_v9, %v3534_v28  ;;  %v8581_v28 = vld [vmem:[#allocation151_spill] sm:$0xff] }
 0x4a2   : > { %3429 = vrot.lane.b32.xlu1 %v2738_v61, %s4957_s16  ;;  %v3532_v27 = vpop.permute.xlu0 %3531  ;;  %v3912_v29 = vsel %vm1855_vm3, %v3880_v60, %v8581_v28  ;;  %v8583_v9 = vld [vmem:[#allocation63_spill] sm:$0xff] }
 0x4a3   : > { %v4037_v42 = vsel %vm1987_vm7, %v4005_v11, %v3532_v27 }
 0x4a4   : > { %v3280_v62 = vpop.permute.xlu1 %3279  ;;  %3809 = vrot.lane.b32.xlu0 %v2738_v61, %s4960_s10  ;;  %v3944_v61 = vsel %vm1888_vm4, %v3912_v29, %v7373_v38 }
 0x4a5   : > { %v3975_v52 = vsel %vm1921_vm5, %v3943_v41, %v3280_v62 }
 0x4a6   : > { %3557 = vrot.lane.b32.xlu1 %v8576_v7, %s4958_s17  ;;  %v3660_v53 = vpop.permute.xlu0 %3659 }
 0x4a7   : > { %v4069_v45 = vsel %vm2020_vm8, %v4037_v42, %v3660_v53 }
 0x4a8   : > { %v3788_v43 = vpop.permute.xlu1 %3787  ;;  %3555 = vrot.lane.b32.xlu0 %v8577_v25, %s4958_s17 }
 0x4a9   : > { %v4101_v49 = vsel %vm2053_vm9, %v4069_v45, %v3788_v43  ;;  %v8582_v43 = vld [vmem:[#allocation8_spill] sm:$0xff] }
 0x4aa   : > { %3303 = vrot.lane.b32.xlu1 %v2707_v5, %s4956_s15  ;;  %4841 = vmatprep.mubr.msk.f32.mxu1 %vm2091_vm10, %v4101_v49  ;;  %v3662_v47 = vpop.permute.xlu0 %3661  ;;  %v3881_v25 = vsel %vm279_vm0, %v7122_v30, %v8582_v43  ;;  %v2742_v49 = vld [vmem:[#allocation2 + $0x12a] sm:$0xff]  ;;  %v2808_v43 = vld [vmem:[#allocation2 + $0x159] sm:$0xff] }
 0x4ab   : > { %v4070_v21 = vsel %vm2020_vm8, %v4038_v63, %v3662_v47 }
 0x4ac   : > { %v3408_v23 = vpop.permute.xlu1 %3407  ;;  %3683 = vrot.lane.b32.xlu0 %v2707_v5, %s4959_s18  ;;  %v3913_v5 = vsel %vm1855_vm3, %v3881_v25, %v7251_v19 }
 0x4ad   : > { %v4007_v54 = vsel %vm1954_vm6, %v3975_v52, %v3408_v23  ;;  %v3945_v13 = vsel %vm1888_vm4, %v3913_v5, %v7385_v31  ;;  %v2774_v23 = vld [vmem:[#allocation2 + $0x140] sm:$0xff] }
 0x4ae   : > { %3811 = vrot.lane.b32.xlu1 %v2833_v40, %s4960_s10  ;;  %v3282_v8 = vpop.permute.xlu0 %3281 }
 0x4af   : > { %v3976_v27 = vsel %vm1921_vm5, %v3944_v61, %v3282_v8  ;;  %v2775_v61 = vld [vmem:[#allocation2 + $0x150] sm:$0xff] }
 0x4b0   : > { %v3410_v46 = vpop.permute.xlu1 %3409  ;;  %3685 = vrot.lane.b32.xlu0 %v2802_v44, %s4959_s18 }
 0x4b1   : > { %v4008_v62 = vsel %vm1954_vm6, %v3976_v27, %v3410_v46  ;;  %v3882_v46 = vsel %vm279_vm0, %v7116_v0, %v8583_v9  ;;  %v2713_v27 = vld [vmem:[#allocation2 + $0x151] sm:$0xff] }
 0x4b2   : > { %3431 = vrot.lane.b32.xlu1 %v2833_v40, %s4957_s16  ;;  %v3790_v14 = vpop.permute.xlu0 %3789  ;;  %v2773_v40 = vld [vmem:[#allocation2 + $0x138] sm:$0xff] }
 0x4b3   : > { %v4102_v16 = vsel %vm2053_vm9, %v4070_v21, %v3790_v14  ;;  %v3914_v21 = vsel %vm1855_vm3, %v3882_v46, %v7244_v26  ;;  %v8584_v14 = vld [vmem:[#allocation134_spill] sm:$0xff] }
 0x4b4   : > { %v3538_v34 = vpop.permute.xlu1 %3537  ;;  %3305 = vrot.lane.b32.xlu0 %v2802_v44, %s4956_s15  ;;  %4842 = vmatmul.mubr.msk.f32.gmra.mxu1 %vm2091_vm10, %v4102_v16  ;;  %v2711_v44 = vld [vmem:[#allocation2 + $0x139] sm:$0xff]  ;;  %v3946_v16 = vsel %vm1888_vm4, %v3914_v21, %v8584_v14  ;;  %v2778_v21 = vld [vmem:[#allocation2 + $0x170] sm:$0xff] }
 0x4b5   : > { %v4040_v42 = vsel %vm1987_vm7, %v4008_v62, %v3538_v34  ;;  %v8588_v62 = vld [vmem:[#allocation28_spill] sm:$0xff] }
 0x4b6   : > { %3433 = vrot.lane.b32.xlu1 %v2740_v15, %s4957_s16  ;;  %v3536_v33 = vpop.permute.xlu0 %3535 }
 0x4b7   : > { %v4039_v4 = vsel %vm1987_vm7, %v4007_v54, %v3536_v33 }
 0x4b8   : > { %v3284_v10 = vpop.permute.xlu1 %3283  ;;  %3813 = vrot.lane.b32.xlu0 %v2740_v15, %s4960_s10  ;;  %v2806_v15 = vld [vmem:[#allocation2 + $0x141] sm:$0xff] }
 0x4b9   : > { %v3977_v47 = vsel %vm1921_vm5, %v3945_v13, %v3284_v10 }
 0x4ba   : > { %3561 = vrot.lane.b32.xlu1 %v2772_v32, %s4958_s17  ;;  %v3664_v56 = vpop.permute.xlu0 %3663  ;;  %v8585_v32 = vld [vmem:[#allocation11_spill] sm:$0xff] }
 0x4bb   : > { %v4071_v37 = vsel %vm2020_vm8, %v4039_v4, %v3664_v56  ;;  %v3883_v4 = vsel %vm279_vm0, %v7132_v48, %v8585_v32  ;;  %v2744_v56 = vld [vmem:[#allocation2 + $0x142] sm:$0xff] }
 0x4bc   : > { %v3792_v57 = vpop.permute.xlu1 %3791  ;;  %3559 = vrot.lane.b32.xlu0 %v2771_v35, %s4958_s17 }
 0x4bd   : > { %v4103_v2 = vsel %vm2053_vm9, %v4071_v37, %v3792_v57  ;;  %v8586_v37 = vld [vmem:[#allocation6_spill] sm:$0xff] }
 0x4be   : > { %3307 = vrot.lane.b32.xlu1 %v2709_v51, %s4956_s15  ;;  %4844 = vmatprep.mubr.msk.f32.mxu1 %vm2091_vm10, %v4103_v2  ;;  %v3666_v24 = vpop.permute.xlu0 %3665  ;;  %v3915_v35 = vsel %vm1855_vm3, %v3883_v4, %v8586_v37  ;;  %v2841_v37 = vld [vmem:[#allocation2 + $0x16a] sm:$0xff] }
 0x4bf   : > { %v4072_v7 = vsel %vm2020_vm8, %v4040_v42, %v3666_v24  ;;  %v3947_v2 = vsel %vm1888_vm4, %v3915_v35, %v7393_v18  ;;  %v2776_v24 = vld [vmem:[#allocation2 + $0x158] sm:$0xff] }
 0x4c0   : > { %v3412_v12 = vpop.permute.xlu1 %3411  ;;  %3687 = vrot.lane.b32.xlu0 %v2709_v51, %s4959_s18  ;;  %v8589_v42 = vld [vmem:[#allocation76_spill] sm:$0xff] }
 0x4c1   : > { %v4009_v39 = vsel %vm1954_vm6, %v3977_v47, %v3412_v12 }
 0x4c2   : > { %3815 = vrot.lane.b32.xlu1 %v2835_v55, %s4960_s10  ;;  %v3286_v3 = vpop.permute.xlu0 %3285 }
 0x4c3   : > { %v3978_v1 = vsel %vm1921_vm5, %v3946_v16, %v3286_v3 }
 0x4c4   : > { %v3414_v11 = vpop.permute.xlu1 %3413  ;;  %3689 = vrot.lane.b32.xlu0 %v2804_v20, %s4959_s18 }
 0x4c5   : > { %v4010_v36 = vsel %vm1954_vm6, %v3978_v1, %v3414_v11  ;;  %v2777_v1 = vld [vmem:[#allocation2 + $0x168] sm:$0xff] }
 0x4c6   : > { %3435 = vrot.lane.b32.xlu1 %v2835_v55, %s4957_s16  ;;  %v3794_v38 = vpop.permute.xlu0 %3793  ;;  %v8587_v55 = vld [vmem:[#allocation12_spill] sm:$0xff] }
 0x4c7   : > { %v4104_v53 = vsel %vm2053_vm9, %v4072_v7, %v3794_v38  ;;  %v3884_v3 = vsel %vm279_vm0, %v7128_v58, %v8587_v55 }
 0x4c8   : > { %v3542_v45 = vpop.permute.xlu1 %3541  ;;  %3309 = vrot.lane.b32.xlu0 %v2804_v20, %s4956_s15  ;;  %4845 = vmatmul.mubr.msk.f32.gmra.mxu1 %vm2091_vm10, %v4104_v53  ;;  %v3916_v11 = vsel %vm1855_vm3, %v3884_v3, %v8588_v62 }
 0x4c9   : > { %v4042_v26 = vsel %vm1987_vm7, %v4010_v36, %v3542_v45  ;;  %v3948_v7 = vsel %vm1888_vm4, %v3916_v11, %v8589_v42  ;;  %v2839_v45 = vld [vmem:[#allocation2 + $0x152] sm:$0xff] }
 0x4ca   : > { %3437 = vrot.lane.b32.xlu1 %v2742_v49, %s4957_s16  ;;  %v3540_v50 = vpop.permute.xlu0 %3539  ;;  %v4927_v36 = vld [vmem:[#allocation2 + $0xb0] sm:$0xff] }
 0x4cb   : > { %v4041_v30 = vsel %vm1987_vm7, %v4009_v39, %v3540_v50  ;;  %v8590_v39 = vld [vmem:[#allocation67_spill] sm:$0xff] }
 0x4cc   : > { %v3288_v22 = vpop.permute.xlu1 %3287  ;;  %3817 = vrot.lane.b32.xlu0 %v2742_v49, %s4960_s10 }
 0x4cd   : > { %v3979_v51 = vsel %vm1921_vm5, %v3947_v2, %v3288_v22 }
 0x4ce   : > { %3565 = vrot.lane.b32.xlu1 %v2774_v23, %s4958_s17  ;;  %v3668_v6 = vpop.permute.xlu0 %3667  ;;  %v8591_v23 = vld [vmem:[#allocation20_spill] sm:$0xff] }
 0x4cf   : > { %v4073_v19 = vsel %vm2020_vm8, %v4041_v30, %v3668_v6  ;;  %v3885_v30 = vsel %vm279_vm0, %v8591_v23, %v8590_v39  ;;  %v2746_v6 = vld [vmem:[#allocation2 + $0x15a] sm:$0xff] }
 0x4d0   : > { %v3796_v8 = vpop.permute.xlu1 %3795  ;;  %3563 = vrot.lane.b32.xlu0 %v2773_v40, %s4958_s17  ;;  %v8601_v39 = vld [vmem:[#allocation77_spill] sm:$0xff] }
 0x4d1   : > { %v4105_v31 = vsel %vm2053_vm9, %v4073_v19, %v3796_v8  ;;  %v8592_v19 = vld [vmem:[#allocation27_spill] sm:$0xff] }
 0x4d2   : > { %3311 = vrot.lane.b32.xlu1 %v2711_v44, %s4956_s15  ;;  %4847 = vmatprep.mubr.msk.f32.mxu1 %vm2091_vm10, %v4105_v31  ;;  %v3670_v63 = vpop.permute.xlu0 %3669  ;;  %v3917_v40 = vsel %vm1855_vm3, %v3885_v30, %v8592_v19  ;;  %v8593_v31 = vld [vmem:[#allocation131_spill] sm:$0xff]  ;;  %v8602_v30 = vld [vmem:[#allocation156_spill] sm:$0xff] }
 0x4d3   : > { %v4074_v41 = vsel %vm2020_vm8, %v4042_v26, %v3670_v63 }
 0x4d4   : > { %v3416_v34 = vpop.permute.xlu1 %3415  ;;  %3691 = vrot.lane.b32.xlu0 %v2711_v44, %s4959_s18  ;;  %v3949_v44 = vsel %vm1888_vm4, %v3917_v40, %v8593_v31 }
 0x4d5   : > { %v4011_v60 = vsel %vm1954_vm6, %v3979_v51, %v3416_v34 }
 0x4d6   : > { %3819 = vrot.lane.b32.xlu1 %v2837_v17, %s4960_s10  ;;  %v3290_v0 = vpop.permute.xlu0 %3289 }
 0x4d7   : > { %v3980_v53 = vsel %vm1921_vm5, %v3948_v7, %v3290_v0 }
 0x4d8   : > { %v3418_v33 = vpop.permute.xlu1 %3417  ;;  %3693 = vrot.lane.b32.xlu0 %v2806_v15, %s4959_s18 }
 0x4d9   : > { %v4012_v25 = vsel %vm1954_vm6, %v3980_v53, %v3418_v33  ;;  %v8594_v33 = vld [vmem:[#allocation70_spill] sm:$0xff] }
 0x4da   : > { %3439 = vrot.lane.b32.xlu1 %v2837_v17, %s4957_s16  ;;  %v3798_v52 = vpop.permute.xlu0 %3797  ;;  %v3886_v26 = vsel %vm279_vm0, %v4927_v36, %v8594_v33  ;;  %v8604_v36 = vld [vmem:[#allocation74_spill] sm:$0xff] }
 0x4db   : > { %v4106_v10 = vsel %vm2053_vm9, %v4074_v41, %v3798_v52  ;;  %v8595_v52 = vld [vmem:[#allocation58_spill] sm:$0xff] }
 0x4dc   : > { %v3546_v54 = vpop.permute.xlu1 %3545  ;;  %3313 = vrot.lane.b32.xlu0 %v2806_v15, %s4956_s15  ;;  %4848 = vmatmul.mubr.msk.f32.gmra.mxu1 %vm2091_vm10, %v4106_v10  ;;  %v2715_v15 = vld [vmem:[#allocation2 + $0x169] sm:$0xff]  ;;  %v3918_v10 = vsel %vm1855_vm3, %v3886_v26, %v8595_v52 }
 0x4dd   : > { %v4044_v5 = vsel %vm1987_vm7, %v4012_v25, %v3546_v54  ;;  %v8596_v54 = vld [vmem:[#allocation100_spill] sm:$0xff] }
 0x4de   : > { %3441 = vrot.lane.b32.xlu1 %v2744_v56, %s4957_s16  ;;  %v3544_v57 = vpop.permute.xlu0 %3543  ;;  %v3950_v32 = vsel %vm1888_vm4, %v3918_v10, %v8596_v54  ;;  %v2782_v10 = vld [vmem:[#allocation2 + $0x1a0] sm:$0xff] }
 0x4df   : > { %v4043_v48 = vsel %vm1987_vm7, %v4011_v60, %v3544_v57  ;;  %v2810_v57 = vld [vmem:[#allocation2 + $0x171] sm:$0xff] }
 0x4e0   : > { %v3292_v59 = vpop.permute.xlu1 %3291  ;;  %3821 = vrot.lane.b32.xlu0 %v2744_v56, %s4960_s10 }
 0x4e1   : > { %v3981_v9 = vsel %vm1921_vm5, %v3949_v44, %v3292_v59  ;;  %v2812_v44 = vld [vmem:[#allocation2 + $0x189] sm:$0xff] }
 0x4e2   : > { %3569 = vrot.lane.b32.xlu1 %v2776_v24, %s4958_s17  ;;  %v3672_v28 = vpop.permute.xlu0 %3671 }
 0x4e3   : > { %v4075_v29 = vsel %vm2020_vm8, %v4043_v48, %v3672_v28 }
 0x4e4   : > { %v3800_v12 = vpop.permute.xlu1 %3799  ;;  %3567 = vrot.lane.b32.xlu0 %v2775_v61, %s4958_s17  ;;  %v8597_v61 = vld [vmem:[#allocation13_spill] sm:$0xff] }
 0x4e5   : > { %v4107_v18 = vsel %vm2053_vm9, %v4075_v29, %v3800_v12  ;;  %v4928_v29 = vld [vmem:[#allocation2 + $0xc0] sm:$0xff] }
 0x4e6   : > { %3315 = vrot.lane.b32.xlu1 %v2713_v27, %s4956_s15  ;;  %4850 = vmatprep.mubr.msk.f32.mxu1 %vm2091_vm10, %v4107_v18  ;;  %v3674_v20 = vpop.permute.xlu0 %3673  ;;  %v3887_v12 = vsel %vm279_vm0, %v4928_v29, %v8597_v61  ;;  %v2748_v18 = vld [vmem:[#allocation2 + $0x172] sm:$0xff] }
 0x4e7   : > { %v4076_v50 = vsel %vm2020_vm8, %v4044_v5, %v3674_v20  ;;  %v8599_v20 = vld [vmem:[#allocation97_spill] sm:$0xff]  ;;  %v8607_v61 = vld [vmem:[#allocation132_spill] sm:$0xff] }
 0x4e8   : > { %v3420_v38 = vpop.permute.xlu1 %3419  ;;  %3695 = vrot.lane.b32.xlu0 %v2713_v27, %s4959_s18  ;;  %v8598_v27 = vld [vmem:[#allocation54_spill] sm:$0xff] }
 0x4e9   : > { %v4013_v63 = vsel %vm1954_vm6, %v3981_v9, %v3420_v38  ;;  %v3919_v55 = vsel %vm1855_vm3, %v3887_v12, %v8598_v27  ;;  %v2780_v38 = vld [vmem:[#allocation2 + $0x188] sm:$0xff] }
 0x4ea   : > { %3823 = vrot.lane.b32.xlu1 %v2839_v45, %s4960_s10  ;;  %v3294_v58 = vpop.permute.xlu0 %3293  ;;  %v3951_v62 = vsel %vm1888_vm4, %v3919_v55, %v8599_v20  ;;  %v2717_v5 = vld [vmem:[#allocation2 + $0x181] sm:$0xff] }
 0x4eb   : > { %v3982_v56 = vsel %vm1921_vm5, %v3950_v32, %v3294_v58  ;;  %v8608_v27 = vld [vmem:[#allocation22_spill] sm:$0xff] }
 0x4ec   : > { %v3422_v49 = vpop.permute.xlu1 %3421  ;;  %3697 = vrot.lane.b32.xlu0 %v2808_v43, %s4959_s18 }
 0x4ed   : > { %v4014_v2 = vsel %vm1954_vm6, %v3982_v56, %v3422_v49  ;;  %v2781_v56 = vld [vmem:[#allocation2 + $0x198] sm:$0xff] }
 0x4ee   : > { %3443 = vrot.lane.b32.xlu1 %v2839_v45, %s4957_s16  ;;  %v3802_v13 = vpop.permute.xlu0 %3801 }
 0x4ef   : > { %v4108_v47 = vsel %vm2053_vm9, %v4076_v50, %v3802_v13  ;;  %v4929_v50 = vld [vmem:[#allocation2 + $0xc8] sm:$0xff] }
 0x4f0   : > { %v3550_v22 = vpop.permute.xlu1 %3549  ;;  %3317 = vrot.lane.b32.xlu0 %v2808_v43, %s4956_s15  ;;  %4851 = vmatmul.mubr.msk.f32.gmra.mxu1 %vm2091_vm10, %v4108_v47  ;;  %v2779_v43 = vld [vmem:[#allocation2 + $0x180] sm:$0xff]  ;;  %v8600_v13 = vld [vmem:[#allocation14_spill] sm:$0xff] }
 0x4f1   : > { %v4046_v59 = vsel %vm1987_vm7, %v4014_v2, %v3550_v22  ;;  %v3888_v47 = vsel %vm279_vm0, %v4929_v50, %v8600_v13  ;;  %v2814_v2 = vld [vmem:[#allocation2 + $0x1a1] sm:$0xff] }
 0x4f2   : > { %3445 = vrot.lane.b32.xlu1 %v2746_v6, %s4957_s16  ;;  %v3548_v8 = vpop.permute.xlu0 %3547  ;;  %v3920_v23 = vsel %vm1855_vm3, %v3888_v47, %v8601_v39  ;;  %v8610_v50 = vld [vmem:[#allocation129_spill] sm:$0xff] }
 0x4f3   : > { %v4045_v14 = vsel %vm1987_vm7, %v4013_v63, %v3548_v8  ;;  %v2843_v8 = vld [vmem:[#allocation2 + $0x182] sm:$0xff] }
 0x4f4   : > { %v3296_v46 = vpop.permute.xlu1 %3295  ;;  %3825 = vrot.lane.b32.xlu0 %v2746_v6, %s4960_s10  ;;  %v3952_v6 = vsel %vm1888_vm4, %v3920_v23, %v8602_v30 }
 0x4f5   : > { %v3983_v11 = vsel %vm1921_vm5, %v3951_v62, %v3296_v46  ;;  %v2845_v62 = vld [vmem:[#allocation2 + $0x19a] sm:$0xff] }
 0x4f6   : > { %3573 = vrot.lane.b32.xlu1 %v2778_v21, %s4958_s17  ;;  %v3676_v16 = vpop.permute.xlu0 %3675 }
 0x4f7   : > { %v4077_v34 = vsel %vm2020_vm8, %v4045_v14, %v3676_v16 }
 0x4f8   : > { %v3804_v17 = vpop.permute.xlu1 %3803  ;;  %3571 = vrot.lane.b32.xlu0 %v2777_v1, %s4958_s17  ;;  %v4930_v1 = vld [vmem:[#allocation2 + $0xd8] sm:$0xff] }
 0x4f9   : > { %v4109_v0 = vsel %vm2053_vm9, %v4077_v34, %v3804_v17  ;;  %v8603_v17 = vld [vmem:[#allocation17_spill] sm:$0xff] }
 0x4fa   : > { %3319 = vrot.lane.b32.xlu1 %v2715_v15, %s4956_s15  ;;  %4853 = vmatprep.mubr.msk.f32.mxu1 %vm2091_vm10, %v4109_v0  ;;  %v3678_v41 = vpop.permute.xlu0 %3677  ;;  %v3889_v0 = vsel %vm279_vm0, %v4930_v1, %v8603_v17  ;;  %v8614_v1 = vld [vmem:[#allocation36_spill] sm:$0xff] }
 0x4fb   : > { %v4078_v60 = vsel %vm2020_vm8, %v4046_v59, %v3678_v41  ;;  %v3921_v33 = vsel %vm1855_vm3, %v3889_v0, %v8604_v36  ;;  %v8605_v41 = vld [vmem:[#allocation153_spill] sm:$0xff] }
 0x4fc   : > { %v3424_v4 = vpop.permute.xlu1 %3423  ;;  %3699 = vrot.lane.b32.xlu0 %v2715_v15, %s4959_s18  ;;  %v2750_v15 = vld [vmem:[#allocation2 + $0x18a] sm:$0xff]  ;;  %v3953_v52 = vsel %vm1888_vm4, %v3921_v33, %v8605_v41  ;;  %v4456_v36 = vld [vmem:[%s5086_s9] sm:$0xff] }
 0x4fd   : > { %v4015_v7 = vsel %vm1954_vm6, %v3983_v11, %v3424_v4 }
 0x4fe   : > { %3827 = vrot.lane.b32.xlu1 %v2841_v37, %s4960_s10  ;;  %v3298_v35 = vpop.permute.xlu0 %3297 }
 0x4ff   : > { %v3984_v40 = vsel %vm1921_vm5, %v3952_v6, %v3298_v35 }
 0x500   : > { %v3426_v51 = vpop.permute.xlu1 %3425  ;;  %3701 = vrot.lane.b32.xlu0 %v2810_v57, %s4959_s18 }
 0x501   : > { %v4016_v9 = vsel %vm1954_vm6, %v3984_v40, %v3426_v51 }
 0x502   : > { %3447 = vrot.lane.b32.xlu1 %v2841_v37, %s4957_s16  ;;  %v3806_v24 = vpop.permute.xlu0 %3805 }
 0x503   : > { %v4110_v48 = vsel %vm2053_vm9, %v4078_v60, %v3806_v24  ;;  %v2813_v60 = vld [vmem:[#allocation2 + $0x199] sm:$0xff] }
 0x504   : > { %v3554_v28 = vpop.permute.xlu1 %3553  ;;  %3321 = vrot.lane.b32.xlu0 %v2810_v57, %s4956_s15  ;;  %4854 = vmatmul.mubr.msk.f32.gmra.mxu1 %vm2091_vm10, %v4110_v48  ;;  %v4931_v24 = vld [vmem:[#allocation2 + $0xe0] sm:$0xff] }
 0x505   : > { %v4048_v63 = vsel %vm1987_vm7, %v4016_v9, %v3554_v28  ;;  %v8606_v48 = vld [vmem:[#allocation69_spill] sm:$0xff]  ;;  %v4933_v9 = vld [vmem:[#allocation2 + $0xf8] sm:$0xff] }
 0x506   : > { %3449 = vrot.lane.b32.xlu1 %v2748_v18, %s4957_s16  ;;  %v3552_v3 = vpop.permute.xlu0 %3551  ;;  %v3890_v28 = vsel %vm279_vm0, %v4931_v24, %v8606_v48 }
 0x507   : > { %v4047_v53 = vsel %vm1987_vm7, %v4015_v7, %v3552_v3  ;;  %v3922_v12 = vsel %vm1855_vm3, %v3890_v28, %v8607_v61  ;;  %v8617_v28 = vld [vmem:[#allocation35_spill] sm:$0xff] }
 0x508   : > { %v3300_v42 = vpop.permute.xlu1 %3299  ;;  %3829 = vrot.lane.b32.xlu0 %v2748_v18, %s4960_s10  ;;  %v2846_v18 = vld [vmem:[#allocation2 + $0x1a2] sm:$0xff]  ;;  %v3954_v55 = vsel %vm1888_vm4, %v3922_v12, %v8608_v27 }
 0x509   : > { %v3985_v54 = vsel %vm1921_vm5, %v3953_v52, %v3300_v42 }
 0x50a   : > { %3577 = vrot.lane.b32.xlu1 %v2780_v38, %s4958_s17  ;;  %v3680_v45 = vpop.permute.xlu0 %3679 }
 0x50b   : > { %v4079_v58 = vsel %vm2020_vm8, %v4047_v53, %v3680_v45 }
 0x50c   : > { %v3808_v25 = vpop.permute.xlu1 %3807  ;;  %3575 = vrot.lane.b32.xlu0 %v2779_v43, %s4958_s17 }
 0x50d   : > { %v4111_v49 = vsel %vm2053_vm9, %v4079_v58, %v3808_v25  ;;  %v4932_v25 = vld [vmem:[#allocation2 + $0xf0] sm:$0xff] }
 0x50e   : > { %3323 = vrot.lane.b32.xlu1 %v2717_v5, %s4956_s15  ;;  %4856 = vmatprep.mubr.msk.f32.mxu1 %vm2091_vm10, %v4111_v49  ;;  %v3682_v22 = vpop.permute.xlu0 %3681  ;;  %v8609_v49 = vld [vmem:[#allocation71_spill] sm:$0xff] }
 0x50f   : > { %v4080_v21 = vsel %vm2020_vm8, %v4048_v63, %v3682_v22  ;;  %v8611_v22 = vld [vmem:[#allocation15_spill] sm:$0xff] }
 0x510   : > { %v3428_v19 = vpop.permute.xlu1 %3427  ;;  %3703 = vrot.lane.b32.xlu0 %v2717_v5, %s4959_s18  ;;  %v3891_v5 = vsel %vm279_vm0, %v4932_v25, %v8609_v49 }
 0x511   : > { %v4017_v4 = vsel %vm1954_vm6, %v3985_v54, %v3428_v19  ;;  %v3923_v13 = vsel %vm1855_vm3, %v3891_v5, %v8610_v50  ;;  %v4458_v50 = vld [vmem:[%s5086_s9 + $0x10] sm:$0xff] }
 0x512   : > { %3831 = vrot.lane.b32.xlu1 %v2843_v8, %s4960_s10  ;;  %v3302_v31 = vpop.permute.xlu0 %3301  ;;  %v3955_v39 = vsel %vm1888_vm4, %v3923_v13, %v8611_v22 }
 0x513   : > { %v3986_v20 = vsel %vm1921_vm5, %v3954_v55, %v3302_v31 }
 0x514   : > { %v3430_v46 = vpop.permute.xlu1 %3429  ;;  %3705 = vrot.lane.b32.xlu0 %v2812_v44, %s4959_s18 }
 0x515   : > { %v4018_v42 = vsel %vm1954_vm6, %v3986_v20, %v3430_v46  ;;  %v8612_v46 = vld [vmem:[#allocation16_spill] sm:$0xff] }
 0x516   : > { %3451 = vrot.lane.b32.xlu1 %v2843_v8, %s4957_s16  ;;  %v3810_v14 = vpop.permute.xlu0 %3809  ;;  %v3892_v63 = vsel %vm279_vm0, %v4933_v9, %v8612_v46  ;;  %v4936_v9 = vld [vmem:[#allocation2 + $0x120] sm:$0xff]  ;;  %v8621_v46 = vld [vmem:[#allocation23_spill] sm:$0xff] }
 0x517   : > { %v4112_v16 = vsel %vm2053_vm9, %v4080_v21, %v3810_v14  ;;  %v4457_v14 = vld [vmem:[%s5086_s9 + $0x8] sm:$0xff] }
 0x518   : > { %v3558_v34 = vpop.permute.xlu1 %3557  ;;  %3325 = vrot.lane.b32.xlu0 %v2812_v44, %s4956_s15  ;;  %4857 = vmatmul.mubr.msk.f32.gmra.mxu1 %vm2091_vm10, %v4112_v16  ;;  %v8613_v16 = vld [vmem:[#allocation98_spill] sm:$0xff] }
 0x519   : > { %v4050_v38 = vsel %vm1987_vm7, %v4018_v42, %v3558_v34  ;;  %v3924_v34 = vsel %vm1855_vm3, %v3892_v63, %v8613_v16  ;;  %v8618_v42 = vld [vmem:[#allocation19_spill] sm:$0xff]  ;;  %v3895_v63 = vsel %vm279_vm0, %v4936_v9, %v8621_v46 }
 0x51a   : > { %3453 = vrot.lane.b32.xlu1 %v2750_v15, %s4957_s16  ;;  %v3556_v26 = vpop.permute.xlu0 %3555  ;;  %v3956_v17 = vsel %vm1888_vm4, %v3924_v34, %v8614_v1  ;;  %v8623_v34 = vld [vmem:[#allocation61_spill] sm:$0xff] }
 0x51b   : > { %v4049_v37 = vsel %vm1987_vm7, %v4017_v4, %v3556_v26 }
 0x51c   : > { %v3304_v32 = vpop.permute.xlu1 %3303  ;;  %3833 = vrot.lane.b32.xlu0 %v2750_v15, %s4960_s10 }
 0x51d   : > { %v3987_v23 = vsel %vm1921_vm5, %v3955_v39, %v3304_v32 }
 0x51e   : > { %3581 = vrot.lane.b32.xlu1 %v2782_v10, %s4958_s17  ;;  %v3684_v35 = vpop.permute.xlu0 %3683 }
 0x51f   : > { %v4081_v57 = vsel %vm2020_vm8, %v4049_v37, %v3684_v35 }
 0x520   : > { %v3812_v51 = vpop.permute.xlu1 %3811  ;;  %3579 = vrot.lane.b32.xlu0 %v2781_v56, %s4958_s17  ;;  %s7857_s17 = scalar_lea.vmem %s8090_s7, %s4688_s27 }
 0x521   : > { %v4113_v59 = vsel %vm2053_vm9, %v4081_v57, %v3812_v51  ;;  %v8615_v51 = vld [vmem:[#allocation72_spill] sm:$0xff] }
 0x522   : > { %3709 = vrot.lane.b32.xlu1 %v2814_v2, %s4959_s18  ;;  %4859 = vmatprep.mubr.msk.f32.mxu1 %vm2091_vm10, %v4113_v59  ;;  %v3686_v29 = vpop.permute.xlu0 %3685  ;;  %v4934_v2 = vld [vmem:[#allocation2 + $0x108] sm:$0xff] }
 0x523   : > { %v4082_v53 = vsel %vm2020_vm8, %v4050_v38, %v3686_v29  ;;  %v3893_v59 = vsel %vm279_vm0, %v4934_v2, %v8615_v51 }
 0x524   : > { %v3432_v3 = vpop.permute.xlu1 %3431  ;;  %3707 = vrot.lane.b32.xlu0 %v2813_v60, %s4959_s18  ;;  %v8616_v60 = vld [vmem:[#allocation95_spill] sm:$0xff] }
 0x525   : > { %v4019_v6 = vsel %vm1954_vm6, %v3987_v23, %v3432_v3  ;;  %v3925_v24 = vsel %vm1855_vm3, %v3893_v59, %v8616_v60  ;;  %v4460_v60 = vld [vmem:[%s5086_s9 + $0x20] sm:$0xff] }
 0x526   : > { %3837 = vrot.lane.b32.xlu1 %v2846_v18, %s4960_s10  ;;  %v3306_v11 = vpop.permute.xlu0 %3305  ;;  %v3957_v29 = vsel %vm1888_vm4, %v3925_v24, %v8617_v28 }
 0x527   : > { %v3988_v33 = vsel %vm1921_vm5, %v3956_v17, %v3306_v11  ;;  %v4935_v11 = vld [vmem:[#allocation2 + $0x110] sm:$0xff] }
 0x528   : > { %v3434_v7 = vpop.permute.xlu1 %3433  ;;  %3835 = vrot.lane.b32.xlu0 %v2845_v62, %s4960_s10 }
 0x529   : > { %v4020_v54 = vsel %vm1954_vm6, %v3988_v33, %v3434_v7  ;;  %v3894_v7 = vsel %vm279_vm0, %v4935_v11, %v8618_v42  ;;  %v4938_v11 = vld [vmem:[#allocation2 + $0x138] sm:$0xff]  ;;  %v8627_v42 = vld [vmem:[#allocation130_spill] sm:$0xff] }
 0x52a   : > { %v3814_v45 = vpop.permute.xlu0 %3813 }
 0x52b   : > { %v4114_v58 = vsel %vm2053_vm9, %v4082_v53, %v3814_v45  ;;  %v4459_v53 = vld [vmem:[%s5086_s9 + $0x18] sm:$0xff]  ;;  %v8619_v45 = vld [vmem:[#allocation154_spill] sm:$0xff] }
 0x52c   : > { %v3562_v43 = vpop.permute.xlu1 %3561  ;;  %4860 = vmatmul.mubr.msk.f32.gmra.mxu1 %vm2091_vm10, %v4114_v58  ;;  %v3926_v58 = vsel %vm1855_vm3, %v3894_v7, %v8619_v45  ;;  %v3897_v7 = vsel %vm279_vm0, %v4938_v11, %v8627_v42 }
 0x52d   : > { %v4052_v4 = vsel %vm1987_vm7, %v4020_v54, %v3562_v43  ;;  %v8620_v43 = vld [vmem:[#allocation66_spill] sm:$0xff]  ;;  %v8624_v54 = vld [vmem:[#allocation24_spill] sm:$0xff] }
 0x52e   : > { %v3560_v47 = vpop.permute.xlu0 %3559  ;;  %v3958_v25 = vsel %vm1888_vm4, %v3926_v58, %v8620_v43  ;;  %v8629_v58 = vld [vmem:[#allocation78_spill] sm:$0xff] }
 0x52f   : > { %v4051_v19 = vsel %vm1987_vm7, %v4019_v6, %v3560_v47 }
 0x530   : > { %v3308_v30 = vpop.permute.xlu1 %3307 }
 0x531   : > { %v3989_v61 = vsel %vm1921_vm5, %v3957_v29, %v3308_v30 }
 0x532   : > { %v3688_v40 = vpop.permute.xlu0 %3687 }
 0x533   : > { %v4083_v8 = vsel %vm2020_vm8, %v4051_v19, %v3688_v40 }
 0x534   : > { %v3816_v31 = vpop.permute.xlu1 %3815 }
 0x535   : > { %v4115_v44 = vsel %vm2053_vm9, %v4083_v8, %v3816_v31 }
 0x536   : > { %4862 = vmatprep.mubr.msk.f32.mxu1 %vm2091_vm10, %v4115_v44  ;;  %v3690_v21 = vpop.permute.xlu0 %3689 }
 0x537   : > { %v4084_v56 = vsel %vm2020_vm8, %v4052_v4, %v3690_v21  ;;  %v8622_v21 = vld [vmem:[#allocation152_spill] sm:$0xff] }
 0x538   : > { %v3436_v0 = vpop.permute.xlu1 %3435  ;;  %v4834_v15 = vpop.f32.mrf.mxu1 }
 0x539   : > { %v4489_v26 = vadd.f32 %v4834_v15, %v4457_v14  ;;  %v4021_v18 = vsel %vm1954_vm6, %v3989_v61, %v3436_v0  ;;  %v3927_v14 = vsel %vm1855_vm3, %v3895_v63, %v8622_v21  ;;  %v4462_v21 = vld [vmem:[%s5086_s9 + $0x30] sm:$0xff] }
 0x53a   : > { %v4297_v41 = vpop.f32.mrf.mxu1  ;;  %v3310_v52 = vpop.permute.xlu0 %3309  ;;  %v3959_v1 = vsel %vm1888_vm4, %v3927_v14, %v8623_v34 }
 0x53b   : > { %4521 = vst.msk [vmem:[%s7857_s17 + $0x8] sm:$0xff] %vm279_vm0, %v4489_v26  ;;  %v4488_v10 = vadd.f32 %v4456_v36, %v4297_v41  ;;  %v3990_v13 = vsel %vm1921_vm5, %v3958_v25, %v3310_v52 }
 0x53c   : > { %v3438_v32 = vpop.permute.xlu1 %3437 }
 0x53d   : > { %4520 = vst.msk [vmem:[%s7857_s17] sm:$0xff] %vm279_vm0, %v4488_v10  ;;  %v4022_v30 = vsel %vm1954_vm6, %v3990_v13, %v3438_v32  ;;  %v4937_v10 = vld [vmem:[#allocation2 + $0x128] sm:$0xff] }
 0x53e   : > { %v3818_v37 = vpop.permute.xlu0 %3817  ;;  %v3896_v32 = vsel %vm279_vm0, %v4937_v10, %v8624_v54  ;;  %v4940_v10 = vld [vmem:[#allocation2 + $0x150] sm:$0xff]  ;;  %v8633_v54 = vld [vmem:[#allocation128_spill] sm:$0xff] }
 0x53f   : > { %v4116_v35 = vsel %vm2053_vm9, %v4084_v56, %v3818_v37  ;;  %v4461_v56 = vld [vmem:[%s5086_s9 + $0x28] sm:$0xff] }
 0x540   : > { %v3566_v57 = vpop.permute.xlu1 %3565  ;;  %4863 = vmatmul.mubr.msk.f32.gmra.mxu1 %vm2091_vm10, %v4116_v35  ;;  %v8625_v37 = vld [vmem:[#allocation18_spill] sm:$0xff] }
 0x541   : > { %v4054_v19 = vsel %vm1987_vm7, %v4022_v30, %v3566_v57  ;;  %v3928_v35 = vsel %vm1855_vm3, %v3896_v32, %v8625_v37  ;;  %v8626_v57 = vld [vmem:[#allocation81_spill] sm:$0xff]  ;;  %v8630_v30 = vld [vmem:[#allocation75_spill] sm:$0xff]  ;;  %v3899_v32 = vsel %vm279_vm0, %v4940_v10, %v8633_v54 }
 0x542   : > { %v3564_v48 = vpop.permute.xlu0 %3563  ;;  %v3960_v2 = vsel %vm1888_vm4, %v3928_v35, %v8626_v57  ;;  %v8635_v35 = vld [vmem:[#allocation133_spill] sm:$0xff] }
 0x543   : > { %v4053_v27 = vsel %vm1987_vm7, %v4021_v18, %v3564_v48 }
 0x544   : > { %v3312_v12 = vpop.permute.xlu1 %3311 }
 0x545   : > { %v3991_v17 = vsel %vm1921_vm5, %v3959_v1, %v3312_v12 }
 0x546   : > { %v3692_v55 = vpop.permute.xlu0 %3691 }
 0x547   : > { %v4085_v3 = vsel %vm2020_vm8, %v4053_v27, %v3692_v55 }
 0x548   : > { %v3820_v20 = vpop.permute.xlu1 %3819 }
 0x549   : > { %v4117_v62 = vsel %vm2053_vm9, %v4085_v3, %v3820_v20 }
 0x54a   : > { %4865 = vmatprep.mubr.msk.f32.mxu1 %vm2091_vm10, %v4117_v62  ;;  %v3694_v38 = vpop.permute.xlu0 %3693 }
 0x54b   : > { %v4086_v40 = vsel %vm2020_vm8, %v4054_v19, %v3694_v38  ;;  %v8628_v38 = vld [vmem:[#allocation7_spill] sm:$0xff] }
 0x54c   : > { %v3440_v49 = vpop.permute.xlu1 %3439  ;;  %v4837_v5 = vpop.f32.mrf.mxu1 }
 0x54d   : > { %v4491_v47 = vadd.f32 %v4837_v5, %v4459_v53  ;;  %v4023_v15 = vsel %vm1954_vm6, %v3991_v17, %v3440_v49  ;;  %v3929_v53 = vsel %vm1855_vm3, %v3897_v7, %v8628_v38  ;;  %v4464_v38 = vld [vmem:[%s5086_s9 + $0x40] sm:$0xff] }
 0x54e   : > { %v4307_v22 = vpop.f32.mrf.mxu1  ;;  %v3314_v39 = vpop.permute.xlu0 %3313  ;;  %v3961_v43 = vsel %vm1888_vm4, %v3929_v53, %v8629_v58 }
 0x54f   : > { %4523 = vst.msk [vmem:[%s7857_s17 + $0x18] sm:$0xff] %vm279_vm0, %v4491_v47  ;;  %v4490_v23 = vadd.f32 %v4458_v50, %v4307_v22  ;;  %v3992_v24 = vsel %vm1921_vm5, %v3960_v2, %v3314_v39 }
 0x550   : > { %v3442_v6 = vpop.permute.xlu1 %3441 }
 0x551   : > { %4522 = vst.msk [vmem:[%s7857_s17 + $0x10] sm:$0xff] %vm279_vm0, %v4490_v23  ;;  %v4024_v12 = vsel %vm1954_vm6, %v3992_v24, %v3442_v6  ;;  %v4939_v23 = vld [vmem:[#allocation2 + $0x140] sm:$0xff] }
 0x552   : > { %v3822_v8 = vpop.permute.xlu0 %3821  ;;  %v3898_v6 = vsel %vm279_vm0, %v4939_v23, %v8630_v30  ;;  %v4942_v30 = vld [vmem:[#allocation2 + $0x170] sm:$0xff] }
 0x553   : > { %v4118_v31 = vsel %vm2053_vm9, %v4086_v40, %v3822_v8  ;;  %v4463_v40 = vld [vmem:[%s5086_s9 + $0x38] sm:$0xff] }
 0x554   : > { %v3570_v44 = vpop.permute.xlu1 %3569  ;;  %4866 = vmatmul.mubr.msk.f32.gmra.mxu1 %vm2091_vm10, %v4118_v31  ;;  %v8631_v8 = vld [vmem:[#allocation32_spill] sm:$0xff] }
 0x555   : > { %v4056_v27 = vsel %vm1987_vm7, %v4024_v12, %v3570_v44  ;;  %v3930_v31 = vsel %vm1855_vm3, %v3898_v6, %v8631_v8  ;;  %v8632_v44 = vld [vmem:[#allocation136_spill] sm:$0xff]  ;;  %v8639_v6 = vld [vmem:[#allocation94_spill] sm:$0xff] }
 0x556   : > { %v3568_v16 = vpop.permute.xlu0 %3567  ;;  %v3962_v9 = vsel %vm1888_vm4, %v3930_v31, %v8632_v44  ;;  %v8636_v12 = vld [vmem:[#allocation96_spill] sm:$0xff]  ;;  %v8640_v8 = vld [vmem:[#allocation10_spill] sm:$0xff]  ;;  %v8641_v44 = vld [vmem:[#allocation79_spill] sm:$0xff] }
 0x557   : > { %v4055_v36 = vsel %vm1987_vm7, %v4023_v15, %v3568_v16 }
 0x558   : > { %v3316_v0 = vpop.permute.xlu1 %3315 }
 0x559   : > { %v3993_v25 = vsel %vm1921_vm5, %v3961_v43, %v3316_v0 }
 0x55a   : > { %v3696_v33 = vpop.permute.xlu0 %3695 }
 0x55b   : > { %v4087_v26 = vsel %vm2020_vm8, %v4055_v36, %v3696_v33 }
 0x55c   : > { %v3824_v41 = vpop.permute.xlu1 %3823 }
 0x55d   : > { %v4119_v52 = vsel %vm2053_vm9, %v4087_v26, %v3824_v41 }
 0x55e   : > { %4868 = vmatprep.mubr.msk.f32.mxu1 %vm2091_vm10, %v4119_v52  ;;  %v3698_v4 = vpop.permute.xlu0 %3697 }
 0x55f   : > { %v4088_v55 = vsel %vm2020_vm8, %v4056_v27, %v3698_v4  ;;  %v8634_v4 = vld [vmem:[#allocation31_spill] sm:$0xff] }
 0x560   : > { %v3444_v51 = vpop.permute.xlu1 %3443  ;;  %v4840_v59 = vpop.f32.mrf.mxu1 }
 0x561   : > { %v4493_v48 = vadd.f32 %v4840_v59, %v4461_v56  ;;  %v4025_v5 = vsel %vm1954_vm6, %v3993_v25, %v3444_v51  ;;  %v3931_v56 = vsel %vm1855_vm3, %v3899_v32, %v8634_v4  ;;  %v4467_v32 = vld [vmem:[%s5086_s9 + $0x58] sm:$0xff] }
 0x562   : > { %v4317_v28 = vpop.f32.mrf.mxu1  ;;  %v3318_v29 = vpop.permute.xlu0 %3317  ;;  %v3963_v57 = vsel %vm1888_vm4, %v3931_v56, %v8635_v35 }
 0x563   : > { %4525 = vst.msk [vmem:[%s7857_s17 + $0x28] sm:$0xff] %vm279_vm0, %v4493_v48  ;;  %v4492_v61 = vadd.f32 %v4460_v60, %v4317_v28  ;;  %v3994_v14 = vsel %vm1921_vm5, %v3962_v9, %v3318_v29 }
 0x564   : > { %v3446_v18 = vpop.permute.xlu1 %3445 }
 0x565   : > { %4524 = vst.msk [vmem:[%s7857_s17 + $0x20] sm:$0xff] %vm279_vm0, %v4492_v61  ;;  %v4026_v0 = vsel %vm1954_vm6, %v3994_v14, %v3446_v18  ;;  %v4941_v61 = vld [vmem:[#allocation2 + $0x158] sm:$0xff]  ;;  %v8643_v14 = vld [vmem:[#allocation158_spill] sm:$0xff] }
 0x566   : > { %v3826_v3 = vpop.permute.xlu0 %3825  ;;  %v3900_v18 = vsel %vm279_vm0, %v4941_v61, %v8636_v12  ;;  %v4471_v12 = vld [vmem:[%s5086_s9 + $0x78] sm:$0xff] }
 0x567   : > { %v4120_v20 = vsel %vm2053_vm9, %v4088_v55, %v3826_v3  ;;  %v4465_v55 = vld [vmem:[%s5086_s9 + $0x48] sm:$0xff] }
 0x568   : > { %v3574_v62 = vpop.permute.xlu1 %3573  ;;  %4869 = vmatmul.mubr.msk.f32.gmra.mxu1 %vm2091_vm10, %v4120_v20  ;;  %v8637_v3 = vld [vmem:[#allocation62_spill] sm:$0xff] }
 0x569   : > { %v4058_v36 = vsel %vm1987_vm7, %v4026_v0, %v3574_v62  ;;  %v3932_v20 = vsel %vm1855_vm3, %v3900_v18, %v8637_v3  ;;  %v8638_v62 = vld [vmem:[#allocation102_spill] sm:$0xff] }
 0x56a   : > { %v3572_v45 = vpop.permute.xlu0 %3571  ;;  %v3964_v11 = vsel %vm1888_vm4, %v3932_v20, %v8638_v62  ;;  %v4473_v62 = vld [vmem:[%s5086_s9 + $0x88] sm:$0xff] }
 0x56b   : > { %v4057_v50 = vsel %vm1987_vm7, %v4025_v5, %v3572_v45 }
 0x56c   : > { %v3320_v49 = vpop.permute.xlu1 %3319 }
 0x56d   : > { %v3995_v2 = vsel %vm1921_vm5, %v3963_v57, %v3320_v49  ;;  %v4466_v57 = vld [vmem:[%s5086_s9 + $0x50] sm:$0xff] }
 0x56e   : > { %v3700_v13 = vpop.permute.xlu0 %3699 }
 0x56f   : > { %v4089_v47 = vsel %vm2020_vm8, %v4057_v50, %v3700_v13 }
 0x570   : > { %v3828_v22 = vpop.permute.xlu1 %3827 }
 0x571   : > { %v4121_v39 = vsel %vm2053_vm9, %v4089_v47, %v3828_v22 }
 0x572   : > { %4871 = vmatprep.mubr.msk.f32.mxu1 %vm2091_vm10, %v4121_v39  ;;  %v3702_v19 = vpop.permute.xlu0 %3701 }
 0x573   : > { %v4090_v33 = vsel %vm2020_vm8, %v4058_v36, %v3702_v19  ;;  %v3902_v19 = vsel %vm279_vm0, %v4942_v30, %v8639_v6  ;;  %v4479_v30 = vld [vmem:[%s5086_s9 + $0xb8] sm:$0xff] }
 0x574   : > { %v3448_v46 = vpop.permute.xlu1 %3447  ;;  %v4843_v63 = vpop.f32.mrf.mxu1  ;;  %v3934_v9 = vsel %vm1855_vm3, %v3902_v19, %v8641_v44  ;;  %v4478_v19 = vld [vmem:[%s5086_s9 + $0xb0] sm:$0xff]  ;;  %v4481_v44 = vld [vmem:[%s5086_s9 + $0xc8] sm:$0xff] }
 0x575   : > { %v4495_v16 = vadd.f32 %v4843_v63, %v4463_v40  ;;  %v4027_v59 = vsel %vm1954_vm6, %v3995_v2, %v3448_v46  ;;  %v4943_v40 = vld [vmem:[#allocation2 + $0x168] sm:$0xff]  ;;  %v8642_v63 = vld [vmem:[#allocation57_spill] sm:$0xff] }
 0x576   : > { %v4327_v34 = vpop.f32.mrf.mxu1  ;;  %v3322_v1 = vpop.permute.xlu0 %3321  ;;  %v3901_v31 = vsel %vm279_vm0, %v4943_v40, %v8640_v8 }
 0x577   : > { %4527 = vst.msk [vmem:[%s7857_s17 + $0x38] sm:$0xff] %vm279_vm0, %v4495_v16  ;;  %v4494_v17 = vadd.f32 %v4462_v21, %v4327_v34  ;;  %v3996_v53 = vsel %vm1921_vm5, %v3964_v11, %v3322_v1  ;;  %v3933_v21 = vsel %vm1855_vm3, %v3901_v31, %v8642_v63  ;;  %v3966_v16 = vsel %vm1888_vm4, %v3934_v9, %v8643_v14  ;;  %v8644_v34 = vld [vmem:[#allocation99_spill] sm:$0xff] }
 0x578   : > { %v3450_v15 = vpop.permute.xlu1 %3449  ;;  %v3965_v1 = vsel %vm1888_vm4, %v3933_v21, %v8644_v34 }
 0x579   : > { %4526 = vst.msk [vmem:[%s7857_s17 + $0x30] sm:$0xff] %vm279_vm0, %v4494_v17  ;;  %v4028_v49 = vsel %vm1954_vm6, %v3996_v53, %v3450_v15 }
 0x57a   : > { %v3830_v26 = vpop.permute.xlu0 %3829 }
 0x57b   : > { %v4122_v41 = vsel %vm2053_vm9, %v4090_v33, %v3830_v26 }
 0x57c   : > { %v3578_v52 = vpop.permute.xlu1 %3577  ;;  %4872 = vmatmul.mubr.msk.f32.gmra.mxu1 %vm2091_vm10, %v4122_v41 }
 0x57d   : > { %v4060_v50 = vsel %vm1987_vm7, %v4028_v49, %v3578_v52 }
 0x57e   : > { %v3576_v37 = vpop.permute.xlu0 %3575 }
 0x57f   : > { %v4059_v60 = vsel %vm1987_vm7, %v4027_v59, %v3576_v37 }
 0x580   : > { %v3324_v51 = vpop.permute.xlu1 %3323 }
 0x581   : > { %v3997_v15 = vsel %vm1921_vm5, %v3965_v1, %v3324_v51  ;;  %v4482_v1 = vld [vmem:[%s5086_s9 + $0xd0] sm:$0xff] }
 0x582   : > { %v3704_v24 = vpop.permute.xlu0 %3703 }
 0x583   : > { %v4091_v48 = vsel %vm2020_vm8, %v4059_v60, %v3704_v24  ;;  %v4469_v60 = vld [vmem:[%s5086_s9 + $0x68] sm:$0xff] }
 0x584   : > { %v3832_v28 = vpop.permute.xlu1 %3831 }
 0x585   : > { %v4123_v29 = vsel %vm2053_vm9, %v4091_v48, %v3832_v28  ;;  %v4468_v48 = vld [vmem:[%s5086_s9 + $0x60] sm:$0xff] }
 0x586   : > { %4874 = vmatprep.mubr.msk.f32.mxu1 %vm2091_vm10, %v4123_v29  ;;  %v3706_v27 = vpop.permute.xlu0 %3705 }
 0x587   : > { %v4092_v13 = vsel %vm2020_vm8, %v4060_v50, %v3706_v27  ;;  %v4470_v27 = vld [vmem:[%s5086_s9 + $0x70] sm:$0xff]  ;;  %v4477_v50 = vld [vmem:[%s5086_s9 + $0xa8] sm:$0xff] }
 0x588   : > { %v3452_v42 = vpop.permute.xlu1 %3451  ;;  %v4846_v7 = vpop.f32.mrf.mxu1 }
 0x589   : > { %v4497_v45 = vadd.f32 %v4846_v7, %v4465_v55  ;;  %v4029_v36 = vsel %vm1954_vm6, %v3997_v15, %v3452_v42  ;;  %v4472_v42 = vld [vmem:[%s5086_s9 + $0x80] sm:$0xff] }
 0x58a   : > { %v4337_v58 = vpop.f32.mrf.mxu1  ;;  %v3326_v43 = vpop.permute.xlu0 %3325 }
 0x58b   : > { %4529 = vst.msk [vmem:[%s7857_s17 + $0x48] sm:$0xff] %vm279_vm0, %v4497_v45  ;;  %v4496_v25 = vadd.f32 %v4464_v38, %v4337_v58  ;;  %v3998_v17 = vsel %vm1921_vm5, %v3966_v16, %v3326_v43  ;;  %v4475_v45 = vld [vmem:[%s5086_s9 + $0x98] sm:$0xff]  ;;  %v4474_v43 = vld [vmem:[%s5086_s9 + $0x90] sm:$0xff] }
 0x58c   : > { %v3454_v5 = vpop.permute.xlu1 %3453  ;;  %v4483_v16 = vld [vmem:[%s5086_s9 + $0xd8] sm:$0xff] }
 0x58d   : > { %4528 = vst.msk [vmem:[%s7857_s17 + $0x40] sm:$0xff] %vm279_vm0, %v4496_v25  ;;  %v4030_v33 = vsel %vm1954_vm6, %v3998_v17, %v3454_v5 }
 0x58e   : > { %v3834_v47 = vpop.permute.xlu0 %3833 }
 0x58f   : > { %v4124_v22 = vsel %vm2053_vm9, %v4092_v13, %v3834_v47  ;;  %v4476_v47 = vld [vmem:[%s5086_s9 + $0xa0] sm:$0xff] }
 0x590   : > { %v3582_v39 = vpop.permute.xlu1 %3581  ;;  %4875 = vmatmul.mubr.msk.f32.gmra.mxu1 %vm2091_vm10, %v4124_v22 }
 0x591   : > { %v4062_v52 = vsel %vm1987_vm7, %v4030_v33, %v3582_v39 }
 0x592   : > { %v3580_v23 = vpop.permute.xlu0 %3579 }
 0x593   : > { %v4061_v26 = vsel %vm1987_vm7, %v4029_v36, %v3580_v23  ;;  %v4485_v36 = vld [vmem:[%s5086_s9 + $0xe8] sm:$0xff] }
 0x594   : > { %v3710_v46 = vpop.permute.xlu1 %3709 }
 0x595   : > { %v4094_v4 = vsel %vm2020_vm8, %v4062_v52, %v3710_v46  ;;  %v4480_v46 = vld [vmem:[%s5086_s9 + $0xc0] sm:$0xff] }
 0x596   : > { %v3708_v0 = vpop.permute.xlu0 %3707 }
 0x597   : > { %v4093_v10 = vsel %vm2020_vm8, %v4061_v26, %v3708_v0  ;;  %v4484_v26 = vld [vmem:[%s5086_s9 + $0xe0] sm:$0xff] }
 0x598   : > { %v3838_v41 = vpop.permute.xlu1 %3837 }
 0x599   : > { %v4126_v37 = vsel %vm2053_vm9, %v4094_v4, %v3838_v41  ;;  %v4486_v4 = vld [vmem:[%s5086_s9 + $0xf0] sm:$0xff] }
 0x59a   : > { %v3836_v54 = vpop.permute.xlu0 %3835 }
 0x59b   : > { %v4125_v56 = vsel %vm2053_vm9, %v4093_v10, %v3836_v54  ;;  %v4487_v54 = vld [vmem:[%s5086_s9 + $0xf8] sm:$0xff] }
 0x59c   : > { %v4849_v35 = vpop.f32.mrf.mxu1  ;;  %4877 = vmatprep.mubr.msk.f32.mxu1 %vm2091_vm10, %v4125_v56 }
 0x59d   : > { %v4499_v2 = vadd.f32 %v4849_v35, %v4467_v32  ;;  %4878 = vmatmul.mubr.msk.f32.gmra.mxu1 %vm2091_vm10, %v4126_v37 }
 0x59e   : > { %v4347_v51 = vpop.f32.mrf.mxu1 }
 0x59f   : > { %4531 = vst.msk [vmem:[%s7857_s17 + $0x58] sm:$0xff] %vm279_vm0, %v4499_v2  ;;  %v4498_v59 = vadd.f32 %v4466_v57, %v4347_v51 }
 0x5a1   : > { %4530 = vst.msk [vmem:[%s7857_s17 + $0x50] sm:$0xff] %vm279_vm0, %v4498_v59 }
 0x5b0   : > { %v4852_v24 = vpop.f32.mrf.mxu1 }
 0x5b1   : > { %v4501_v28 = vadd.f32 %v4852_v24, %v4469_v60 }
 0x5b2   : > { %v4357_v29 = vpop.f32.mrf.mxu1 }
 0x5b3   : > { %4533 = vst.msk [vmem:[%s7857_s17 + $0x68] sm:$0xff] %vm279_vm0, %v4501_v28  ;;  %v4500_v61 = vadd.f32 %v4468_v48, %v4357_v29 }
 0x5b5   : > { %4532 = vst.msk [vmem:[%s7857_s17 + $0x60] sm:$0xff] %vm279_vm0, %v4500_v61 }
 0x5c4   : > { %v4855_v18 = vpop.f32.mrf.mxu1 }
 0x5c5   : > { %v4503_v55 = vadd.f32 %v4855_v18, %v4471_v12 }
 0x5c6   : > { %v4367_v3 = vpop.f32.mrf.mxu1 }
 0x5c7   : > { %4535 = vst.msk [vmem:[%s7857_s17 + $0x78] sm:$0xff] %vm279_vm0, %v4503_v55  ;;  %v4502_v20 = vadd.f32 %v4470_v27, %v4367_v3 }
 0x5c9   : > { %4534 = vst.msk [vmem:[%s7857_s17 + $0x70] sm:$0xff] %vm279_vm0, %v4502_v20 }
 0x5d8   : > { %v4858_v11 = vpop.f32.mrf.mxu1 }
 0x5d9   : > { %v4505_v7 = vadd.f32 %v4858_v11, %v4473_v62 }
 0x5da   : > { %v4377_v38 = vpop.f32.mrf.mxu1 }
 0x5db   : > { %4537 = vst.msk [vmem:[%s7857_s17 + $0x88] sm:$0xff] %vm279_vm0, %v4505_v7  ;;  %v4504_v53 = vadd.f32 %v4472_v42, %v4377_v38 }
 0x5dd   : > { %4536 = vst.msk [vmem:[%s7857_s17 + $0x80] sm:$0xff] %vm279_vm0, %v4504_v53 }
 0x5ec   : > { %v4861_v58 = vpop.f32.mrf.mxu1 }
 0x5ed   : > { %v4507_v25 = vadd.f32 %v4861_v58, %v4475_v45 }
 0x5ee   : > { %v4387_v49 = vpop.f32.mrf.mxu1 }
 0x5ef   : > { %4539 = vst.msk [vmem:[%s7857_s17 + $0x98] sm:$0xff] %vm279_vm0, %v4507_v25  ;;  %v4506_v5 = vadd.f32 %v4474_v43, %v4387_v49 }
 0x5f1   : > { %4538 = vst.msk [vmem:[%s7857_s17 + $0x90] sm:$0xff] %vm279_vm0, %v4506_v5 }
 0x600   : > { %v4864_v13 = vpop.f32.mrf.mxu1 }
 0x601   : > { %v4509_v22 = vadd.f32 %v4864_v13, %v4477_v50 }
 0x602   : > { %v4397_v39 = vpop.f32.mrf.mxu1 }
 0x603   : > { %4541 = vst.msk [vmem:[%s7857_s17 + $0xa8] sm:$0xff] %vm279_vm0, %v4509_v22  ;;  %v4508_v23 = vadd.f32 %v4476_v47, %v4397_v39 }
 0x605   : > { %4540 = vst.msk [vmem:[%s7857_s17 + $0xa0] sm:$0xff] %vm279_vm0, %v4508_v23 }
 0x614   : > { %v4867_v6 = vpop.f32.mrf.mxu1 }
 0x615   : > { %v4511_v40 = vadd.f32 %v4867_v6, %v4479_v30 }
 0x616   : > { %v4407_v8 = vpop.f32.mrf.mxu1 }
 0x617   : > { %4543 = vst.msk [vmem:[%s7857_s17 + $0xb8] sm:$0xff] %vm279_vm0, %v4511_v40  ;;  %v4510_v31 = vadd.f32 %v4478_v19, %v4407_v8 }
 0x619   : > { %4542 = vst.msk [vmem:[%s7857_s17 + $0xb0] sm:$0xff] %vm279_vm0, %v4510_v31 }
 0x628   : > { %v4870_v9 = vpop.f32.mrf.mxu1 }
 0x629   : > { %v4513_v63 = vadd.f32 %v4870_v9, %v4481_v44 }
 0x62a   : > { %v4417_v21 = vpop.f32.mrf.mxu1 }
 0x62b   : > { %4545 = vst.msk [vmem:[%s7857_s17 + $0xc8] sm:$0xff] %vm279_vm0, %v4513_v63  ;;  %v4512_v14 = vadd.f32 %v4480_v46, %v4417_v21 }
 0x62d   : > { %4544 = vst.msk [vmem:[%s7857_s17 + $0xc0] sm:$0xff] %vm279_vm0, %v4512_v14 }
 0x63c   : > { %v4873_v34 = vpop.f32.mrf.mxu1 }
 0x63d   : > { %v4515_v17 = vadd.f32 %v4873_v34, %v4483_v16 }
 0x63e   : > { %v4427_v0 = vpop.f32.mrf.mxu1 }
 0x63f   : > { %4547 = vst.msk [vmem:[%s7857_s17 + $0xd8] sm:$0xff] %vm279_vm0, %v4515_v17  ;;  %v4514_v15 = vadd.f32 %v4482_v1, %v4427_v0 }
 0x641   : > { %4546 = vst.msk [vmem:[%s7857_s17 + $0xd0] sm:$0xff] %vm279_vm0, %v4514_v15 }
 0x650   : > { %v4876_v33 = vpop.f32.mrf.mxu1 }
 0x651   : > { %v4517_v41 = vadd.f32 %v4876_v33, %v4485_v36 }
 0x652   : > { %v4437_v52 = vpop.f32.mrf.mxu1 }
 0x653   : > { %4549 = vst.msk [vmem:[%s7857_s17 + $0xe8] sm:$0xff] %vm279_vm0, %v4517_v41  ;;  %v4516_v10 = vadd.f32 %v4484_v26, %v4437_v52 }
 0x655   : > { %4548 = vst.msk [vmem:[%s7857_s17 + $0xe0] sm:$0xff] %vm279_vm0, %v4516_v10 }
 0x65d   : > { %v4879_v32 = vpop.f32.mrf.mxu1 }
 0x65e   : > { %v4519_v56 = vadd.f32 %v4879_v32, %v4487_v54 }
 0x65f   : > { %v4447_v37 = vpop.f32.mrf.mxu1 }
 0x660   : > { %4551 = vst.msk [vmem:[%s7857_s17 + $0xf8] sm:$0xff] %vm279_vm0, %v4519_v56  ;;  %v4518_v35 = vadd.f32 %v4486_v4, %v4447_v37 }
 0x662   : > { %4550 = vst.msk [vmem:[%s7857_s17 + $0xf0] sm:$0xff] %vm279_vm0, %v4518_v35 }
 0x663 PF: > { %s17_s24 = sadd.s32 1, %s4950_s24  }
 0x664   : > { %p14_p4 = scmp.ge.s32.totalorder %s17_s24, 4  }
 0x666   :  { %16 = sbr.rel (!%p14_p4) target bundleno = 1 (0x1), region = 80 }

</bundles_post_ra>
